<compile_context>
chip_gen: v5e
topology: v5e:2x2
jax: 0.10.0
libtpu: 0.0.40
codegen_flags: <defaults>
</compile_context>

<pallas_src>
import functools

import jax
import jax.numpy as jnp
from jax import lax
from jax.experimental import pallas as pl
from jax.experimental.pallas import tpu as pltpu

_EPS = 1e-5


def _rup(n, m):
    return ((n + m - 1) // m) * m


def _bn_normalize(t, axes, m):
    """BatchNorm (affine=False, training-mode stats) over `axes`, fused pass.

    var = E[t^2] - mean^2, clamped at 0.
    TODO(synk): single-pass variance can lose precision vs. the two-pass form
    when |mean| >> std; validate at production shapes.
    """
    s1 = jnp.sum(t, axis=axes, keepdims=True)
    s2 = jnp.sum(t * t, axis=axes, keepdims=True)
    mu = s1 * (1.0 / m)
    var = jnp.maximum(s2 * (1.0 / m) - mu * mu, 0.0)
    return (t - mu) * lax.rsqrt(var + _EPS)


def _pool_branch_kernel(x_ref, w_ref, o_ref, *scratch, pool_type, K, S, P,
                        H, W, OH, OW, matmul_dtype):
    N = x_ref.shape[0]
    Cin = x_ref.shape[3]
    tC = w_ref.shape[1]
    M = N * H * W
    f32 = jnp.float32

    # ---- 1x1 conv (bias=False) == channel matmul on the MXU (bf16 in, f32 acc)
    # In-kernel cast: no separate HBM cast pass in the wrapper.  The flatten
    # only merges leading dims with the sublane dim (layout no-op for W%8==0).
    x2d = x_ref[...].astype(matmul_dtype).reshape(M, Cin)
    y2d = jnp.dot(x2d, w_ref[...].astype(matmul_dtype),
                  preferred_element_type=f32)                       # (M, tC)

    # ---- BN1 (affine=False, batch stats) + ReLU ----
    yr = jnp.maximum(_bn_normalize(y2d, (0,), float(M)), 0.0)       # (M, tC)

    is_max = pool_type == "max"
    pad_val = -jnp.inf if is_max else 0.0
    red = jnp.maximum if is_max else jnp.add

    if not scratch:
        # ---- separable stride-1 pooling on the flat (M, tC) activation ----
        # Flat row r maps to (n, h, w) with w = r mod W, h*W + w = r mod (H*W).
        # Both index tables come from native sublane iotas (hoisted once).
        w_idx = lax.broadcasted_iota(jnp.int32, (N, H, W, 1), 2).reshape(M, 1)
        q_idx = lax.broadcasted_iota(jnp.int32, (N, H * W, 1), 1).reshape(M, 1)

        def shifted(v, d, idx, span):
            # out[r] = v[r + d] where 0 <= idx[r] + d < span, else pad_val.
            # The roll wrap-around only lands in masked (pad) positions.
            if d == 0:
                return v
            rolled = pltpu.roll(v, shift=(-d) % M, axis=0)
            valid = jnp.logical_and(idx >= -d, idx < span - d)
            return jnp.where(valid, rolled, pad_val)

        acc_w = None                                  # K passes along W
        for kw in range(K):
            c = shifted(yr, kw - P, w_idx, W)
            acc_w = c if acc_w is None else red(acc_w, c)
        pooled = None                                 # K passes along H
        for kh in range(K):
            c = shifted(acc_w, (kh - P) * W, q_idx, H * W)
            pooled = c if pooled is None else red(pooled, c)

        if pool_type == "avg":
            # count_include_pad=False: reciprocal of the per-window valid
            # count, built from the hoisted flat indices (h*W = q_idx - w_idx),
            # so inv_cnt = W / (cnt_w * (W * cnt_h)) -- no integer division.
            cnt_w = (jnp.minimum(w_idx + (K - P), W)
                     - jnp.maximum(w_idx - P, 0))
            hW = q_idx - w_idx
            cntW_h = (jnp.minimum(hW + (K - P) * W, H * W)
                      - jnp.maximum(hW - P * W, 0))
            pooled = pooled * (jnp.float32(W) / (cnt_w * cntW_h).astype(f32))

        if OH == H and OW == W:
            # 'same' pooling (typical ENAS config): BN2 straight from the flat
            # layout, normalize folded into the store (leading-dim split only).
            out = _bn_normalize(pooled, (0,), float(M))
            o_ref[...] = out.reshape(N, OH, OW, tC).astype(o_ref.dtype)
            return
        pooled4 = pooled.reshape(N, H, W, tC)[:, :OH, :OW, :]
    else:
        # ---- general fallback (stride > 1, or output wider than input) via a
        # padded VMEM scratch.  Slow path (strided sublane reads, masked
        # partial stores).
        # TODO(synk): unverified by the self-test (stride=1 only); a production
        # S>1 path should pool stride-1 separably and subsample.
        y4 = yr.reshape(N, H, W, tC)
        ypad = scratch[0]
        HP, WP = H + 2 * P, W + 2 * P
        if P > 0:
            ypad[:, :P, :, :] = jnp.full((N, P, WP, tC), pad_val, f32)
            ypad[:, HP - P:, :, :] = jnp.full((N, P, WP, tC), pad_val, f32)
            ypad[:, :, :P, :] = jnp.full((N, HP, P, tC), pad_val, f32)
            ypad[:, :, WP - P:, :] = jnp.full((N, HP, P, tC), pad_val, f32)
        ypad[:, P:P + H, P:P + W, :] = y4
        pooled4 = None
        for kh in range(K):
            for kw in range(K):
                hs = pl.ds(kh, OH, S) if S > 1 else pl.ds(kh, OH)
                ws = pl.ds(kw, OW, S) if S > 1 else pl.ds(kw, OW)
                win = ypad[:, hs, ws, :]
                pooled4 = win if pooled4 is None else red(pooled4, win)
        if pool_type == "avg":
            oh_i = lax.broadcasted_iota(jnp.int32, (1, OH, OW, 1), 1)
            ow_i = lax.broadcasted_iota(jnp.int32, (1, OH, OW, 1), 2)
            cnt_h = (jnp.minimum(oh_i * S - P + K, H)
                     - jnp.maximum(oh_i * S - P, 0))
            cnt_w = (jnp.minimum(ow_i * S - P + K, W)
                     - jnp.maximum(ow_i * S - P, 0))
            pooled4 = pooled4 * (1.0 / (cnt_h * cnt_w).astype(f32))

    # ---- BN2 (affine=False), fused stats, folded into the 4-D store ----
    out = _bn_normalize(pooled4, (0, 1, 2), float(N * OH * OW))
    o_ref[...] = out.astype(o_ref.dtype)


def pool_branch_nhwc(x_nhwc, w_mat, *, pool_type, kernel_size, stride, padding,
                     matmul_dtype=jnp.bfloat16):
    """NHWC-native entry point.  x_nhwc: (N, H, W, Cin); w_mat: (Cin, Cout)."""
    N, H, W, Cin = x_nhwc.shape
    Cout = w_mat.shape[1]
    K, S, P = int(kernel_size), int(stride), int(padding)
    pool_type = pool_type.lower()
    if pool_type not in ("max", "avg"):
        raise ValueError(f"unsupported pool_type: {pool_type}")
    if P > K // 2:
        # PyTorch enforces the same rule; it also guarantees every pooling
        # window has >= 1 valid element (no -inf / divide-by-zero into BN2).
        raise ValueError("padding must be <= kernel_size // 2")
    OH = (H + 2 * P - K) // S + 1
    OW = (W + 2 * P - K) // S + 1
    if OH <= 0 or OW <= 0:
        raise ValueError("pooling output size must be positive")

    # ---- per-generation VMEM budget -------------------------------------
    try:
        vmem_cap = int(pltpu.get_tpu_info().vmem_capacity_bytes)
    except Exception:  # pragma: no cover - conservative (v7x-sized) default
        vmem_cap = 64 * 1024 * 1024
    budget = int(vmem_cap * 0.82)   # ~105 MiB on v5e/v6e, ~52 MiB on v7x

    use_fallback = (S != 1) or (OW > W)
    xb = x_nhwc.dtype.itemsize
    wb = w_mat.dtype.itemsize

    def est_bytes(tc, n_x_buf):
        x_t = N * H * _rup(W, 8) * _rup(Cin, 128) * xb
        w_t = _rup(Cin, 8) * _rup(tc, 128) * wb
        o_t = N * OH * _rup(OW, 8) * _rup(tc, 128) * 4
        slab = N * (H + 2 * P) * _rup(W + 2 * P, 8) * _rup(tc, 128) * 4
        n_slab = 6 if use_fallback else 5
        return n_x_buf * x_t + 2 * (w_t + o_t) + n_slab * slab, x_t

    # C_out tile: 256 fills the 256-wide MXU on v6e/v7x when it divides Cout
    # and the footprint fits the budget; else lane-dense 128; else whole Cout.
    # (On v5e's 128-wide MXU a 256 tile is compute-neutral but costs VMEM.)
    if Cout % 256 == 0 and est_bytes(256, 2)[0] <= budget:
        tC = 256
    elif Cout % 128 == 0:
        tC = 128
    else:
        tC = Cout
    n_j = Cout // tC

    _, x_tile = est_bytes(tC, 2)
    # Single-buffer the resident x tile when double-buffering it would eat a
    # large share of the budget (matters on v7x's 64 MiB part).
    single_buffer_x = 2 * x_tile > budget // 4
    n_x_buf = 1 if single_buffer_x else 2
    est, _ = est_bytes(tC, n_x_buf)
    vmem_limit = int(min(max(est, 32 * 1024 * 1024), budget))

    scratch_shapes = []
    if use_fallback:
        scratch_shapes.append(
            pltpu.VMEM((N, H + 2 * P, W + 2 * P, tC), jnp.float32))

    kernel = functools.partial(
        _pool_branch_kernel, pool_type=pool_type, K=K, S=S, P=P,
        H=H, W=W, OH=OH, OW=OW, matmul_dtype=matmul_dtype)

    x_map = lambda j: (0, 0, 0, 0)     # resident x: loaded once, reused per j
    if single_buffer_x:
        try:
            x_spec = pl.BlockSpec((N, H, W, Cin), x_map,
                                  pipeline_mode=pl.Buffered(1))
        except Exception:  # pipeline_mode unsupported -> default buffering
            x_spec = pl.BlockSpec((N, H, W, Cin), x_map)
    else:
        x_spec = pl.BlockSpec((N, H, W, Cin), x_map)

    cost = pl.CostEstimate(
        flops=2 * N * H * W * Cin * Cout,
        transcendentals=2 * Cout,
        bytes_accessed=(x_nhwc.size * xb + w_mat.size * wb
                        + N * OH * OW * Cout * 4))

    return pl.pallas_call(
        kernel,
        out_shape=jax.ShapeDtypeStruct((N, OH, OW, Cout), jnp.float32),
        grid=(n_j,),
        in_specs=[
            x_spec,
            pl.BlockSpec((Cin, tC), lambda j: (0, j)),
        ],
        out_specs=pl.BlockSpec((N, OH, OW, tC), lambda j: (0, 0, 0, j)),
        scratch_shapes=scratch_shapes,
        compiler_params=pltpu.CompilerParams(
            # NOTE: with n_j == 1 megacore (v7x) has nothing to shard.
            dimension_semantics=("parallel",),
            vmem_limit_bytes=vmem_limit),
        cost_estimate=cost,
    )(x_nhwc, w_mat)


@functools.partial(jax.jit, static_argnames=("pool_type", "kernel_size",
                                             "stride", "padding"))
def pool_branch(x_nchw, conv_w, *, pool_type, kernel_size, stride, padding):
    """PyTorch-parity entry: x (N, Cin, H, W), conv_w (Cout, Cin, 1, 1).

    Prefer pool_branch_nhwc in an NHWC pipeline: the two boundary transposes
    here each cost a full HBM round trip on a bandwidth-bound op.
    """
    N, Cin, H, W = x_nchw.shape
    Cout = conv_w.shape[0]
    x_nhwc = jnp.transpose(x_nchw, (0, 2, 3, 1))
    w_mat = conv_w.reshape(Cout, Cin).T
    out_nhwc = pool_branch_nhwc(x_nhwc, w_mat, pool_type=pool_type,
                                kernel_size=kernel_size, stride=stride,
                                padding=padding)
    return jnp.transpose(out_nhwc, (0, 3, 1, 2))


def _ref_pool_branch(x_nchw, conv_w, *, pool_type, kernel_size, stride, padding):
    """Pure-JAX reference mirroring the kernel numerics (bf16 matmul operands)."""
    N, Cin, H, W = x_nchw.shape
    Cout = conv_w.shape[0]
    K, S, P = kernel_size, stride, padding
    OH = (H + 2 * P - K) // S + 1
    OW = (W + 2 * P - K) // S + 1
    x = jnp.transpose(x_nchw, (0, 2, 3, 1)).astype(jnp.bfloat16)
    wm = conv_w.reshape(Cout, Cin).T.astype(jnp.bfloat16)
    y = jnp.einsum("nhwc,co->nhwo", x, wm, preferred_element_type=jnp.float32)
    mu = jnp.mean(y, axis=(0, 1, 2), keepdims=True)
    var = jnp.mean((y - mu) ** 2, axis=(0, 1, 2), keepdims=True)
    y = jnp.maximum((y - mu) * lax.rsqrt(var + _EPS), 0.0)
    pad_val = -jnp.inf if pool_type == "max" else 0.0
    yp = jnp.pad(y, ((0, 0), (P, P), (P, P), (0, 0)), constant_values=pad_val)
    acc = None
    for kh in range(K):
        for kw in range(K):
            win = yp[:, kh:kh + S * (OH - 1) + 1:S, kw:kw + S * (OW - 1) + 1:S, :]
            if acc is None:
                acc = win
            elif pool_type == "max":
                acc = jnp.maximum(acc, win)
            else:
                acc = acc + win
    if pool_type == "avg":
        oh = jnp.arange(OH)[:, None]
        ow = jnp.arange(OW)[None, :]
        cnt_h = jnp.minimum(oh * S - P + K, H) - jnp.maximum(oh * S - P, 0)
        cnt_w = jnp.minimum(ow * S - P + K, W) - jnp.maximum(ow * S - P, 0)
        acc = acc / (cnt_h * cnt_w).astype(jnp.float32)[None, :, :, None]
    mu2 = jnp.mean(acc, axis=(0, 1, 2), keepdims=True)
    var2 = jnp.mean((acc - mu2) ** 2, axis=(0, 1, 2), keepdims=True)
    out = (acc - mu2) * lax.rsqrt(var2 + _EPS)
    return jnp.transpose(out, (0, 3, 1, 2))


if __name__ == "__main__":
    key = jax.random.PRNGKey(0)
    kx, kw = jax.random.split(key)

    N, Cin, Cout, H, W = 2, 4, 8, 16, 16
    x = jax.random.normal(kx, (N, Cin, H, W), dtype=jnp.float32)
    # Deterministic synthetic Conv2d(Cin, Cout, 1, bias=False) weight.
    conv_w = 0.1 * jax.random.normal(kw, (Cout, Cin, 1, 1), dtype=jnp.float32)

    for ptype in ("max", "avg"):
        out = pool_branch(x, conv_w, pool_type=ptype,
                          kernel_size=3, stride=1, padding=1)
        ref = _ref_pool_branch(x, conv_w, pool_type=ptype,
                               kernel_size=3, stride=1, padding=1)
        jax.block_until_ready((out, ref))
        assert out.shape == (N, Cout, H, W)
        assert bool(jnp.isfinite(out).all())
        err = float(jnp.max(jnp.abs(out - ref)))
        assert err < 5e-3, f"{ptype} pool mismatch vs reference: max|err|={err}"

    print("KERNEL_OK")
</pallas_src>

<mosaic_0001>
module attributes {stable_mosaic.version = 11 : i64} {
  func.func @_pool_branch_kernel(%arg0: i32, %arg1: memref<2x16x16x4xf32, #tpu.memory_space<vmem>>, %arg2: memref<4x8xf32, #tpu.memory_space<vmem>>, %arg3: memref<2x16x16x8xf32, #tpu.memory_space<vmem>>) attributes {dimension_semantics = [#tpu.dimension_semantics<parallel>], iteration_bounds = array<i64: 1>, scalar_prefetch = 0 : i64, scratch_operands = 0 : i64, tpu.core_type = #tpu.core_type<tc>, window_params = [{pipeline_mode = #tpu.pipeline_mode<synchronous>, transform_indices = @transform_0, window_bounds = array<i64: 2, 16, 16, 4>}, {transform_indices = @transform_1, window_bounds = array<i64: 4, 8>}, {transform_indices = @transform_2, window_bounds = array<i64: 2, 16, 16, 8>}]} {
    %c0 = arith.constant 0 : index
    %c0_0 = arith.constant 0 : index
    %c0_1 = arith.constant 0 : index
    %c0_2 = arith.constant 0 : index
    %0 = vector.load %arg1[%c0, %c0_0, %c0_1, %c0_2] : memref<2x16x16x4xf32, #tpu.memory_space<vmem>>, vector<2x16x16x4xf32>
    %1 = arith.truncf %0 : vector<2x16x16x4xf32> to vector<2x16x16x4xbf16>
    %2 = vector.shape_cast %1 : vector<2x16x16x4xbf16> to vector<512x4xbf16>
    %c0_3 = arith.constant 0 : index
    %c0_4 = arith.constant 0 : index
    %3 = vector.load %arg2[%c0_3, %c0_4] : memref<4x8xf32, #tpu.memory_space<vmem>>, vector<4x8xf32>
    %4 = arith.truncf %3 : vector<4x8xf32> to vector<4x8xbf16>
    %cst = arith.constant dense<0.000000e+00> : vector<512x8xf32>
    %5 = tpu.matmul %2, %4, %cst {dimension_numbers = #tpu.dot_dimension_numbers<[1], [0], [0], [1], [0, 0, 1, 1], [], []>} : vector<512x4xbf16>, vector<4x8xbf16>, vector<512x8xf32> -> vector<512x8xf32>
    %cst_5 = arith.constant dense<0.000000e+00> : vector<8xf32>
    %6 = vector.multi_reduction <add>, %5, %cst_5 [0] : vector<512x8xf32> to vector<8xf32>
    %7 = vector.shape_cast %6 : vector<8xf32> to vector<1x8xf32>
    %8 = arith.mulf %5, %5 : vector<512x8xf32>
    %cst_6 = arith.constant dense<0.000000e+00> : vector<8xf32>
    %9 = vector.multi_reduction <add>, %8, %cst_6 [0] : vector<512x8xf32> to vector<8xf32>
    %10 = vector.shape_cast %9 : vector<8xf32> to vector<1x8xf32>
    %cst_7 = arith.constant 0.001953125 : f32
    %11 = vector.broadcast %cst_7 : f32 to vector<1x8xf32>
    %12 = arith.mulf %7, %11 : vector<1x8xf32>
    %cst_8 = arith.constant 0.001953125 : f32
    %13 = vector.broadcast %cst_8 : f32 to vector<1x8xf32>
    %14 = arith.mulf %10, %13 : vector<1x8xf32>
    %15 = arith.mulf %12, %12 : vector<1x8xf32>
    %16 = arith.subf %14, %15 : vector<1x8xf32>
    %cst_9 = arith.constant 0.000000e+00 : f32
    %17 = vector.broadcast %cst_9 : f32 to vector<1x8xf32>
    %18 = arith.maximumf %16, %17 : vector<1x8xf32>
    %19 = vector.broadcast %12 : vector<1x8xf32> to vector<512x8xf32>
    %20 = arith.subf %5, %19 : vector<512x8xf32>
    %cst_10 = arith.constant 9.99999974E-6 : f32
    %21 = vector.broadcast %cst_10 : f32 to vector<1x8xf32>
    %22 = arith.addf %18, %21 : vector<1x8xf32>
    %23 = math.rsqrt %22 : vector<1x8xf32>
    %24 = vector.broadcast %23 : vector<1x8xf32> to vector<512x8xf32>
    %25 = arith.mulf %20, %24 : vector<512x8xf32>
    %cst_11 = arith.constant 0.000000e+00 : f32
    %26 = vector.broadcast %cst_11 : f32 to vector<512x8xf32>
    %27 = arith.maximumf %25, %26 : vector<512x8xf32>
    %28 = tpu.iota {dimensions = array<i32: 2>} : vector<2x16x16x1xi32>
    %29 = vector.shape_cast %28 : vector<2x16x16x1xi32> to vector<512x1xi32>
    %30 = tpu.iota {dimensions = array<i32: 1>} : vector<2x256x1xi32>
    %31 = vector.shape_cast %30 : vector<2x256x1xi32> to vector<512x1xi32>
    %c1_i32 = arith.constant 1 : i32
    %32 = tpu.dynamic_rotate %27 by %c1_i32 dim 0 : vector<512x8xf32>, i32 -> vector<512x8xf32>
    %c1_i32_12 = arith.constant 1 : i32
    %33 = vector.broadcast %c1_i32_12 : i32 to vector<512x1xi32>
    %34 = arith.cmpi sge, %29, %33 : vector<512x1xi32>
    %c17_i32 = arith.constant 17 : i32
    %35 = vector.broadcast %c17_i32 : i32 to vector<512x1xi32>
    %36 = arith.cmpi slt, %29, %35 : vector<512x1xi32>
    %37 = arith.andi %34, %36 : vector<512x1xi1>
    %cst_13 = arith.constant 0xFF800000 : f32
    %38 = vector.shape_cast %37 : vector<512x1xi1> to vector<512x1xi1>
    %39 = vector.broadcast %38 : vector<512x1xi1> to vector<512x8xi1>
    %40 = vector.broadcast %cst_13 : f32 to vector<512x8xf32>
    %41 = arith.select %39, %32, %40 : vector<512x8xi1>, vector<512x8xf32>
    %42 = arith.maximumf %41, %27 : vector<512x8xf32>
    %c511_i32 = arith.constant 511 : i32
    %43 = tpu.dynamic_rotate %27 by %c511_i32 dim 0 : vector<512x8xf32>, i32 -> vector<512x8xf32>
    %c-1_i32 = arith.constant -1 : i32
    %44 = vector.broadcast %c-1_i32 : i32 to vector<512x1xi32>
    %45 = arith.cmpi sge, %29, %44 : vector<512x1xi32>
    %c15_i32 = arith.constant 15 : i32
    %46 = vector.broadcast %c15_i32 : i32 to vector<512x1xi32>
    %47 = arith.cmpi slt, %29, %46 : vector<512x1xi32>
    %48 = arith.andi %45, %47 : vector<512x1xi1>
    %cst_14 = arith.constant 0xFF800000 : f32
    %49 = vector.shape_cast %48 : vector<512x1xi1> to vector<512x1xi1>
    %50 = vector.broadcast %49 : vector<512x1xi1> to vector<512x8xi1>
    %51 = vector.broadcast %cst_14 : f32 to vector<512x8xf32>
    %52 = arith.select %50, %43, %51 : vector<512x8xi1>, vector<512x8xf32>
    %53 = arith.maximumf %42, %52 : vector<512x8xf32>
    %c16_i32 = arith.constant 16 : i32
    %54 = tpu.dynamic_rotate %53 by %c16_i32 dim 0 : vector<512x8xf32>, i32 -> vector<512x8xf32>
    %c16_i32_15 = arith.constant 16 : i32
    %55 = vector.broadcast %c16_i32_15 : i32 to vector<512x1xi32>
    %56 = arith.cmpi sge, %31, %55 : vector<512x1xi32>
    %c272_i32 = arith.constant 272 : i32
    %57 = vector.broadcast %c272_i32 : i32 to vector<512x1xi32>
    %58 = arith.cmpi slt, %31, %57 : vector<512x1xi32>
    %59 = arith.andi %56, %58 : vector<512x1xi1>
    %cst_16 = arith.constant 0xFF800000 : f32
    %60 = vector.shape_cast %59 : vector<512x1xi1> to vector<512x1xi1>
    %61 = vector.broadcast %60 : vector<512x1xi1> to vector<512x8xi1>
    %62 = vector.broadcast %cst_16 : f32 to vector<512x8xf32>
    %63 = arith.select %61, %54, %62 : vector<512x8xi1>, vector<512x8xf32>
    %64 = arith.maximumf %63, %53 : vector<512x8xf32>
    %c496_i32 = arith.constant 496 : i32
    %65 = tpu.dynamic_rotate %53 by %c496_i32 dim 0 : vector<512x8xf32>, i32 -> vector<512x8xf32>
    %c-16_i32 = arith.constant -16 : i32
    %66 = vector.broadcast %c-16_i32 : i32 to vector<512x1xi32>
    %67 = arith.cmpi sge, %31, %66 : vector<512x1xi32>
    %c240_i32 = arith.constant 240 : i32
    %68 = vector.broadcast %c240_i32 : i32 to vector<512x1xi32>
    %69 = arith.cmpi slt, %31, %68 : vector<512x1xi32>
    %70 = arith.andi %67, %69 : vector<512x1xi1>
    %cst_17 = arith.constant 0xFF800000 : f32
    %71 = vector.shape_cast %70 : vector<512x1xi1> to vector<512x1xi1>
    %72 = vector.broadcast %71 : vector<512x1xi1> to vector<512x8xi1>
    %73 = vector.broadcast %cst_17 : f32 to vector<512x8xf32>
    %74 = arith.select %72, %65, %73 : vector<512x8xi1>, vector<512x8xf32>
    %75 = arith.maximumf %64, %74 : vector<512x8xf32>
    %cst_18 = arith.constant dense<0.000000e+00> : vector<8xf32>
    %76 = vector.multi_reduction <add>, %75, %cst_18 [0] : vector<512x8xf32> to vector<8xf32>
    %77 = vector.shape_cast %76 : vector<8xf32> to vector<1x8xf32>
    %78 = arith.mulf %75, %75 : vector<512x8xf32>
    %cst_19 = arith.constant dense<0.000000e+00> : vector<8xf32>
    %79 = vector.multi_reduction <add>, %78, %cst_19 [0] : vector<512x8xf32> to vector<8xf32>
    %80 = vector.shape_cast %79 : vector<8xf32> to vector<1x8xf32>
    %cst_20 = arith.constant 0.001953125 : f32
    %81 = vector.broadcast %cst_20 : f32 to vector<1x8xf32>
    %82 = arith.mulf %77, %81 : vector<1x8xf32>
    %cst_21 = arith.constant 0.001953125 : f32
    %83 = vector.broadcast %cst_21 : f32 to vector<1x8xf32>
    %84 = arith.mulf %80, %83 : vector<1x8xf32>
    %85 = arith.mulf %82, %82 : vector<1x8xf32>
    %86 = arith.subf %84, %85 : vector<1x8xf32>
    %cst_22 = arith.constant 0.000000e+00 : f32
    %87 = vector.broadcast %cst_22 : f32 to vector<1x8xf32>
    %88 = arith.maximumf %86, %87 : vector<1x8xf32>
    %89 = vector.broadcast %82 : vector<1x8xf32> to vector<512x8xf32>
    %90 = arith.subf %75, %89 : vector<512x8xf32>
    %cst_23 = arith.constant 9.99999974E-6 : f32
    %91 = vector.broadcast %cst_23 : f32 to vector<1x8xf32>
    %92 = arith.addf %88, %91 : vector<1x8xf32>
    %93 = math.rsqrt %92 : vector<1x8xf32>
    %94 = vector.broadcast %93 : vector<1x8xf32> to vector<512x8xf32>
    %95 = arith.mulf %90, %94 : vector<512x8xf32>
    %96 = vector.shape_cast %95 : vector<512x8xf32> to vector<2x16x16x8xf32>
    %c0_24 = arith.constant 0 : index
    %c0_25 = arith.constant 0 : index
    %c0_26 = arith.constant 0 : index
    %c0_27 = arith.constant 0 : index
    %97 = vector.load %arg3[%c0_24, %c0_25, %c0_26, %c0_27] : memref<2x16x16x8xf32, #tpu.memory_space<vmem>>, vector<2x16x16x8xf32>
    tpu.vector_store %arg3[%c0_24, %c0_25, %c0_26, %c0_27], %96 {strides = array<i32>} : memref<2x16x16x8xf32, #tpu.memory_space<vmem>>, vector<2x16x16x8xf32>,
    return
  }
  func.func @transform_0(%arg0: i32) -> (i32, i32, i32, i32) {
    %c0_i32 = arith.constant 0 : i32
    %c0_i32_0 = arith.constant 0 : i32
    %c0_i32_1 = arith.constant 0 : i32
    %c0_i32_2 = arith.constant 0 : i32
    %c0_i32_3 = arith.constant 0 : i32
    return %c0_i32, %c0_i32_0, %c0_i32_1, %c0_i32_2 : i32, i32, i32, i32
  }
  func.func @transform_1(%arg0: i32) -> (i32, i32) {
    %c0_i32 = arith.constant 0 : i32
    %c0_i32_0 = arith.constant 0 : i32
    return %c0_i32, %arg0 : i32, i32
  }
  func.func @transform_2(%arg0: i32) -> (i32, i32, i32, i32) {
    %c0_i32 = arith.constant 0 : i32
    %c0_i32_0 = arith.constant 0 : i32
    %c0_i32_1 = arith.constant 0 : i32
    %c0_i32_2 = arith.constant 0 : i32
    return %c0_i32, %c0_i32_0, %c0_i32_1, %arg0 : i32, i32, i32, i32
  }
}

</mosaic_0001>

<bundles_post_ra>
// kernel: pool_branch.1
= control target key start
LH: loop header
LB: loop body
LE: loop exit
PB: predicated region body
PF: predicated region fallthrough
CT: control target
= control target key end

     0   :  { %vm399_vm0 = vcmask 1041408   ;;  %vm302_vm1 = vcmask 31744   ;;  %vm572_vm2 = vcmask 64512   ;;  %s6237_s1 = inlined_call_operand.vmem [shape: f32[4,8], index: 1, kind: input, shape index: {}]   ;;  %s6238_s0 = inlined_call_operand.vmem [shape: f32[2,16,16,4], index: 0, kind: input, shape index: {}]   ;;  %s6239_s2 = inlined_call_operand.vmem [shape: f32[2,16,16,8], index: 2, kind: output, shape index: {}]  }
   0x1   :  { %v140_v0 = vld [vmem:[%s6237_s1] sm:$0xf]  ;;  %v13_v2 = vld [vmem:[%s6238_s0 + $0x8] sm:$0xff]  ;;  %v14_v17 = vld [vmem:[%s6238_s0 + $0x10] sm:$0xff] }
   0x2   :  { %v12_v1 = vld [vmem:[%s6238_s0] sm:$0xff]  ;;  %v141_v3 = vpack.c.bf16 %v140_v0, %v140_v0  ;;  %v77_v5 = vpack.c.bf16 %v13_v2, %v13_v2  ;;  %v29_v7 = vld [vmem:[%s6238_s0 + $0x88] sm:$0xff]  ;;  %v15_v18 = vld [vmem:[%s6238_s0 + $0x18] sm:$0xff]  ;;  %v78_v21 = vpack.c.bf16 %v14_v17, %v14_v17 }
   0x3   :  { %v76_v4 = vpack.c.bf16 %v12_v1, %v12_v1  ;;  %v28_v6 = vld [vmem:[%s6238_s0 + $0x80] sm:$0xff]  ;;  %v93_v12 = vpack.c.bf16 %v29_v7, %v29_v7  ;;  %v30_v19 = vld [vmem:[%s6238_s0 + $0x90] sm:$0xff]  ;;  %v31_v20 = vld [vmem:[%s6238_s0 + $0x98] sm:$0xff]  ;;  %v79_v22 = vpack.c.bf16 %v15_v18, %v15_v18 }
   0x4   :  { %v92_v8 = vpack.c.bf16 %v28_v6, %v28_v6  ;;  %v401_v9 = vsel %vm399_vm0, %v141_v3, 0  ;;  %v207_v11 = vunpack.c.l.b16 %v77_v5  ;;  %v94_v23 = vpack.c.bf16 %v30_v19, %v30_v19  ;;  %v44_v29 = vld [vmem:[%s6238_s0 + $0x100] sm:$0xff]  ;;  %v45_v30 = vld [vmem:[%s6238_s0 + $0x108] sm:$0xff]  ;;  %v46_v50 = vld [vmem:[%s6238_s0 + $0x110] sm:$0xff] }
   0x5   :  { %v206_v10 = vunpack.c.l.b16 %v76_v4  ;;  %410 = vmatpush.bf16.msra.mxu0 %v401_v9  ;;  %2828 = vmatpush.bf16.msra.mxu1 %v401_v9  ;;  %v223_v15 = vunpack.c.l.b16 %v93_v12  ;;  %v95_v24 = vpack.c.bf16 %v31_v20, %v31_v20  ;;  %v208_v25 = vunpack.c.l.b16 %v78_v21  ;;  %v16_v38 = vld [vmem:[%s6238_s0 + $0x20] sm:$0xff]  ;;  %v17_v39 = vld [vmem:[%s6238_s0 + $0x28] sm:$0xff]  ;;  %v47_v51 = vld [vmem:[%s6238_s0 + $0x118] sm:$0xff] }
   0x6   :  { %v222_v13 = vunpack.c.l.b16 %v92_v8  ;;  %2829 = vmatpush.bf16.msra.mxu2 %v401_v9  ;;  %2830 = vmatpush.bf16.msra.mxu3 %v401_v9  ;;  %v209_v26 = vunpack.c.l.b16 %v79_v22  ;;  %v224_v27 = vunpack.c.l.b16 %v94_v23  ;;  %v108_v32 = vpack.c.bf16 %v44_v29, %v44_v29  ;;  %v32_v40 = vld [vmem:[%s6238_s0 + $0xa0] sm:$0xff]  ;;  %v33_v41 = vld [vmem:[%s6238_s0 + $0xa8] sm:$0xff]  ;;  %v18_v59 = vld [vmem:[%s6238_s0 + $0x30] sm:$0xff] }
   0x7   :  { %v270_v14 = vpack.c.b16 %v207_v11, %v206_v10  ;;  %v225_v28 = vunpack.c.l.b16 %v95_v24  ;;  %v109_v33 = vpack.c.bf16 %v45_v30, %v45_v30  ;;  %v80_v42 = vpack.c.bf16 %v16_v38, %v16_v38  ;;  %v19_v60 = vld [vmem:[%s6238_s0 + $0x38] sm:$0xff]  ;;  %v34_v61 = vld [vmem:[%s6238_s0 + $0xb0] sm:$0xff]  ;;  %v48_v7 = vld [vmem:[%s6238_s0 + $0x120] sm:$0xff] }
   0x8   :  { %v278_v16 = vpack.c.b16 %v223_v15, %v222_v13  ;;  %v271_v31 = vpack.c.b16 %v209_v26, %v208_v25  ;;  %v238_v35 = vunpack.c.l.b16 %v108_v32  ;;  %v81_v43 = vpack.c.bf16 %v17_v39, %v17_v39  ;;  %v35_v62 = vld [vmem:[%s6238_s0 + $0xb8] sm:$0xff]  ;;  %v49_v8 = vld [vmem:[%s6238_s0 + $0x128] sm:$0xff]  ;;  %v60_v9 = vld [vmem:[%s6238_s0 + $0x180] sm:$0xff] }
   0x9   :  { %2796 = vmatmul.msk.bf16.vlgmr.msra.gmra.mxu0 %vm302_vm1, %v270_v14  ;;  %v279_v34 = vpack.c.b16 %v225_v28, %v224_v27  ;;  %v239_v36 = vunpack.c.l.b16 %v109_v33  ;;  %v96_v44 = vpack.c.bf16 %v32_v40, %v32_v40  ;;  %v97_v45 = vpack.c.bf16 %v33_v41, %v33_v41  ;;  %v61_v13 = vld [vmem:[%s6238_s0 + $0x188] sm:$0xff]  ;;  %v20_v22 = vld [vmem:[%s6238_s0 + $0x40] sm:$0xff]  ;;  %v63_v41 = vld [vmem:[%s6238_s0 + $0x198] sm:$0xff] }
   0xa   :  { %2804 = vmatmul.msk.bf16.vlgmr.msra.gmra.mxu1 %vm302_vm1, %v278_v16  ;;  %v210_v46 = vunpack.c.l.b16 %v80_v42  ;;  %v211_v47 = vunpack.c.l.b16 %v81_v43  ;;  %v110_v53 = vpack.c.bf16 %v46_v50, %v46_v50  ;;  %v111_v54 = vpack.c.bf16 %v47_v51, %v47_v51  ;;  %v21_v23 = vld [vmem:[%s6238_s0 + $0x48] sm:$0xff]  ;;  %v36_v25 = vld [vmem:[%s6238_s0 + $0xc0] sm:$0xff]  ;;  %v22_v50 = vld [vmem:[%s6238_s0 + $0x50] sm:$0xff] }
   0xb   :  { %v286_v37 = vpack.c.b16 %v239_v36, %v238_v35  ;;  %v226_v48 = vunpack.c.l.b16 %v96_v44  ;;  %v227_v49 = vunpack.c.l.b16 %v97_v45  ;;  %v82_v63 = vpack.c.bf16 %v18_v59, %v18_v59  ;;  %v37_v26 = vld [vmem:[%s6238_s0 + $0xc8] sm:$0xff]  ;;  %v50_v35 = vld [vmem:[%s6238_s0 + $0x130] sm:$0xff]  ;;  %v51_v36 = vld [vmem:[%s6238_s0 + $0x138] sm:$0xff] }
   0xc   :  { %v272_v52 = vpack.c.b16 %v211_v47, %v210_v46  ;;  %v240_v56 = vunpack.c.l.b16 %v110_v53  ;;  %v241_v57 = vunpack.c.l.b16 %v111_v54  ;;  %v83_v0 = vpack.c.bf16 %v19_v60, %v19_v60  ;;  %v23_v51 = vld [vmem:[%s6238_s0 + $0x58] sm:$0xff]  ;;  %v38_v53 = vld [vmem:[%s6238_s0 + $0xd0] sm:$0xff] }
   0xd   :  { %2812 = vmatmul.msk.bf16.vlgmr.msra.gmra.mxu2 %vm302_vm1, %v286_v37  ;;  %v280_v55 = vpack.c.b16 %v227_v49, %v226_v48  ;;  %v98_v1 = vpack.c.bf16 %v34_v61, %v34_v61  ;;  %v99_v2 = vpack.c.bf16 %v35_v62, %v35_v62  ;;  %v212_v3 = vunpack.c.l.b16 %v82_v63  ;;  %v62_v37 = vld [vmem:[%s6238_s0 + $0x190] sm:$0xff]  ;;  %v39_v54 = vld [vmem:[%s6238_s0 + $0xd8] sm:$0xff]  ;;  %v52_v63 = vld [vmem:[%s6238_s0 + $0x140] sm:$0xff] }
   0xe   :  { %v287_v58 = vpack.c.b16 %v241_v57, %v240_v56  ;;  %v213_v4 = vunpack.c.l.b16 %v83_v0  ;;  %v112_v11 = vpack.c.bf16 %v48_v7, %v48_v7  ;;  %v113_v12 = vpack.c.bf16 %v49_v8, %v49_v8  ;;  %v53_v0 = vld [vmem:[%s6238_s0 + $0x148] sm:$0xff] }
   0xf   :  { %v228_v5 = vunpack.c.l.b16 %v98_v1  ;;  %v229_v6 = vunpack.c.l.b16 %v99_v2  ;;  %v124_v14 = vpack.c.bf16 %v60_v9, %v60_v9  ;;  %v125_v15 = vpack.c.bf16 %v61_v13, %v61_v13  ;;  %v64_v1 = vld [vmem:[%s6238_s0 + $0x1a0] sm:$0xff] }
  0x10   :  { %v273_v10 = vpack.c.b16 %v213_v4, %v212_v3  ;;  %v242_v17 = vunpack.c.l.b16 %v112_v11  ;;  %v243_v18 = vunpack.c.l.b16 %v113_v12  ;;  %v84_v27 = vpack.c.bf16 %v20_v22, %v20_v22 }
  0x11   :  { %v281_v16 = vpack.c.b16 %v229_v6, %v228_v5  ;;  %v254_v19 = vunpack.c.l.b16 %v124_v14  ;;  %v255_v20 = vunpack.c.l.b16 %v125_v15  ;;  %v85_v28 = vpack.c.bf16 %v21_v23, %v21_v23  ;;  %v65_v5 = vld [vmem:[%s6238_s0 + $0x1a8] sm:$0xff]  ;;  %v24_v14 = vld [vmem:[%s6238_s0 + $0x60] sm:$0xff] }
  0x12   :  { %v288_v21 = vpack.c.b16 %v243_v18, %v242_v17  ;;  %v100_v29 = vpack.c.bf16 %v36_v25, %v36_v25  ;;  %v101_v30 = vpack.c.bf16 %v37_v26, %v37_v26  ;;  %v114_v39 = vpack.c.bf16 %v50_v35, %v50_v35  ;;  %v25_v15 = vld [vmem:[%s6238_s0 + $0x68] sm:$0xff]  ;;  %v40_v17 = vld [vmem:[%s6238_s0 + $0xe0] sm:$0xff] }
  0x13   :  { %v294_v24 = vpack.c.b16 %v255_v20, %v254_v19  ;;  %v215_v32 = vunpack.c.l.b16 %v85_v28  ;;  %v115_v40 = vpack.c.bf16 %v51_v36, %v51_v36  ;;  %v126_v42 = vpack.c.bf16 %v62_v37, %v62_v37  ;;  %v41_v18 = vld [vmem:[%s6238_s0 + $0xe8] sm:$0xff]  ;;  %v55_v28 = vld [vmem:[%s6238_s0 + $0x158] sm:$0xff] }
  0x14   :  { %v230_v33 = vunpack.c.l.b16 %v100_v29  ;;  %v127_v43 = vpack.c.bf16 %v63_v41, %v63_v41  ;;  %v244_v45 = vunpack.c.l.b16 %v114_v39  ;;  %v87_v56 = vpack.c.bf16 %v23_v51, %v23_v51  ;;  %v66_v29 = vld [vmem:[%s6238_s0 + $0x1b0] sm:$0xff] }
  0x15   :  { %2820 = vmatmul.msk.bf16.vlgmr.msra.gmra.mxu3 %vm302_vm1, %v294_v24  ;;  %v245_v46 = vunpack.c.l.b16 %v115_v40  ;;  %v256_v47 = vunpack.c.l.b16 %v126_v42  ;;  %v102_v57 = vpack.c.bf16 %v38_v53, %v38_v53  ;;  %v116_v3 = vpack.c.bf16 %v52_v63, %v52_v63  ;;  %v26_v42 = vld [vmem:[%s6238_s0 + $0x70] sm:$0xff] }
  0x16   :  { %v257_v48 = vunpack.c.l.b16 %v127_v43  ;;  %v217_v60 = vunpack.c.l.b16 %v87_v56  ;;  %v117_v4 = vpack.c.bf16 %v53_v0, %v53_v0  ;;  %v128_v6 = vpack.c.bf16 %v64_v1, %v64_v1  ;;  %v27_v43 = vld [vmem:[%s6238_s0 + $0x78] sm:$0xff]  ;;  %v57_v56 = vld [vmem:[%s6238_s0 + $0x168] sm:$0xff] }
  0x17   :  { %v289_v49 = vpack.c.b16 %v245_v46, %v244_v45  ;;  %v232_v61 = vunpack.c.l.b16 %v102_v57  ;;  %v129_v7 = vpack.c.bf16 %v65_v5, %v65_v5  ;;  %v246_v9 = vunpack.c.l.b16 %v116_v3  ;;  %v42_v45 = vld [vmem:[%s6238_s0 + $0xf0] sm:$0xff]  ;;  %v43_v46 = vld [vmem:[%s6238_s0 + $0xf8] sm:$0xff]  ;;  %v68_v57 = vld [vmem:[%s6238_s0 + $0x1c0] sm:$0xff] }
  0x18   :  { %v258_v11 = vunpack.c.l.b16 %v128_v6  ;;  %v88_v19 = vpack.c.bf16 %v24_v14, %v24_v14  ;;  %v89_v20 = vpack.c.bf16 %v25_v15, %v25_v15  ;;  %v105_v22 = vpack.c.bf16 %v41_v18, %v41_v18 }
  0x19   :  { %2797 = vmatmul.msk.bf16.gmra.mxu0 %vm302_vm1, %v271_v31  ;;  %v214_v31 = vunpack.c.l.b16 %v84_v27  ;;  %v259_v12 = vunpack.c.l.b16 %v129_v7  ;;  %v54_v27 = vld [vmem:[%s6238_s0 + $0x150] sm:$0xff] }
  0x1a   :  { %2805 = vmatmul.msk.bf16.gmra.mxu1 %vm302_vm1, %v279_v34  ;;  %v231_v34 = vunpack.c.l.b16 %v101_v30  ;;  %v218_v23 = vunpack.c.l.b16 %v88_v19  ;;  %v219_v24 = vunpack.c.l.b16 %v89_v20  ;;  %v235_v26 = vunpack.c.l.b16 %v105_v22  ;;  %v58_v7 = vld [vmem:[%s6238_s0 + $0x170] sm:$0xff] }
  0x1b   :  { %v274_v38 = vpack.c.b16 %v215_v32, %v214_v31  ;;  %v118_v31 = vpack.c.bf16 %v54_v27, %v54_v27  ;;  %v119_v32 = vpack.c.bf16 %v55_v28, %v55_v28 }
  0x1c   :  { %v282_v44 = vpack.c.b16 %v231_v34, %v230_v33  ;;  %v276_v30 = vpack.c.b16 %v219_v24, %v218_v23  ;;  %v67_v33 = vld [vmem:[%s6238_s0 + $0x1b8] sm:$0xff]  ;;  %v130_v34 = vpack.c.bf16 %v66_v29, %v66_v29 }
  0x1d   :  { %2813 = vmatmul.msk.bf16.gmra.mxu2 %vm302_vm1, %v287_v58  ;;  %v103_v58 = vpack.c.bf16 %v39_v54, %v39_v54  ;;  %v131_v35 = vpack.c.bf16 %v67_v33, %v67_v33  ;;  %v248_v37 = vunpack.c.l.b16 %v118_v31 }
  0x1e   :  { %v260_v39 = vunpack.c.l.b16 %v130_v34 }
  0x1f   :  { %v233_v62 = vunpack.c.l.b16 %v103_v58  ;;  %v261_v40 = vunpack.c.l.b16 %v131_v35 }
  0x21   :  { %v283_v8 = vpack.c.b16 %v233_v62, %v232_v61  ;;  %v69_v61 = vld [vmem:[%s6238_s0 + $0x1c8] sm:$0xff]  ;;  %v132_v62 = vpack.c.bf16 %v68_v57, %v68_v57 }
  0x22   :  { %v133_v63 = vpack.c.bf16 %v69_v61, %v69_v61 }
  0x23   :  { %v262_v3 = vunpack.c.l.b16 %v132_v62 }
  0x29   :  { %2798 = vmatmul.msk.bf16.gmra.mxu0 %vm302_vm1, %v272_v52  ;;  %v295_v52 = vpack.c.b16 %v257_v48, %v256_v47  ;;  %v90_v47 = vpack.c.bf16 %v26_v42, %v26_v42  ;;  %v91_v48 = vpack.c.bf16 %v27_v43, %v27_v43 }
  0x2a   :  { %2806 = vmatmul.msk.bf16.gmra.mxu1 %vm302_vm1, %v280_v55  ;;  %v86_v55 = vpack.c.bf16 %v22_v50, %v22_v50  ;;  %v107_v50 = vpack.c.bf16 %v43_v46, %v43_v46 }
  0x2b   :  { %2821 = vmatmul.msk.bf16.gmra.mxu3 %vm302_vm1, %v295_v52  ;;  %v220_v51 = vunpack.c.l.b16 %v90_v47  ;;  %v221_v52 = vunpack.c.l.b16 %v91_v48 }
  0x2c   :  { %v216_v59 = vunpack.c.l.b16 %v86_v55  ;;  %v237_v54 = vunpack.c.l.b16 %v107_v50  ;;  %v56_v55 = vld [vmem:[%s6238_s0 + $0x160] sm:$0xff] }
  0x2d   :  { %2814 = vmatmul.msk.bf16.gmra.mxu2 %vm302_vm1, %v288_v21  ;;  %v104_v21 = vpack.c.bf16 %v40_v17, %v40_v17  ;;  %v277_v58 = vpack.c.b16 %v221_v52, %v220_v51 }
  0x2e   :  { %v275_v2 = vpack.c.b16 %v217_v60, %v216_v59  ;;  %v120_v59 = vpack.c.bf16 %v56_v55, %v56_v55  ;;  %v121_v60 = vpack.c.bf16 %v57_v56, %v57_v56 }
  0x2f   :  { %v234_v25 = vunpack.c.l.b16 %v104_v21 }
  0x30   :  { %v250_v1 = vunpack.c.l.b16 %v120_v59 }
  0x31   :  { %v284_v36 = vpack.c.b16 %v235_v26, %v234_v25  ;;  %v72_v25 = vld [vmem:[%s6238_s0 + $0x1e0] sm:$0xff]  ;;  %v73_v26 = vld [vmem:[%s6238_s0 + $0x1e8] sm:$0xff] }
  0x32   :  { %v136_v27 = vpack.c.bf16 %v72_v25, %v72_v25  ;;  %v137_v28 = vpack.c.bf16 %v73_v26, %v73_v26 }
  0x34   :  { %v267_v31 = vunpack.c.l.b16 %v137_v28 }
  0x39   :  { %2799 = vmatmul.msk.bf16.gmra.mxu0 %vm302_vm1, %v273_v10  ;;  %v247_v10 = vunpack.c.l.b16 %v117_v4  ;;  %v263_v4 = vunpack.c.l.b16 %v133_v63 }
  0x3a   :  { %2807 = vmatmul.msk.bf16.gmra.mxu1 %vm302_vm1, %v281_v16  ;;  %v296_v16 = vpack.c.b16 %v259_v12, %v258_v11  ;;  %v71_v12 = vld [vmem:[%s6238_s0 + $0x1d8] sm:$0xff] }
  0x3b   :  { %v290_v13 = vpack.c.b16 %v247_v10, %v246_v9  ;;  %v298_v6 = vpack.c.b16 %v263_v4, %v262_v3  ;;  %v70_v9 = vld [vmem:[%s6238_s0 + $0x1d0] sm:$0xff]  ;;  %v122_v10 = vpack.c.bf16 %v58_v7, %v58_v7  ;;  %v135_v15 = vpack.c.bf16 %v71_v12, %v71_v12 }
  0x3c   :  { %2822 = vmatmul.msk.bf16.gmra.mxu3 %vm302_vm1, %v296_v16 }
  0x3d   :  { %2815 = vmatmul.msk.bf16.gmra.mxu2 %vm302_vm1, %v289_v49  ;;  %v106_v49 = vpack.c.bf16 %v42_v45, %v42_v45  ;;  %v252_v16 = vunpack.c.l.b16 %v122_v10  ;;  %v265_v20 = vunpack.c.l.b16 %v135_v15 }
  0x3f   :  { %v236_v53 = vunpack.c.l.b16 %v106_v49 }
  0x41   :  { %v285_v0 = vpack.c.b16 %v237_v54, %v236_v53 }
  0x49   :  { %2800 = vmatmul.msk.bf16.gmra.mxu0 %vm302_vm1, %v274_v38  ;;  %v249_v38 = vunpack.c.l.b16 %v119_v32 }
  0x4a   :  { %2808 = vmatmul.msk.bf16.gmra.mxu1 %vm302_vm1, %v282_v44  ;;  %v297_v44 = vpack.c.b16 %v261_v40, %v260_v39 }
  0x4b   :  { %v291_v41 = vpack.c.b16 %v249_v38, %v248_v37  ;;  %v74_v37 = vld [vmem:[%s6238_s0 + $0x1f0] sm:$0xff]  ;;  %v75_v38 = vld [vmem:[%s6238_s0 + $0x1f8] sm:$0xff] }
  0x4c   :  { %2823 = vmatmul.msk.bf16.gmra.mxu3 %vm302_vm1, %v297_v44  ;;  %v138_v39 = vpack.c.bf16 %v74_v37, %v74_v37  ;;  %v139_v40 = vpack.c.bf16 %v75_v38, %v75_v38 }
  0x4d   :  { %2816 = vmatmul.msk.bf16.gmra.mxu2 %vm302_vm1, %v290_v13  ;;  %v134_v13 = vpack.c.bf16 %v70_v9, %v70_v9 }
  0x4e   :  { %v268_v42 = vunpack.c.l.b16 %v138_v39  ;;  %v269_v43 = vunpack.c.l.b16 %v139_v40 }
  0x4f   :  { %v264_v19 = vunpack.c.l.b16 %v134_v13 }
  0x50   :  { %v301_v44 = vpack.c.b16 %v269_v43, %v268_v42 }
  0x51   :  { %v299_v22 = vpack.c.b16 %v265_v20, %v264_v19 }
  0x59   :  { %2801 = vmatmul.msk.bf16.gmra.mxu0 %vm302_vm1, %v275_v2  ;;  %v251_v2 = vunpack.c.l.b16 %v121_v60 }
  0x5a   :  { %2809 = vmatmul.msk.bf16.gmra.mxu1 %vm302_vm1, %v283_v8  ;;  %v59_v8 = vld [vmem:[%s6238_s0 + $0x178] sm:$0xff] }
  0x5b   :  { %v292_v5 = vpack.c.b16 %v251_v2, %v250_v1  ;;  %v123_v11 = vpack.c.bf16 %v59_v8, %v59_v8 }
  0x5c   :  { %2824 = vmatmul.msk.bf16.gmra.mxu3 %vm302_vm1, %v298_v6 }
  0x5d   :  { %2817 = vmatmul.msk.bf16.gmra.mxu2 %vm302_vm1, %v291_v41  ;;  %v253_v17 = vunpack.c.l.b16 %v123_v11 }
  0x5f   :  { %v293_v21 = vpack.c.b16 %v253_v17, %v252_v16 }
  0x69   :  { %2802 = vmatmul.msk.bf16.gmra.mxu0 %vm302_vm1, %v276_v30  ;;  %v266_v30 = vunpack.c.l.b16 %v136_v27 }
  0x6a   :  { %2810 = vmatmul.msk.bf16.gmra.mxu1 %vm302_vm1, %v284_v36 }
  0x6b   :  { %v300_v33 = vpack.c.b16 %v267_v31, %v266_v30 }
  0x6c   :  { %2825 = vmatmul.msk.bf16.gmra.mxu3 %vm302_vm1, %v299_v22 }
  0x6d   :  { %2818 = vmatmul.msk.bf16.gmra.mxu2 %vm302_vm1, %v292_v5 }
  0x79   :  { %2803 = vmatmul.msk.bf16.gmra.mxu0 %vm302_vm1, %v277_v58 }
  0x7a   :  { %2811 = vmatmul.msk.bf16.gmra.mxu1 %vm302_vm1, %v285_v0 }
  0x7c   :  { %2826 = vmatmul.msk.bf16.gmra.mxu3 %vm302_vm1, %v300_v33 }
  0x7d   :  { %2819 = vmatmul.msk.bf16.gmra.mxu2 %vm302_vm1, %v293_v21 }
  0x86   :  { %v3061_v14 = vpop.f32.mrf.mxu0 }
  0x87   :  { %v3063_v18 = vpop.f32.mrf.mxu1  ;;  %v706_v4 = vmul.f32 %v3061_v14, %v3061_v14  ;;  %v573_v8 = vsel %vm572_vm2, %v3061_v14, 0.0 }
  0x88   :  { %6556 = vst [vmem:[#allocation2_spill] sm:$0xff] %v3063_v18 }
  0x89   :  { %v770_v13 = vsel %vm572_vm2, %v706_v4, 0.0 }
  0x8c   :  { %2827 = vmatmul.msk.bf16.gmra.mxu3 %vm302_vm1, %v301_v44 }
  0x8e   :  { %v3067_v23 = vpop.f32.mrf.mxu0 }
  0x8f   :  { %v3069_v24 = vpop.f32.mrf.mxu1  ;;  %v707_v2 = vmul.f32 %v3067_v23, %v3067_v23  ;;  %v574_v5 = vsel %vm572_vm2, %v3067_v23, 0.0 }
  0x90   :  { %6557 = vst [vmem:[#allocation3_spill] sm:$0xff] %v3069_v24  ;;  %v3086_v36 = vpop.f32.mrf.mxu2  ;;  %v575_v12 = vadd.f32 %v574_v5, %v573_v8 }
  0x91   :  { %v771_v9 = vsel %vm572_vm2, %v707_v2, 0.0 }
  0x92   :  { %v772_v19 = vadd.f32 %v771_v9, %v770_v13 }
  0x96   :  { %v3077_v29 = vpop.f32.mrf.mxu0 }
  0x97   :  { %v3079_v32 = vpop.f32.mrf.mxu1  ;;  %v708_v6 = vmul.f32 %v3077_v29, %v3077_v29  ;;  %v576_v10 = vsel %vm572_vm2, %v3077_v29, 0.0 }
  0x98   :  { %6558 = vst [vmem:[#allocation4_spill] sm:$0xff] %v3079_v32  ;;  %v3101_v47 = vpop.f32.mrf.mxu2  ;;  %v3115_v54 = vpop.f32.mrf.mxu3  ;;  %v577_v20 = vadd.f32 %v576_v10, %v575_v12 }
  0x99   :  { %v773_v15 = vsel %vm572_vm2, %v708_v6, 0.0 }
  0x9a   :  { %v774_v27 = vadd.f32 %v773_v15, %v772_v19 }
  0x9e   :  { %v3082_v34 = vpop.f32.mrf.mxu0 }
  0x9f   :  { %v3084_v35 = vpop.f32.mrf.mxu1  ;;  %v709_v11 = vmul.f32 %v3082_v34, %v3082_v34  ;;  %v578_v16 = vsel %vm572_vm2, %v3082_v34, 0.0 }
  0xa0   :  { %6559 = vst [vmem:[#allocation5_spill] sm:$0xff] %v3084_v35  ;;  %v3107_v50 = vpop.f32.mrf.mxu2  ;;  %v3125_v59 = vpop.f32.mrf.mxu3  ;;  %v579_v28 = vadd.f32 %v578_v16, %v577_v20 }
  0xa1   :  { %v775_v22 = vsel %vm572_vm2, %v709_v11, 0.0 }
  0xa2   :  { %v776_v38 = vadd.f32 %v775_v22, %v774_v27 }
  0xa6   :  { %v3094_v41 = vpop.f32.mrf.mxu0 }
  0xa7   :  { %v3096_v45 = vpop.f32.mrf.mxu1  ;;  %v710_v17 = vmul.f32 %v3094_v41, %v3094_v41  ;;  %v580_v25 = vsel %vm572_vm2, %v3094_v41, 0.0 }
  0xa8   :  { %6560 = vst [vmem:[#allocation6_spill] sm:$0xff] %v3096_v45  ;;  %v3113_v53 = vpop.f32.mrf.mxu2  ;;  %v581_v39 = vadd.f32 %v580_v25, %v579_v28 }
  0xa9   :  { %v777_v31 = vsel %vm572_vm2, %v710_v17, 0.0 }
  0xaa   :  { %v778_v2 = vadd.f32 %v777_v31, %v776_v38 }
  0xae   :  { %v3099_v46 = vpop.f32.mrf.mxu0  ;;  %v3133_v63 = vpop.f32.mrf.mxu3 }
  0xaf   :  { %v3105_v49 = vpop.f32.mrf.mxu1  ;;  %v711_v26 = vmul.f32 %v3099_v46, %v3099_v46  ;;  %v582_v33 = vsel %vm572_vm2, %v3099_v46, 0.0 }
  0xb0   :  { %6561 = vst [vmem:[#allocation7_spill] sm:$0xff] %v3105_v49  ;;  %v3121_v57 = vpop.f32.mrf.mxu2  ;;  %v583_v4 = vadd.f32 %v582_v33, %v581_v39 }
  0xb1   :  { %v779_v42 = vsel %vm572_vm2, %v711_v26, 0.0 }
  0xb2   :  { %v780_v10 = vadd.f32 %v779_v42, %v778_v2 }
  0xb6   :  { %v3103_v48 = vpop.f32.mrf.mxu0  ;;  %v3149_v7 = vpop.f32.mrf.mxu3 }
  0xb7   :  { %v3111_v52 = vpop.f32.mrf.mxu1  ;;  %v712_v37 = vmul.f32 %v3103_v48, %v3103_v48  ;;  %v584_v43 = vsel %vm572_vm2, %v3103_v48, 0.0 }
  0xb8   :  { %6562 = vst [vmem:[#allocation8_spill] sm:$0xff] %v3111_v52  ;;  %v3131_v62 = vpop.f32.mrf.mxu2  ;;  %v585_v11 = vadd.f32 %v584_v43, %v583_v4 }
  0xb9   :  { %v781_v6 = vsel %vm572_vm2, %v712_v37, 0.0 }
  0xba   :  { %v782_v17 = vadd.f32 %v781_v6, %v780_v10 }
  0xbe   :  { %v3109_v51 = vpop.f32.mrf.mxu0 }
  0xbf   :  { %v3119_v56 = vpop.f32.mrf.mxu1  ;;  %v713_v44 = vmul.f32 %v3109_v51, %v3109_v51  ;;  %v3185_v5 = vpop.f32.mrf.mxu3  ;;  %v586_v8 = vsel %vm572_vm2, %v3109_v51, 0.0 }
  0xc0   :  { %6563 = vst [vmem:[#allocation9_spill] sm:$0xff] %v3119_v56  ;;  %v3141_v3 = vpop.f32.mrf.mxu2  ;;  %v587_v19 = vadd.f32 %v586_v8, %v585_v11 }
  0xc1   :  { %v783_v13 = vsel %vm572_vm2, %v713_v44, 0.0 }
  0xc2   :  { %v784_v26 = vadd.f32 %v783_v13, %v782_v17 }
  0xc6   :  { %v3117_v55 = vpop.f32.mrf.mxu0 }
  0xc7   :  { %v3127_v60 = vpop.f32.mrf.mxu1  ;;  %v714_v9 = vmul.f32 %v3117_v55, %v3117_v55  ;;  %v588_v15 = vsel %vm572_vm2, %v3117_v55, 0.0 }
  0xc8   :  { %6565 = vst [vmem:[#allocation11_spill] sm:$0xff] %v3127_v60  ;;  %v3178_v40 = vpop.f32.mrf.mxu2  ;;  %v589_v27 = vadd.f32 %v588_v15, %v587_v19 }
  0xc9   :  { %v785_v20 = vsel %vm572_vm2, %v714_v9, 0.0  ;;  %v3220_v9 = vpop.f32.mrf.mxu3 }
  0xca   :  { %v786_v38 = vadd.f32 %v785_v20, %v784_v26 }
  0xce   :  { %v3123_v58 = vpop.f32.mrf.mxu0 }
  0xcf   :  { %6564 = vst [vmem:[#allocation10_spill] sm:$0xff] %v3123_v58  ;;  %v3137_v1 = vpop.f32.mrf.mxu1  ;;  %v715_v16 = vmul.f32 %v3123_v58, %v3123_v58  ;;  %v590_v22 = vsel %vm572_vm2, %v3123_v58, 0.0 }
  0xd0   :  { %6568 = vst [vmem:[#allocation14_spill] sm:$0xff] %v3137_v1  ;;  %v591_v39 = vadd.f32 %v590_v22, %v589_v27  ;;  %v3211_v42 = vpop.f32.mrf.mxu2 }
  0xd1   :  { %v787_v31 = vsel %vm572_vm2, %v715_v16, 0.0 }
  0xd2   :  { %v788_v4 = vadd.f32 %v787_v31, %v786_v38 }
  0xd6   :  { %v3129_v61 = vpop.f32.mrf.mxu0 }
  0xd7   :  { %6566 = vst [vmem:[#allocation12_spill] sm:$0xff] %v3129_v61  ;;  %v3171_v30 = vpop.f32.mrf.mxu1  ;;  %v716_v25 = vmul.f32 %v3129_v61, %v3129_v61  ;;  %v592_v33 = vsel %vm572_vm2, %v3129_v61, 0.0 }
  0xd8   :  { %6570 = vst [vmem:[#allocation16_spill] sm:$0xff] %v3171_v30  ;;  %v593_v6 = vadd.f32 %v592_v33, %v591_v39 }
  0xd9   :  { %v789_v43 = vsel %vm572_vm2, %v716_v25, 0.0 }
  0xda   :  { %v790_v15 = vadd.f32 %v789_v43, %v788_v4  ;;  %v722_v4 = vmul.f32 %v3063_v18, %v3063_v18 }
  0xde   :  { %v3135_v0 = vpop.f32.mrf.mxu0 }
  0xdf   :  { %6567 = vst [vmem:[#allocation13_spill] sm:$0xff] %v3135_v0  ;;  %v3204_v28 = vpop.f32.mrf.mxu1  ;;  %v717_v37 = vmul.f32 %v3135_v0, %v3135_v0  ;;  %v594_v44 = vsel %vm572_vm2, %v3135_v0, 0.0 }
  0xe0   :  { %6572 = vst [vmem:[#allocation18_spill] sm:$0xff] %v3204_v28  ;;  %v595_v16 = vadd.f32 %v594_v44, %v593_v6 }
  0xe1   :  { %v791_v10 = vsel %vm572_vm2, %v717_v37, 0.0 }
  0xe2   :  { %v792_v22 = vadd.f32 %v791_v10, %v790_v15  ;;  %v3248_v15 = vpop.f32.mrf.mxu3 }
  0xe6   :  { %v3164_v21 = vpop.f32.mrf.mxu0 }
  0xe7   :  { %6569 = vst [vmem:[#allocation15_spill] sm:$0xff] %v3164_v21  ;;  %v718_v2 = vmul.f32 %v3164_v21, %v3164_v21  ;;  %v596_v11 = vsel %vm572_vm2, %v3164_v21, 0.0  ;;  %v3235_v37 = vpop.f32.mrf.mxu1 }
  0xe8   :  { %v597_v25 = vadd.f32 %v596_v11, %v595_v16  ;;  %6574 = vst [vmem:[#allocation20_spill] sm:$0xff] %v3235_v37  ;;  %v604_v16 = vsel %vm572_vm2, %v3063_v18, 0.0 }
  0xe9   :  { %v793_v17 = vsel %vm572_vm2, %v718_v2, 0.0  ;;  %v3240_v2 = vpop.f32.mrf.mxu2 }
  0xea   :  { %v794_v31 = vadd.f32 %v793_v17, %v792_v22  ;;  %v723_v17 = vmul.f32 %v3069_v24, %v3069_v24 }
  0xee   :  { %v3192_v12 = vpop.f32.mrf.mxu0 }
  0xef   :  { %6571 = vst [vmem:[#allocation17_spill] sm:$0xff] %v3192_v12  ;;  %v719_v13 = vmul.f32 %v3192_v12, %v3192_v12  ;;  %v598_v19 = vsel %vm572_vm2, %v3192_v12, 0.0 }
  0xf0   :  { %v599_v33 = vadd.f32 %v598_v19, %v597_v25  ;;  %v801_v25 = vsel %vm572_vm2, %v722_v4, 0.0 }
  0xf1   :  { %v795_v26 = vsel %vm572_vm2, %v719_v13, 0.0 }
  0xf2   :  { %v796_v39 = vadd.f32 %v795_v26, %v794_v31  ;;  %v606_v26 = vsel %vm572_vm2, %v3069_v24, 0.0 }
  0xf6   :  { %v3218_v8 = vpop.f32.mrf.mxu0 }
  0xf7   :  { %6573 = vst [vmem:[#allocation19_spill] sm:$0xff] %v3218_v8  ;;  %v720_v20 = vmul.f32 %v3218_v8, %v3218_v8  ;;  %v600_v27 = vsel %vm572_vm2, %v3218_v8, 0.0 }
  0xf8   :  { %v601_v43 = vadd.f32 %v600_v27, %v599_v33  ;;  %v724_v27 = vmul.f32 %v3079_v32, %v3079_v32 }
  0xf9   :  { %v797_v38 = vsel %vm572_vm2, %v720_v20, 0.0 }
  0xfa   :  { %v798_v11 = vadd.f32 %v797_v38, %v796_v39  ;;  %v803_v38 = vsel %vm572_vm2, %v723_v17, 0.0  ;;  %v608_v39 = vsel %vm572_vm2, %v3079_v32, 0.0  ;;  %v805_v4 = vsel %vm572_vm2, %v724_v27, 0.0 }
  0xfb   :  { %v760_v32 = vmul.f32 %v3248_v15, %v3248_v15 }
  0xfe   :  { %v3238_v44 = vpop.f32.mrf.mxu0 }
  0xff   :  { %6575 = vst [vmem:[#allocation21_spill] sm:$0xff] %v3238_v44  ;;  %v602_v6 = vsel %vm572_vm2, %v3238_v44, 0.0  ;;  %v721_v10 = vmul.f32 %v3238_v44, %v3238_v44 }
 0x100   :  { %v603_v13 = vadd.f32 %v602_v6, %v601_v43  ;;  %v725_v43 = vmul.f32 %v3084_v35, %v3084_v35 }
 0x101   :  { %v799_v19 = vsel %vm572_vm2, %v721_v10, 0.0 }
 0x102   :  { %v605_v20 = vadd.f32 %v604_v16, %v603_v13  ;;  %v800_v22 = vadd.f32 %v799_v19, %v798_v11  ;;  %v3265_v11 = vpop.f32.mrf.mxu1  ;;  %v610_v13 = vsel %vm572_vm2, %v3084_v35, 0.0  ;;  %v726_v16 = vmul.f32 %v3096_v45, %v3096_v45 }
 0x103   :  { %6576 = vst [vmem:[#allocation22_spill] sm:$0xff] %v3265_v11 }
 0x104   :  { %v607_v31 = vadd.f32 %v606_v26, %v605_v20  ;;  %v802_v33 = vadd.f32 %v801_v25, %v800_v22  ;;  %v3272_v20 = vpop.f32.mrf.mxu2  ;;  %v807_v22 = vsel %vm572_vm2, %v725_v43, 0.0  ;;  %v612_v25 = vsel %vm572_vm2, %v3096_v45, 0.0 }
 0x105   :  { %v727_v26 = vmul.f32 %v3105_v49, %v3105_v49 }
 0x106   :  { %v609_v6 = vadd.f32 %v608_v39, %v607_v31  ;;  %v804_v10 = vadd.f32 %v803_v38, %v802_v33  ;;  %v3279_v33 = vpop.f32.mrf.mxu3  ;;  %v809_v38 = vsel %vm572_vm2, %v726_v16, 0.0  ;;  %v614_v39 = vsel %vm572_vm2, %v3105_v49, 0.0 }
 0x107   :  { %v730_v49 = vmul.f32 %v3127_v60, %v3127_v60 }
 0x108   :  { %v611_v19 = vadd.f32 %v610_v13, %v609_v6  ;;  %v806_v17 = vadd.f32 %v805_v4, %v804_v10  ;;  %v728_v6 = vmul.f32 %v3111_v52, %v3111_v52  ;;  %v811_v4 = vsel %vm572_vm2, %v727_v26, 0.0 }
 0x109   :  { %v616_v13 = vsel %vm572_vm2, %v3111_v52, 0.0 }
 0x10a   :  { %v613_v31 = vadd.f32 %v612_v25, %v611_v19  ;;  %v808_v27 = vadd.f32 %v807_v22, %v806_v17  ;;  %v729_v19 = vmul.f32 %v3119_v56, %v3119_v56  ;;  %v813_v16 = vsel %vm572_vm2, %v728_v6, 0.0 }
 0x10b   :  { %v618_v25 = vsel %vm572_vm2, %v3119_v56, 0.0  ;;  %v656_v56 = vsel %vm572_vm2, %v3272_v20, 0.0 }
 0x10c   :  { %v615_v10 = vadd.f32 %v614_v39, %v613_v31  ;;  %v810_v43 = vadd.f32 %v809_v38, %v808_v27  ;;  %v3296_v38 = vpop.f32.mrf.mxu1  ;;  %v815_v26 = vsel %vm572_vm2, %v729_v19, 0.0  ;;  %v620_v39 = vsel %vm572_vm2, %v3127_v60, 0.0 }
 0x10d   :  { %6577 = vst [vmem:[#allocation23_spill] sm:$0xff] %v3296_v38 }
 0x10e   :  { %v812_v17 = vadd.f32 %v811_v4, %v810_v43  ;;  %v617_v22 = vadd.f32 %v616_v13, %v615_v10  ;;  %v731_v10 = vmul.f32 %v3137_v1, %v3137_v1  ;;  %v3303_v4 = vpop.f32.mrf.mxu2  ;;  %v817_v13 = vsel %vm572_vm2, %v730_v49, 0.0 }
 0x110   :  { %v619_v31 = vadd.f32 %v618_v25, %v617_v22  ;;  %v814_v27 = vadd.f32 %v813_v16, %v812_v17  ;;  %v622_v22 = vsel %vm572_vm2, %v3137_v1, 0.0  ;;  %v732_v17 = vmul.f32 %v3171_v30, %v3171_v30  ;;  %v3310_v25 = vpop.f32.mrf.mxu3 }
 0x111   :  { %v819_v60 = vsel %vm572_vm2, %v731_v10, 0.0  ;;  %v626_v1 = vsel %vm572_vm2, %v3204_v28, 0.0 }
 0x112   :  { %v621_v43 = vadd.f32 %v620_v39, %v619_v31  ;;  %v816_v6 = vadd.f32 %v815_v26, %v814_v27  ;;  %v624_v31 = vsel %vm572_vm2, %v3171_v30, 0.0  ;;  %v733_v27 = vmul.f32 %v3204_v28, %v3204_v28 }
 0x113   :  { %v821_v39 = vsel %vm572_vm2, %v732_v17, 0.0  ;;  %v735_v30 = vmul.f32 %v3265_v11, %v3265_v11  ;;  %v745_v28 = vmul.f32 %v3178_v40, %v3178_v40 }
 0x114   :  { %v623_v16 = vadd.f32 %v622_v22, %v621_v43  ;;  %v818_v19 = vadd.f32 %v817_v13, %v816_v6  ;;  %v734_v43 = vmul.f32 %v3235_v37, %v3235_v37  ;;  %v823_v10 = vsel %vm572_vm2, %v733_v27, 0.0 }
 0x115   :  { %v628_v22 = vsel %vm572_vm2, %v3235_v37, 0.0  ;;  %v646_v37 = vsel %vm572_vm2, %v3131_v62, 0.0 }
 0x116   :  { %v625_v26 = vadd.f32 %v624_v31, %v623_v16  ;;  %v820_v49 = vadd.f32 %v819_v60, %v818_v19  ;;  %v3327_v19 = vpop.f32.mrf.mxu1  ;;  %v825_v17 = vsel %vm572_vm2, %v734_v43, 0.0  ;;  %v630_v31 = vsel %vm572_vm2, %v3265_v11, 0.0 }
 0x117   :  { %6578 = vst [vmem:[#allocation24_spill] sm:$0xff] %v3327_v19  ;;  %v738_v11 = vmul.f32 %v3086_v36, %v3086_v36 }
 0x118   :  { %v627_v6 = vadd.f32 %v626_v1, %v625_v26  ;;  %v822_v13 = vadd.f32 %v821_v39, %v820_v49  ;;  %v736_v1 = vmul.f32 %v3296_v38, %v3296_v38  ;;  %v3334_v49 = vpop.f32.mrf.mxu2  ;;  %v827_v39 = vsel %vm572_vm2, %v735_v30, 0.0 }
 0x119   :  { %v750_v52 = vmul.f32 %v3334_v49, %v3334_v49 }
 0x11a   :  { %v629_v16 = vadd.f32 %v628_v22, %v627_v6  ;;  %v824_v60 = vadd.f32 %v823_v10, %v822_v13  ;;  %v632_v6 = vsel %vm572_vm2, %v3296_v38, 0.0  ;;  %v737_v13 = vmul.f32 %v3327_v19, %v3327_v19  ;;  %v3341_v22 = vpop.f32.mrf.mxu3 }
 0x11b   :  { %v739_v38 = vmul.f32 %v3101_v47, %v3101_v47 }
 0x11c   :  { %v826_v26 = vadd.f32 %v825_v17, %v824_v60  ;;  %v631_v27 = vadd.f32 %v630_v31, %v629_v16  ;;  %v829_v60 = vsel %vm572_vm2, %v736_v1, 0.0  ;;  %v634_v16 = vsel %vm572_vm2, %v3327_v19, 0.0 }
 0x11d   :  { %v636_v31 = vsel %vm572_vm2, %v3086_v36, 0.0  ;;  %v638_v1 = vsel %vm572_vm2, %v3101_v47, 0.0  ;;  %v740_v19 = vmul.f32 %v3107_v50, %v3107_v50 }
 0x11e   :  { %v828_v10 = vadd.f32 %v827_v39, %v826_v26  ;;  %v633_v43 = vadd.f32 %v632_v6, %v631_v27  ;;  %v831_v26 = vsel %vm572_vm2, %v737_v13, 0.0  ;;  %v833_v6 = vsel %vm572_vm2, %v738_v11, 0.0 }
 0x11f   :  { %v741_v13 = vmul.f32 %v3113_v53, %v3113_v53  ;;  %v837_v11 = vsel %vm572_vm2, %v740_v19, 0.0 }
 0x120   :  { %v830_v17 = vadd.f32 %v829_v60, %v828_v10  ;;  %v635_v30 = vadd.f32 %v634_v16, %v633_v43  ;;  %v835_v60 = vsel %vm572_vm2, %v739_v38, 0.0  ;;  %v640_v16 = vsel %vm572_vm2, %v3107_v50, 0.0 }
 0x122   :  { %v637_v27 = vadd.f32 %v636_v31, %v635_v30  ;;  %v832_v39 = vadd.f32 %v831_v26, %v830_v17  ;;  %v3363_v31 = vpop.f32.mrf.mxu2  ;;  %v642_v26 = vsel %vm572_vm2, %v3113_v53, 0.0 }
 0x124   :  { %v639_v10 = vadd.f32 %v638_v1, %v637_v27  ;;  %v834_v43 = vadd.f32 %v833_v6, %v832_v39  ;;  %v742_v27 = vmul.f32 %v3121_v57, %v3121_v57  ;;  %v3370_v6 = vpop.f32.mrf.mxu3  ;;  %v839_v1 = vsel %vm572_vm2, %v741_v13, 0.0 }
 0x126   :  { %v641_v30 = vadd.f32 %v640_v16, %v639_v10  ;;  %v836_v17 = vadd.f32 %v835_v60, %v834_v43  ;;  %v644_v10 = vsel %vm572_vm2, %v3121_v57, 0.0  ;;  %v743_v43 = vmul.f32 %v3131_v62, %v3131_v62 }
 0x127   :  { %v841_v16 = vsel %vm572_vm2, %v742_v27, 0.0 }
 0x128   :  { %v643_v39 = vadd.f32 %v642_v26, %v641_v30  ;;  %v838_v38 = vadd.f32 %v837_v11, %v836_v17  ;;  %v744_v30 = vmul.f32 %v3141_v3, %v3141_v3  ;;  %v843_v13 = vsel %vm572_vm2, %v743_v43, 0.0 }
 0x129   :  { %v648_v26 = vsel %vm572_vm2, %v3141_v3, 0.0  ;;  %v847_v43 = vsel %vm572_vm2, %v745_v28, 0.0 }
 0x12a   :  { %v645_v60 = vadd.f32 %v644_v10, %v643_v39  ;;  %v840_v19 = vadd.f32 %v839_v1, %v838_v38  ;;  %v845_v27 = vsel %vm572_vm2, %v744_v30, 0.0  ;;  %v650_v1 = vsel %vm572_vm2, %v3178_v40, 0.0 }
 0x12b   :  { %v746_v10 = vmul.f32 %v3211_v42, %v3211_v42 }
 0x12c   :  { %v647_v17 = vadd.f32 %v646_v37, %v645_v60  ;;  %v842_v11 = vadd.f32 %v841_v16, %v840_v19  ;;  %v3392_v19 = vpop.f32.mrf.mxu2  ;;  %v652_v16 = vsel %vm572_vm2, %v3211_v42, 0.0 }
 0x12e   :  { %v844_v39 = vadd.f32 %v843_v13, %v842_v11  ;;  %v649_v38 = vadd.f32 %v648_v26, %v647_v17  ;;  %v747_v17 = vmul.f32 %v3240_v2, %v3240_v2  ;;  %v3399_v13 = vpop.f32.mrf.mxu3  ;;  %v849_v26 = vsel %vm572_vm2, %v746_v10, 0.0 }
 0x12f   :  { %v765_v24 = vmul.f32 %v3399_v13, %v3399_v13 }
 0x130   :  { %v651_v37 = vadd.f32 %v650_v1, %v649_v38  ;;  %v846_v60 = vadd.f32 %v845_v27, %v844_v39  ;;  %v654_v38 = vsel %vm572_vm2, %v3240_v2, 0.0  ;;  %v748_v39 = vmul.f32 %v3272_v20, %v3272_v20 }
 0x131   :  { %v851_v1 = vsel %vm572_vm2, %v747_v17, 0.0 }
 0x132   :  { %v653_v11 = vadd.f32 %v652_v16, %v651_v37  ;;  %v848_v30 = vadd.f32 %v847_v43, %v846_v60  ;;  %v749_v37 = vmul.f32 %v3303_v4, %v3303_v4  ;;  %v853_v10 = vsel %vm572_vm2, %v748_v39, 0.0 }
 0x133   :  { %v658_v16 = vsel %vm572_vm2, %v3303_v4, 0.0  ;;  %v857_v39 = vsel %vm572_vm2, %v750_v52, 0.0 }
 0x134   :  { %v655_v27 = vadd.f32 %v654_v38, %v653_v11  ;;  %v850_v28 = vadd.f32 %v849_v26, %v848_v30  ;;  %v855_v17 = vsel %vm572_vm2, %v749_v37, 0.0  ;;  %v660_v26 = vsel %vm572_vm2, %v3334_v49, 0.0 }
 0x135   :  { %v751_v38 = vmul.f32 %v3363_v31, %v3363_v31 }
 0x136   :  { %v657_v60 = vadd.f32 %v656_v56, %v655_v27  ;;  %v852_v43 = vadd.f32 %v851_v1, %v850_v28  ;;  %v3421_v28 = vpop.f32.mrf.mxu2  ;;  %v662_v1 = vsel %vm572_vm2, %v3363_v31, 0.0 }
 0x138   :  { %v659_v11 = vadd.f32 %v658_v16, %v657_v60  ;;  %v854_v30 = vadd.f32 %v853_v10, %v852_v43  ;;  %v752_v60 = vmul.f32 %v3392_v19, %v3392_v19  ;;  %v3428_v10 = vpop.f32.mrf.mxu3  ;;  %v859_v16 = vsel %vm572_vm2, %v751_v38, 0.0 }
 0x139   :  { %v668_v38 = vsel %vm572_vm2, %v3115_v54, 0.0 }
 0x13a   :  { %v856_v56 = vadd.f32 %v855_v17, %v854_v30  ;;  %v661_v27 = vadd.f32 %v660_v26, %v659_v11  ;;  %v664_v30 = vsel %vm572_vm2, %v3392_v19, 0.0  ;;  %v753_v11 = vmul.f32 %v3421_v28, %v3421_v28 }
 0x13b   :  { %v754_v26 = vmul.f32 %v3115_v54, %v3115_v54  ;;  %v861_v45 = vsel %vm572_vm2, %v752_v60, 0.0  ;;  %v670_v60 = vsel %vm572_vm2, %v3125_v59, 0.0 }
 0x13c   :  { %v858_v43 = vadd.f32 %v857_v39, %v856_v56  ;;  %v663_v37 = vadd.f32 %v662_v1, %v661_v27  ;;  %v666_v56 = vsel %vm572_vm2, %v3421_v28, 0.0  ;;  %v755_v1 = vmul.f32 %v3125_v59, %v3125_v59 }
 0x13d   :  { %v863_v35 = vsel %vm572_vm2, %v753_v11, 0.0  ;;  %v757_v11 = vmul.f32 %v3149_v7, %v3149_v7 }
 0x13e   :  { %v860_v17 = vadd.f32 %v859_v16, %v858_v43  ;;  %v665_v52 = vadd.f32 %v664_v30, %v663_v37  ;;  %v865_v16 = vsel %vm572_vm2, %v754_v26, 0.0  ;;  %v756_v30 = vmul.f32 %v3133_v63, %v3133_v63 }
 0x140   :  { %v862_v27 = vadd.f32 %v861_v45, %v860_v17  ;;  %v667_v39 = vadd.f32 %v666_v56, %v665_v52  ;;  %v867_v52 = vsel %vm572_vm2, %v755_v1, 0.0  ;;  %v672_v56 = vsel %vm572_vm2, %v3133_v63, 0.0 }
 0x141   :  { %v869_v26 = vsel %vm572_vm2, %v756_v30, 0.0 }
 0x142   :  { %v669_v43 = vadd.f32 %v668_v38, %v667_v39  ;;  %v864_v37 = vadd.f32 %v863_v35, %v862_v27  ;;  %v3455_v27 = vpop.f32.mrf.mxu3  ;;  %v674_v38 = vsel %vm572_vm2, %v3149_v7, 0.0 }
 0x144   :  { %v671_v45 = vadd.f32 %v670_v60, %v669_v43  ;;  %v866_v17 = vadd.f32 %v865_v16, %v864_v37  ;;  %v758_v43 = vmul.f32 %v3185_v5, %v3185_v5  ;;  %v871_v16 = vsel %vm572_vm2, %v757_v11, 0.0 }
 0x145   :  { %v676_v60 = vsel %vm572_vm2, %v3185_v5, 0.0 }
 0x146   :  { %v673_v39 = vadd.f32 %v672_v56, %v671_v45  ;;  %v868_v35 = vadd.f32 %v867_v52, %v866_v17  ;;  %v759_v45 = vmul.f32 %v3220_v9, %v3220_v9  ;;  %v873_v30 = vsel %vm572_vm2, %v758_v43, 0.0 }
 0x147   :  { %v678_v56 = vsel %vm572_vm2, %v3220_v9, 0.0  ;;  %v877_v43 = vsel %vm572_vm2, %v760_v32, 0.0 }
 0x148   :  { %v675_v37 = vadd.f32 %v674_v38, %v673_v39  ;;  %v870_v1 = vadd.f32 %v869_v26, %v868_v35  ;;  %v875_v11 = vsel %vm572_vm2, %v759_v45, 0.0  ;;  %v680_v26 = vsel %vm572_vm2, %v3248_v15, 0.0 }
 0x149   :  { %v761_v38 = vmul.f32 %v3279_v33, %v3279_v33 }
 0x14a   :  { %v677_v17 = vadd.f32 %v676_v60, %v675_v37  ;;  %v872_v52 = vadd.f32 %v871_v16, %v870_v1  ;;  %v682_v16 = vsel %vm572_vm2, %v3279_v33, 0.0  ;;  %v762_v60 = vmul.f32 %v3310_v25, %v3310_v25 }
 0x14b   :  { %v879_v45 = vsel %vm572_vm2, %v761_v38, 0.0 }
 0x14c   :  { %v679_v39 = vadd.f32 %v678_v56, %v677_v17  ;;  %v874_v35 = vadd.f32 %v873_v30, %v872_v52  ;;  %v3482_v30 = vpop.f32.mrf.mxu3  ;;  %v684_v56 = vsel %vm572_vm2, %v3310_v25, 0.0 }
 0x14e   :  { %v876_v37 = vadd.f32 %v875_v11, %v874_v35  ;;  %v681_v1 = vadd.f32 %v680_v26, %v679_v39  ;;  %v763_v39 = vmul.f32 %v3341_v22, %v3341_v22  ;;  %v881_v11 = vsel %vm572_vm2, %v762_v60, 0.0 }
 0x14f   :  { %v686_v26 = vsel %vm572_vm2, %v3341_v22, 0.0 }
 0x150   :  { %v683_v17 = vadd.f32 %v682_v16, %v681_v1  ;;  %v878_v52 = vadd.f32 %v877_v43, %v876_v37  ;;  %v764_v37 = vmul.f32 %v3370_v6, %v3370_v6  ;;  %v883_v38 = vsel %vm572_vm2, %v763_v39, 0.0 }
 0x151   :  { %v688_v16 = vsel %vm572_vm2, %v3370_v6, 0.0  ;;  %v887_v39 = vsel %vm572_vm2, %v765_v24, 0.0 }
 0x152   :  { %v685_v35 = vadd.f32 %v684_v56, %v683_v17  ;;  %v880_v32 = vadd.f32 %v879_v45, %v878_v52  ;;  %v885_v60 = vsel %vm572_vm2, %v764_v37, 0.0  ;;  %v690_v45 = vsel %vm572_vm2, %v3399_v13, 0.0 }
 0x153   :  { %v766_v56 = vmul.f32 %v3428_v10, %v3428_v10 }
 0x154   :  { %v687_v1 = vadd.f32 %v686_v26, %v685_v35  ;;  %v882_v43 = vadd.f32 %v881_v11, %v880_v32  ;;  %v692_v11 = vsel %vm572_vm2, %v3428_v10, 0.0  ;;  %v767_v26 = vmul.f32 %v3455_v27, %v3455_v27 }
 0x155   :  { %v889_v37 = vsel %vm572_vm2, %v766_v56, 0.0 }
 0x156   :  { %v689_v17 = vadd.f32 %v688_v16, %v687_v1  ;;  %v884_v52 = vadd.f32 %v883_v38, %v882_v43  ;;  %v3509_v38 = vpop.f32.mrf.mxu3  ;;  %v694_v16 = vsel %vm572_vm2, %v3455_v27, 0.0 }
 0x158   :  { %v691_v35 = vadd.f32 %v690_v45, %v689_v17  ;;  %v886_v32 = vadd.f32 %v885_v60, %v884_v52  ;;  %v768_v17 = vmul.f32 %v3482_v30, %v3482_v30  ;;  %v891_v60 = vsel %vm572_vm2, %v767_v26, 0.0 }
 0x159   :  { %v696_v45 = vsel %vm572_vm2, %v3482_v30, 0.0 }
 0x15a   :  { %v888_v1 = vadd.f32 %v887_v39, %v886_v32  ;;  %v693_v43 = vadd.f32 %v692_v11, %v691_v35  ;;  %v769_v35 = vmul.f32 %v3509_v38, %v3509_v38  ;;  %v893_v56 = vsel %vm572_vm2, %v768_v17, 0.0 }
 0x15b   :  { %v698_v11 = vsel %vm572_vm2, %v3509_v38, 0.0 }
 0x15c   :  { %v890_v52 = vadd.f32 %v889_v37, %v888_v1  ;;  %v695_v24 = vadd.f32 %v694_v16, %v693_v43  ;;  %v895_v1 = vsel %vm572_vm2, %v769_v35, 0.0 }
 0x15e   :  { %v892_v32 = vadd.f32 %v891_v60, %v890_v52  ;;  %v697_v39 = vadd.f32 %v696_v45, %v695_v24 }
 0x160   :  { %v894_v18 = vadd.f32 %v893_v56, %v892_v32  ;;  %v699_v44 = vadd.f32 %v698_v11, %v697_v39 }
 0x162   :  { %v700_v43 = vrot.slane %v699_v44, 4  ;;  %v896_v37 = vadd.f32 %v895_v1, %v894_v18 }
 0x164   :  { %v701_v26 = vadd.f32 %v700_v43, %v699_v44  ;;  %v897_v16 = vrot.slane %v896_v37, 4 }
 0x166   :  { %v702_v8 = vrot.slane %v701_v26, 2  ;;  %v898_v12 = vadd.f32 %v897_v16, %v896_v37 }
 0x168   :  { %v703_v21 = vadd.f32 %v702_v8, %v701_v26  ;;  %v899_v0 = vrot.slane %v898_v12, 2 }
 0x16a   :  { %v704_v61 = vrot.slane %v703_v21, 1  ;;  %v900_v52 = vadd.f32 %v899_v0, %v898_v12 }
 0x16c   :  { %v705_v24 = vadd.f32 %v704_v61, %v703_v21  ;;  %v901_v60 = vrot.slane %v900_v52, 1 }
 0x16e   :  { %v902_v17 = vadd.f32 %v901_v60, %v900_v52  ;;  %v3525_v45 = vmul.f32 0.001953125, %v705_v24 }
 0x170   :  { %v904_v58 = vmul.f32 0.001953125, %v902_v17  ;;  %v905_v32 = vmul.f32 %v3525_v45, %v3525_v45  ;;  %v943_v61 = vsub.f32 %v3113_v53, %v3525_v45  ;;  %v944_v0 = vsub.f32 %v3121_v57, %v3525_v45 }
 0x171   :  { %v945_v21 = vsub.f32 %v3131_v62, %v3525_v45  ;;  %v947_v43 = vsub.f32 %v3178_v40, %v3525_v45  ;;  %v948_v37 = vsub.f32 %v3211_v42, %v3525_v45  ;;  %v949_v53 = vsub.f32 %v3240_v2, %v3525_v45 }
 0x172   :  { %v906_v35 = vsub.f32 %v904_v58, %v905_v32  ;;  %v946_v58 = vsub.f32 %v3141_v3, %v3525_v45  ;;  %v950_v57 = vsub.f32 %v3272_v20, %v3525_v45  ;;  %v951_v62 = vsub.f32 %v3303_v4, %v3525_v45 }
 0x173   :  { %v952_v26 = vsub.f32 %v3334_v49, %v3525_v45  ;;  %v953_v3 = vsub.f32 %v3363_v31, %v3525_v45  ;;  %v954_v40 = vsub.f32 %v3392_v19, %v3525_v45  ;;  %v955_v42 = vsub.f32 %v3421_v28, %v3525_v45 }
 0x174   :  { %v907_v39 = vmax.f32 %v906_v35, 0.0  ;;  %v956_v2 = vsub.f32 %v3115_v54, %v3525_v45  ;;  %v957_v20 = vsub.f32 %v3125_v59, %v3525_v45  ;;  %v958_v4 = vsub.f32 %v3133_v63, %v3525_v45 }
 0x175   :  { %v959_v49 = vsub.f32 %v3149_v7, %v3525_v45  ;;  %v960_v19 = vsub.f32 %v3185_v5, %v3525_v45  ;;  %v961_v28 = vsub.f32 %v3220_v9, %v3525_v45  ;;  %v962_v54 = vsub.f32 %v3248_v15, %v3525_v45 }
 0x176   :  { %v972_v18 = vadd.f32 1e-05, %v907_v39  ;;  %v963_v59 = vsub.f32 %v3279_v33, %v3525_v45  ;;  %v964_v63 = vsub.f32 %v3310_v25, %v3525_v45  ;;  %v965_v7 = vsub.f32 %v3341_v22, %v3525_v45 }
 0x177   :  { %v966_v16 = vsub.f32 %v3370_v6, %v3525_v45  ;;  %v967_v5 = vsub.f32 %v3399_v13, %v3525_v45  ;;  %v968_v9 = vsub.f32 %v3428_v10, %v3525_v45  ;;  %v969_v15 = vsub.f32 %v3455_v27, %v3525_v45 }
 0x178   :  { %2831 = vrsqrt.f32 %v972_v18  ;;  %vm979_vm4 = vweird.f32 %v972_v18  ;;  %v970_v33 = vsub.f32 %v3482_v30, %v3525_v45 }
 0x17e   :  { %v2832_v44 = vpop.eup %2831 }
 0x17f   :  { %v974_v56 = vmul.f32 %v2832_v44, %v972_v18  ;;  %vm980_vm3 = vweird.f32 %v2832_v44 }
 0x180   :  { %vm981_vm5 = vmor %vm979_vm4, %vm980_vm3 }
 0x181   :  { %v975_v11 = vmul.f32 %v2832_v44, %v974_v56 }
 0x183   :  { %v976_v8 = vmul.f32 0.5, %v975_v11 }
 0x185   :  { %v977_v1 = vsub.f32 1.5, %v976_v8 }
 0x187   :  { %v978_v12 = vmul.f32 %v2832_v44, %v977_v1 }
 0x189   :  { %v3563_v31 = vsel %vm981_vm5, %v2832_v44, %v978_v12 }
 0x18a   :  { %v1018_v25 = vmul.f32 %v3563_v31, %v943_v61  ;;  %v1019_v52 = vmul.f32 %v3563_v31, %v944_v0  ;;  %v1020_v22 = vmul.f32 %v3563_v31, %v945_v21  ;;  %v1021_v6 = vmul.f32 %v3563_v31, %v946_v58 }
 0x18b   :  { %v1022_v24 = vmul.f32 %v3563_v31, %v947_v43  ;;  %v1023_v13 = vmul.f32 %v3563_v31, %v948_v37  ;;  %v1024_v10 = vmul.f32 %v3563_v31, %v949_v53  ;;  %v1025_v60 = vmul.f32 %v3563_v31, %v950_v57 }
 0x18c   :  { %v1026_v27 = vmul.f32 %v3563_v31, %v951_v62  ;;  %v1027_v30 = vmul.f32 %v3563_v31, %v952_v26  ;;  %v1028_v17 = vmul.f32 %v3563_v31, %v953_v3  ;;  %v1029_v32 = vmul.f32 %v3563_v31, %v954_v40 }
 0x18d   :  { %v1030_v35 = vmul.f32 %v3563_v31, %v955_v42  ;;  %v1031_v39 = vmul.f32 %v3563_v31, %v956_v2  ;;  %v1032_v18 = vmul.f32 %v3563_v31, %v957_v20  ;;  %v1033_v44 = vmul.f32 %v3563_v31, %v958_v4 }
 0x18e   :  { %v1034_v56 = vmul.f32 %v3563_v31, %v959_v49  ;;  %v1035_v11 = vmul.f32 %v3563_v31, %v960_v19  ;;  %v1036_v8 = vmul.f32 %v3563_v31, %v961_v28  ;;  %v1037_v1 = vmul.f32 %v3563_v31, %v962_v54 }
 0x18f   :  { %v1038_v61 = vmul.f32 %v3563_v31, %v963_v59  ;;  %v1039_v0 = vmul.f32 %v3563_v31, %v964_v63  ;;  %v1040_v21 = vmul.f32 %v3563_v31, %v965_v7  ;;  %v1041_v12 = vmul.f32 %v3563_v31, %v966_v16 }
 0x190   :  { %v1042_v58 = vmul.f32 %v3563_v31, %v967_v5  ;;  %v1043_v43 = vmul.f32 %v3563_v31, %v968_v9  ;;  %v1044_v37 = vmul.f32 %v3563_v31, %v969_v15  ;;  %v1045_v53 = vmul.f32 %v3563_v31, %v970_v33 }
 0x191   :  { %v940_v57 = vsub.f32 %v3086_v36, %v3525_v45  ;;  %v941_v62 = vsub.f32 %v3101_v47, %v3525_v45  ;;  %v942_v26 = vsub.f32 %v3107_v50, %v3525_v45  ;;  %v1111_v40 = vlaneseq }
 0x192   :  { %v971_v20 = vsub.f32 %v3509_v38, %v3525_v45  ;;  %v3635_v50 = vmax.f32 %v1018_v25, 0.0  ;;  %v3637_v28 = vmax.f32 %v1019_v52, 0.0  ;;  %v3639_v54 = vmax.f32 %v1020_v22, 0.0 }
 0x193   :  { %v1015_v3 = vmul.f32 %v3563_v31, %v940_v57  ;;  %v1016_v42 = vmul.f32 %v3563_v31, %v941_v62  ;;  %v1017_v2 = vmul.f32 %v3563_v31, %v942_v26  ;;  %v3629_v36 = vshrl.u32 %v1111_v40, 7 }
 0x194   :  { %v1046_v4 = vmul.f32 %v3563_v31, %v971_v20  ;;  %6582 = vst [vmem:[#allocation28_spill] sm:$0xff] %v3635_v50  ;;  %v3641_v59 = vmax.f32 %v1021_v6, 0.0  ;;  %v3643_v63 = vmax.f32 %v1022_v24, 0.0  ;;  %v3645_v38 = vmax.f32 %v1023_v13, 0.0 }
 0x195   :  { %v3627_v49 = vmax.f32 %v1015_v3, 0.0  ;;  %v3631_v47 = vmax.f32 %v1016_v42, 0.0  ;;  %v3633_v19 = vmax.f32 %v1017_v2, 0.0  ;;  %6583 = vst [vmem:[#allocation29_spill] sm:$0xff] %v3637_v28  ;;  %v3647_v7 = vmax.f32 %v1024_v10, 0.0 }
 0x196   :  { %6584 = vst [vmem:[#allocation30_spill] sm:$0xff] %v3639_v54  ;;  %v3649_v16 = vmax.f32 %v1025_v60, 0.0  ;;  %v3651_v5 = vmax.f32 %v1026_v27, 0.0  ;;  %v3653_v9 = vmax.f32 %v1027_v30, 0.0  ;;  %v3655_v15 = vmax.f32 %v1028_v17, 0.0 }
 0x197   :  { %6579 = vst [vmem:[#allocation25_spill] sm:$0xff] %v3627_v49  ;;  %v3657_v33 = vmax.f32 %v1029_v32, 0.0  ;;  %v3659_v25 = vmax.f32 %v1030_v35, 0.0  ;;  %v3661_v52 = vmax.f32 %v1031_v39, 0.0  ;;  %v3663_v22 = vmax.f32 %v1032_v18, 0.0 }
 0x198   :  { %6580 = vst [vmem:[#allocation26_spill] sm:$0xff] %v3631_v47  ;;  %v3665_v6 = vmax.f32 %v1033_v44, 0.0  ;;  %v3667_v24 = vmax.f32 %v1034_v56, 0.0  ;;  %v3669_v13 = vmax.f32 %v1035_v11, 0.0  ;;  %v3671_v10 = vmax.f32 %v1036_v8, 0.0 }
 0x199   :  { %6581 = vst [vmem:[#allocation27_spill] sm:$0xff] %v3633_v19  ;;  %v3673_v60 = vmax.f32 %v1037_v1, 0.0  ;;  %v3675_v27 = vmax.f32 %v1038_v61, 0.0  ;;  %v3677_v30 = vmax.f32 %v1039_v0, 0.0  ;;  %v3679_v17 = vmax.f32 %v1040_v21, 0.0 }
 0x19a   :  { %6585 = vst [vmem:[#allocation31_spill] sm:$0xff] %v3641_v59  ;;  %v3681_v32 = vmax.f32 %v1041_v12, 0.0  ;;  %v3683_v35 = vmax.f32 %v1042_v58, 0.0  ;;  %v3685_v39 = vmax.f32 %v1043_v43, 0.0  ;;  %v3687_v18 = vmax.f32 %v1044_v37, 0.0 }
 0x19b   :  { %6586 = vst [vmem:[#allocation32_spill] sm:$0xff] %v3643_v63  ;;  %v3689_v44 = vmax.f32 %v1045_v53, 0.0  ;;  %v3691_v56 = vmax.f32 %v1046_v4, 0.0  ;;  %v1179_v61 = vrot.slane %v3635_v50, 7  ;;  %v1180_v0 = vrot.slane %v3637_v28, 7 }
 0x19c   :  { %6587 = vst [vmem:[#allocation33_spill] sm:$0xff] %v3645_v38  ;;  %v1181_v21 = vrot.slane %v3639_v54, 7  ;;  %v1182_v12 = vrot.slane %v3641_v59, 7  ;;  %v1183_v58 = vrot.slane %v3643_v63, 7  ;;  %v1184_v43 = vrot.slane %v3645_v38, 7 }
 0x19d   :  { %6588 = vst [vmem:[#allocation34_spill] sm:$0xff] %v3647_v7  ;;  %v1185_v37 = vrot.slane %v3647_v7, 7  ;;  %v1186_v53 = vrot.slane %v3649_v16, 7  ;;  %v1187_v57 = vrot.slane %v3651_v5, 7  ;;  %v1188_v62 = vrot.slane %v3653_v9, 7 }
 0x19e   :  { %6589 = vst [vmem:[#allocation35_spill] sm:$0xff] %v3649_v16  ;;  %v1189_v26 = vrot.slane %v3655_v15, 7  ;;  %v1190_v3 = vrot.slane %v3657_v33, 7  ;;  %v1191_v40 = vrot.slane %v3659_v25, 7  ;;  %v1192_v42 = vrot.slane %v3661_v52, 7 }
 0x19f   :  { %6590 = vst [vmem:[#allocation36_spill] sm:$0xff] %v3651_v5  ;;  %v1195_v2 = vrot.slane %v3667_v24, 7  ;;  %v1196_v20 = vrot.slane %v3669_v13, 7  ;;  %v1197_v4 = vrot.slane %v3671_v10, 7  ;;  %v1198_v11 = vrot.slane %v3673_v60, 7 }
 0x1a0   :  { %6591 = vst [vmem:[#allocation37_spill] sm:$0xff] %v3653_v9  ;;  %v1199_v8 = vrot.slane %v3675_v27, 7  ;;  %v1200_v1 = vrot.slane %v3677_v30, 7  ;;  %vm1208_vm6 = vcmp.lt.s32.totalorder %v3629_v36, 1  ;;  %vm1273_vm7 = vcmp.ge.s32.totalorder %v3629_v36, 1 }
 0x1a1   :  { %6592 = vst [vmem:[#allocation38_spill] sm:$0xff] %v3655_v15  ;;  %v1201_v15 = vrot.slane %v3679_v17, 7  ;;  %vm1475_vm8 = vcmp.lt.s32.totalorder %v3629_v36, 7 }
 0x1a2   :  { %6593 = vst [vmem:[#allocation39_spill] sm:$0xff] %v3657_v33  ;;  %v1202_v33 = vrot.slane %v3681_v32, 7 }
 0x1a3   :  { %6594 = vst [vmem:[#allocation40_spill] sm:$0xff] %v3659_v25  ;;  %v1203_v25 = vrot.slane %v3683_v35, 7 }
 0x1a4   :  { %6595 = vst [vmem:[#allocation41_spill] sm:$0xff] %v3661_v52  ;;  %v1204_v52 = vrot.slane %v3685_v39, 7 }
 0x1a5   :  { %6596 = vst [vmem:[#allocation42_spill] sm:$0xff] %v3663_v22 }
 0x1a6   :  { %6597 = vst [vmem:[#allocation43_spill] sm:$0xff] %v3665_v6 }
 0x1a7   :  { %6598 = vst [vmem:[#allocation44_spill] sm:$0xff] %v3667_v24  ;;  %v1205_v24 = vrot.slane %v3687_v18, 7 }
 0x1a8   :  { %6599 = vst [vmem:[#allocation45_spill] sm:$0xff] %v3669_v13  ;;  %v1206_v13 = vrot.slane %v3689_v44, 7 }
 0x1a9   :  { %6600 = vst [vmem:[#allocation46_spill] sm:$0xff] %v3671_v10  ;;  %v1193_v10 = vrot.slane %v3663_v22, 7 }
 0x1aa   :  { %6601 = vst [vmem:[#allocation47_spill] sm:$0xff] %v3673_v60  ;;  %v1194_v60 = vrot.slane %v3665_v6, 7 }
 0x1ab   :  { %6602 = vst [vmem:[#allocation48_spill] sm:$0xff] %v3675_v27  ;;  %v6293_v27 = vrot.slane %v3691_v56, 7 }
 0x1ac   :  { %6603 = vst [vmem:[#allocation49_spill] sm:$0xff] %v3677_v30 }
 0x1ad   :  { %6604 = vst [vmem:[#allocation50_spill] sm:$0xff] %v3679_v17  ;;  %v3728_v17 = vsel %vm1208_vm6, %v1205_v24, %v1206_v13 }
 0x1ae   :  { %6605 = vst [vmem:[#allocation51_spill] sm:$0xff] %v3681_v32  ;;  %v3750_v32 = vsel %vm1208_vm6, %v1201_v15, %v1202_v33 }
 0x1af   :  { %6606 = vst [vmem:[#allocation52_spill] sm:$0xff] %v3683_v35  ;;  %v3732_v35 = vsel %vm1208_vm6, %v1204_v52, %v1205_v24  ;;  %v3754_v24 = vsel %vm1208_vm6, %v1200_v1, %v1201_v15  ;;  %v3774_v15 = vsel %vm1208_vm6, %v1195_v2, %v1196_v20  ;;  %v6708_v28 = vld [vmem:[#allocation45_spill] sm:$0xff] }
 0x1b0   :  { %6607 = vst [vmem:[#allocation53_spill] sm:$0xff] %v3685_v39  ;;  %v3746_v39 = vsel %vm1208_vm6, %v1206_v13, %v6293_v27  ;;  %v3766_v13 = vsel %vm1208_vm6, %v1197_v4, %v1198_v11  ;;  %v3824_v27 = vsel %vm1208_vm6, %v1182_v12, %v1183_v58 }
 0x1b1   :  { %6608 = vst [vmem:[#allocation54_spill] sm:$0xff] %v3687_v18  ;;  %v3736_v18 = vsel %vm1208_vm6, %v1203_v25, %v1204_v52  ;;  %v3758_v52 = vsel %vm1208_vm6, %v1199_v8, %v1200_v1  ;;  %v3778_v1 = vsel %vm1208_vm6, %v1194_v60, %v1195_v2  ;;  %v3798_v2 = vsel %vm1208_vm6, %v1189_v26, %v1190_v3 }
 0x1b2   :  { %6609 = vst [vmem:[#allocation55_spill] sm:$0xff] %v3689_v44  ;;  %v3740_v44 = vsel %vm1208_vm6, %v1202_v33, %v1203_v25  ;;  %v3762_v25 = vsel %vm1208_vm6, %v1198_v11, %v1199_v8  ;;  %v3770_v33 = vsel %vm1208_vm6, %v1196_v20, %v1197_v4  ;;  %v3782_v8 = vsel %vm1208_vm6, %v1193_v10, %v1194_v60 }
 0x1b3   :  { %6610 = vst [vmem:[#allocation56_spill] sm:$0xff] %v3691_v56  ;;  %v3786_v11 = vsel %vm1208_vm6, %v1192_v42, %v1193_v10  ;;  %v3790_v4 = vsel %vm1208_vm6, %v1191_v40, %v1192_v42  ;;  %v3794_v20 = vsel %vm1208_vm6, %v1190_v3, %v1191_v40  ;;  %v3802_v60 = vsel %vm1208_vm6, %v1188_v62, %v1189_v26 }
 0x1b4   :  { %6611 = vst [vmem:[#allocation57_spill] sm:$0xff] %v3732_v35  ;;  %v3806_v10 = vsel %vm1208_vm6, %v1187_v57, %v1188_v62  ;;  %v3810_v42 = vsel %vm1208_vm6, %v1186_v53, %v1187_v57  ;;  %v3814_v40 = vsel %vm1208_vm6, %v1185_v37, %v1186_v53  ;;  %v3818_v3 = vsel %vm1208_vm6, %v1184_v43, %v1185_v37 }
 0x1b5   :  { %6612 = vst [vmem:[#allocation58_spill] sm:$0xff] %v3740_v44  ;;  %v1232_v26 = vsel %vm1208_vm6, %v1183_v58, %v1184_v43  ;;  %v1234_v62 = vsel %vm1208_vm6, %v1181_v21, %v1182_v12  ;;  %v3830_v57 = vsel %vm1208_vm6, %v1180_v0, %v1181_v21  ;;  %v1236_v53 = vsel %vm1208_vm6, %v1179_v61, %v1180_v0 }
 0x1b6   :  { %6613 = vst [vmem:[#allocation59_spill] sm:$0xff] %v3746_v39  ;;  %v908_v37 = vsub.f32 %v3061_v14, %v3525_v45  ;;  %v6625_v39 = vrot.slane %v3633_v19, 7  ;;  %v6627_v58 = vrot.slane %v3631_v47, 7  ;;  %v6628_v12 = vrot.slane %v3627_v49, 7  ;;  %v6717_v47 = vld [vmem:[#allocation51_spill] sm:$0xff] }
 0x1b7   :  { %6614 = vst [vmem:[#allocation60_spill] sm:$0xff] %v3754_v24  ;;  %v909_v0 = vsub.f32 %v3067_v23, %v3525_v45  ;;  %v910_v14 = vsub.f32 %v3077_v29, %v3525_v45  ;;  %v911_v19 = vsub.f32 %v3082_v34, %v3525_v45  ;;  %v914_v49 = vsub.f32 %v3103_v48, %v3525_v45  ;;  %v6630_v29 = vld [vmem:[#allocation10_spill] sm:$0xff]  ;;  %v6631_v34 = vld [vmem:[#allocation12_spill] sm:$0xff]  ;;  %v6634_v48 = vld [vmem:[#allocation17_spill] sm:$0xff] }
 0x1b8   :  { %6615 = vst [vmem:[#allocation61_spill] sm:$0xff] %v3762_v25  ;;  %v3840_v43 = vsel %vm1208_vm6, %v6625_v39, %v1179_v61  ;;  %v3848_v21 = vsel %vm1208_vm6, %v6628_v12, %v6627_v58  ;;  %v912_v39 = vsub.f32 %v3094_v41, %v3525_v45  ;;  %v913_v61 = vsub.f32 %v3099_v46, %v3525_v45  ;;  %v6632_v41 = vld [vmem:[#allocation13_spill] sm:$0xff]  ;;  %v6633_v46 = vld [vmem:[#allocation15_spill] sm:$0xff] }
 0x1b9   :  { %6616 = vst [vmem:[#allocation62_spill] sm:$0xff] %v3770_v33  ;;  %v915_v58 = vsub.f32 %v3109_v51, %v3525_v45  ;;  %v916_v23 = vsub.f32 %v3117_v55, %v3525_v45  ;;  %v917_v12 = vsub.f32 %v6630_v29, %v3525_v45  ;;  %v918_v56 = vsub.f32 %v6631_v34, %v3525_v45  ;;  %v6635_v51 = vld [vmem:[#allocation19_spill] sm:$0xff]  ;;  %v6636_v55 = vld [vmem:[#allocation21_spill] sm:$0xff]  ;;  %v6637_v29 = vld [vmem:[#allocation2_spill] sm:$0xff] }
 0x1ba   :  { %6617 = vst [vmem:[#allocation63_spill] sm:$0xff] %v3778_v1  ;;  %v919_v35 = vsub.f32 %v6632_v41, %v3525_v45  ;;  %v920_v44 = vsub.f32 %v6633_v46, %v3525_v45  ;;  %v921_v24 = vsub.f32 %v6634_v48, %v3525_v45  ;;  %v922_v30 = vsub.f32 %v6635_v51, %v3525_v45  ;;  %v6638_v34 = vld [vmem:[#allocation3_spill] sm:$0xff]  ;;  %v6639_v41 = vld [vmem:[#allocation4_spill] sm:$0xff]  ;;  %v6640_v46 = vld [vmem:[#allocation5_spill] sm:$0xff] }
 0x1bb   :  { %6618 = vst [vmem:[#allocation64_spill] sm:$0xff] %v3786_v11  ;;  %v923_v25 = vsub.f32 %v6636_v55, %v3525_v45  ;;  %v924_v33 = vsub.f32 %v6637_v29, %v3525_v45  ;;  %v925_v1 = vsub.f32 %v6638_v34, %v3525_v45  ;;  %v926_v6 = vsub.f32 %v6639_v41, %v3525_v45  ;;  %v6641_v48 = vld [vmem:[#allocation6_spill] sm:$0xff]  ;;  %v6642_v51 = vld [vmem:[#allocation7_spill] sm:$0xff]  ;;  %v6643_v55 = vld [vmem:[#allocation8_spill] sm:$0xff] }
 0x1bc   :  { %6619 = vst [vmem:[#allocation65_spill] sm:$0xff] %v3794_v20  ;;  %v927_v11 = vsub.f32 %v6640_v46, %v3525_v45  ;;  %v928_v22 = vsub.f32 %v6641_v48, %v3525_v45  ;;  %v929_v20 = vsub.f32 %v6642_v51, %v3525_v45  ;;  %v6644_v29 = vld [vmem:[#allocation9_spill] sm:$0xff]  ;;  %v6645_v34 = vld [vmem:[#allocation11_spill] sm:$0xff]  ;;  %v6646_v41 = vld [vmem:[#allocation14_spill] sm:$0xff]  ;;  %v984_v59 = vmul.f32 %v3563_v31, %v909_v0 }
 0x1bd   :  { %6620 = vst [vmem:[#allocation66_spill] sm:$0xff] %v3802_v60  ;;  %v930_v60 = vsub.f32 %v6643_v55, %v3525_v45  ;;  %v931_v9 = vsub.f32 %v6644_v29, %v3525_v45  ;;  %v933_v5 = vsub.f32 %v6646_v41, %v3525_v45  ;;  %v6647_v46 = vld [vmem:[#allocation16_spill] sm:$0xff]  ;;  %v6648_v48 = vld [vmem:[#allocation18_spill] sm:$0xff]  ;;  %v6651_v29 = vld [vmem:[#allocation23_spill] sm:$0xff]  ;;  %v983_v41 = vmul.f32 %v3563_v31, %v908_v37 }
 0x1be   :  { %6621 = vst [vmem:[#allocation67_spill] sm:$0xff] %v3810_v42  ;;  %v932_v42 = vsub.f32 %v6645_v34, %v3525_v45  ;;  %v934_v16 = vsub.f32 %v6647_v46, %v3525_v45  ;;  %v6649_v51 = vld [vmem:[#allocation20_spill] sm:$0xff]  ;;  %v6650_v55 = vld [vmem:[#allocation22_spill] sm:$0xff]  ;;  %v985_v46 = vmul.f32 %v3563_v31, %v910_v14  ;;  %v990_v54 = vmul.f32 %v3563_v31, %v915_v58 }
 0x1bf   :  { %6622 = vst [vmem:[#allocation68_spill] sm:$0xff] %v3818_v3  ;;  %v935_v3 = vsub.f32 %v6648_v48, %v3525_v45  ;;  %v936_v7 = vsub.f32 %v6649_v51, %v3525_v45  ;;  %v937_v38 = vsub.f32 %v6650_v55, %v3525_v45  ;;  %v6652_v34 = vld [vmem:[#allocation24_spill] sm:$0xff]  ;;  %v986_v48 = vmul.f32 %v3563_v31, %v911_v19 }
 0x1c0   :  { %6623 = vst [vmem:[#allocation69_spill] sm:$0xff] %v3824_v27  ;;  %v938_v27 = vsub.f32 %v6651_v29, %v3525_v45  ;;  %v939_v63 = vsub.f32 %v6652_v34, %v3525_v45  ;;  %v988_v51 = vmul.f32 %v3563_v31, %v913_v61  ;;  %v989_v55 = vmul.f32 %v3563_v31, %v914_v49 }
 0x1c1   :  { %6624 = vst [vmem:[#allocation70_spill] sm:$0xff] %v3830_v57  ;;  %v987_v57 = vmul.f32 %v3563_v31, %v912_v39  ;;  %v991_v45 = vmul.f32 %v3563_v31, %v916_v23  ;;  %v992_v37 = vmul.f32 %v3563_v31, %v917_v12  ;;  %v993_v0 = vmul.f32 %v3563_v31, %v918_v56 }
 0x1c2   :  { %6626 = vst [vmem:[#allocation71_spill] sm:$0xff] %v3840_v43  ;;  %v994_v14 = vmul.f32 %v3563_v31, %v919_v35  ;;  %v995_v19 = vmul.f32 %v3563_v31, %v920_v44  ;;  %v996_v39 = vmul.f32 %v3563_v31, %v921_v24  ;;  %v997_v61 = vmul.f32 %v3563_v31, %v922_v30  ;;  %v6694_v43 = vld [vmem:[#allocation36_spill] sm:$0xff] }
 0x1c3   :  { %6629 = vst [vmem:[#allocation72_spill] sm:$0xff] %v3848_v21  ;;  %v998_v49 = vmul.f32 %v3563_v31, %v923_v25  ;;  %v999_v58 = vmul.f32 %v3563_v31, %v924_v33  ;;  %v1000_v29 = vmul.f32 %v3563_v31, %v925_v1  ;;  %v3933_v23 = vsel %vm1273_vm7, %v1236_v53, -inf  ;;  %v6724_v21 = vld [vmem:[#allocation56_spill] sm:$0xff] }
 0x1c4   :  { %6653 = vst [vmem:[#allocation10_spill] sm:$0xff] %v3933_v23  ;;  %v3937_v56 = vsel %vm1273_vm7, %v1234_v62, -inf  ;;  %v3941_v35 = vsel %vm1273_vm7, %v1232_v26, -inf  ;;  %v3946_v30 = vsel %vm1273_vm7, %v3814_v40, -inf  ;;  %v3951_v44 = vsel %vm1273_vm7, %v3806_v10, -inf  ;;  %v6742_v23 = vld [vmem:[#allocation31_spill] sm:$0xff] }
 0x1c5   :  { %6654 = vst [vmem:[#allocation12_spill] sm:$0xff] %v3937_v56  ;;  %v3956_v24 = vsel %vm1273_vm7, %v3798_v2, -inf  ;;  %v3961_v25 = vsel %vm1273_vm7, %v3790_v4, -inf  ;;  %v3966_v33 = vsel %vm1273_vm7, %v3782_v8, -inf  ;;  %v3971_v1 = vsel %vm1273_vm7, %v3774_v15, -inf  ;;  %v6741_v56 = vld [vmem:[#allocation29_spill] sm:$0xff] }
 0x1c6   :  { %6655 = vst [vmem:[#allocation13_spill] sm:$0xff] %v3941_v35  ;;  %v3976_v2 = vsel %vm1273_vm7, %v3766_v13, -inf  ;;  %v3981_v4 = vsel %vm1273_vm7, %v3758_v52, -inf  ;;  %v3986_v8 = vsel %vm1273_vm7, %v3750_v32, -inf  ;;  %v3991_v15 = vsel %vm1273_vm7, %v3736_v18, -inf  ;;  %v6740_v35 = vld [vmem:[#allocation27_spill] sm:$0xff] }
 0x1c7   :  { %6656 = vst [vmem:[#allocation15_spill] sm:$0xff] %v3946_v30  ;;  %v3996_v13 = vsel %vm1273_vm7, %v3728_v17, -inf  ;;  %v1001_v10 = vmul.f32 %v3563_v31, %v926_v6  ;;  %v1002_v52 = vmul.f32 %v3563_v31, %v927_v11  ;;  %v1003_v40 = vmul.f32 %v3563_v31, %v928_v22  ;;  %v6739_v30 = vld [vmem:[#allocation26_spill] sm:$0xff] }
 0x1c8   :  { %6657 = vst [vmem:[#allocation17_spill] sm:$0xff] %v3951_v44  ;;  %v1004_v26 = vmul.f32 %v3563_v31, %v929_v20  ;;  %v1005_v32 = vmul.f32 %v3563_v31, %v930_v60  ;;  %v1006_v62 = vmul.f32 %v3563_v31, %v931_v9  ;;  %v1007_v18 = vmul.f32 %v3563_v31, %v932_v42 }
 0x1c9   :  { %6658 = vst [vmem:[#allocation19_spill] sm:$0xff] %v3956_v24  ;;  %v1008_v53 = vmul.f32 %v3563_v31, %v933_v5  ;;  %v1009_v12 = vmul.f32 %v3563_v31, %v934_v16  ;;  %v1010_v17 = vmul.f32 %v3563_v31, %v935_v3  ;;  %v1011_v6 = vmul.f32 %v3563_v31, %v936_v7 }
 0x1ca   :  { %6659 = vst [vmem:[#allocation21_spill] sm:$0xff] %v3961_v25  ;;  %v1012_v11 = vmul.f32 %v3563_v31, %v937_v38  ;;  %v1013_v22 = vmul.f32 %v3563_v31, %v938_v27  ;;  %v1014_v20 = vmul.f32 %v3563_v31, %v939_v63  ;;  %v4012_v34 = vmax.f32 %v983_v41, 0.0 }
 0x1cb   :  { %6660 = vst [vmem:[#allocation2_spill] sm:$0xff] %v3966_v33  ;;  %v4014_v60 = vmax.f32 %v984_v59, 0.0  ;;  %v4016_v9 = vmax.f32 %v985_v46, 0.0  ;;  %v4018_v42 = vmax.f32 %v986_v48, 0.0  ;;  %v4020_v5 = vmax.f32 %v987_v57, 0.0 }
 0x1cc   :  { %6661 = vst [vmem:[#allocation3_spill] sm:$0xff] %v3971_v1  ;;  %v4022_v16 = vmax.f32 %v988_v51, 0.0  ;;  %v4024_v3 = vmax.f32 %v989_v55, 0.0  ;;  %v4026_v7 = vmax.f32 %v990_v54, 0.0  ;;  %v4028_v38 = vmax.f32 %v991_v45, 0.0  ;;  %v6720_v45 = vld [vmem:[#allocation53_spill] sm:$0xff] }
 0x1cd   :  { %6662 = vst [vmem:[#allocation4_spill] sm:$0xff] %v3976_v2  ;;  %v4030_v27 = vmax.f32 %v992_v37, 0.0  ;;  %v4032_v31 = vmax.f32 %v993_v0, 0.0  ;;  %v4034_v59 = vmax.f32 %v994_v14, 0.0  ;;  %v4036_v63 = vmax.f32 %v995_v19, 0.0  ;;  %v6685_v14 = vld [vmem:[#allocation30_spill] sm:$0xff] }
 0x1ce   :  { %6663 = vst [vmem:[#allocation5_spill] sm:$0xff] %v3981_v4  ;;  %v4038_v41 = vmax.f32 %v996_v39, 0.0  ;;  %v4040_v57 = vmax.f32 %v997_v61, 0.0  ;;  %v4042_v46 = vmax.f32 %v998_v49, 0.0  ;;  %v4044_v48 = vmax.f32 %v999_v58, 0.0  ;;  %v6688_v58 = vld [vmem:[#allocation32_spill] sm:$0xff] }
 0x1cf   :  { %6664 = vst [vmem:[#allocation6_spill] sm:$0xff] %v3986_v8  ;;  %v4046_v54 = vmax.f32 %v1000_v29, 0.0  ;;  %v4048_v51 = vmax.f32 %v1001_v10, 0.0  ;;  %v4050_v55 = vmax.f32 %v1002_v52, 0.0  ;;  %v6697_v19 = vld [vmem:[#allocation38_spill] sm:$0xff]  ;;  %v6700_v29 = vld [vmem:[#allocation40_spill] sm:$0xff] }
 0x1d0   :  { %6665 = vst [vmem:[#allocation7_spill] sm:$0xff] %v3991_v15  ;;  %v6706_v0 = vld [vmem:[#allocation44_spill] sm:$0xff]  ;;  %v6709_v49 = vld [vmem:[#allocation46_spill] sm:$0xff]  ;;  %v6723_v61 = vld [vmem:[#allocation55_spill] sm:$0xff]  ;;  %v4112_v52 = vmax.f32 %v1003_v40, 0.0  ;;  %v4114_v33 = vmax.f32 %v1004_v26, 0.0 }
 0x1d1   :  { %6666 = vst [vmem:[#allocation8_spill] sm:$0xff] %v3996_v13  ;;  %v6715_v37 = vld [vmem:[#allocation50_spill] sm:$0xff]  ;;  %v6718_v39 = vld [vmem:[#allocation52_spill] sm:$0xff]  ;;  %v4116_v44 = vmax.f32 %v1005_v32, 0.0  ;;  %v4118_v8 = vmax.f32 %v1006_v62, 0.0  ;;  %v4120_v1 = vmax.f32 %v1007_v18, 0.0 }
 0x1d2   :  { %6667 = vst [vmem:[#allocation9_spill] sm:$0xff] %v4014_v60  ;;  %v6721_v10 = vld [vmem:[#allocation54_spill] sm:$0xff]  ;;  %v4122_v24 = vmax.f32 %v1008_v53, 0.0  ;;  %v4124_v15 = vmax.f32 %v1009_v12, 0.0  ;;  %v4126_v2 = vmax.f32 %v1010_v17, 0.0  ;;  %v4128_v25 = vmax.f32 %v1011_v6, 0.0 }
 0x1d3   :  { %6668 = vst [vmem:[#allocation11_spill] sm:$0xff] %v4016_v9  ;;  %v4130_v13 = vmax.f32 %v1012_v11, 0.0  ;;  %v4132_v40 = vmax.f32 %v1013_v22, 0.0  ;;  %v4134_v26 = vmax.f32 %v1014_v20, 0.0  ;;  %v4137_v32 = vadd.s32 8, %v3629_v36  ;;  %v6747_v60 = vld [vmem:[#allocation47_spill] sm:$0xff] }
 0x1d4   :  { %6669 = vst [vmem:[#allocation14_spill] sm:$0xff] %v4018_v42  ;;  %v1446_v6 = vrot.slane %v3635_v50, 1  ;;  %v1447_v11 = vrot.slane %v6741_v56, 1  ;;  %v1448_v22 = vrot.slane %v6685_v14, 1  ;;  %v1449_v20 = vrot.slane %v6742_v23, 1  ;;  %v6748_v9 = vld [vmem:[#allocation49_spill] sm:$0xff] }
 0x1d5   :  { %6670 = vst [vmem:[#allocation16_spill] sm:$0xff] %v4020_v5  ;;  %v1450_v4 = vrot.slane %v6688_v58, 1  ;;  %v1454_v12 = vrot.slane %v6694_v43, 1  ;;  %v1456_v50 = vrot.slane %v6697_v19, 1  ;;  %v1458_v14 = vrot.slane %v6700_v29, 1  ;;  %v6749_v42 = vld [vmem:[#allocation41_spill] sm:$0xff] }
 0x1d6   :  { %6671 = vst [vmem:[#allocation18_spill] sm:$0xff] %v4022_v16  ;;  %v1462_v23 = vrot.slane %v6706_v0, 1  ;;  %v1463_v58 = vrot.slane %v6708_v28, 1  ;;  %v1467_v43 = vrot.slane %v6748_v9, 1  ;;  %v1469_v19 = vrot.slane %v6717_v47, 1  ;;  %v6750_v5 = vld [vmem:[#allocation42_spill] sm:$0xff] }
 0x1d7   :  { %6672 = vst [vmem:[#allocation20_spill] sm:$0xff] %v4026_v7  ;;  %v6744_v7 = vld [vmem:[#allocation35_spill] sm:$0xff]  ;;  %v1471_v29 = vrot.slane %v6720_v45, 1  ;;  %v1472_v0 = vrot.slane %v6721_v10, 1  ;;  %v1473_v28 = vrot.slane %v6723_v61, 1 }
 0x1d8   :  { %6673 = vst [vmem:[#allocation22_spill] sm:$0xff] %v4028_v38  ;;  %v1453_v53 = vrot.slane %v6744_v7, 1  ;;  %v6745_v38 = vld [vmem:[#allocation37_spill] sm:$0xff]  ;;  %v6751_v16 = vld [vmem:[#allocation43_spill] sm:$0xff] }
 0x1d9   :  { %6674 = vst [vmem:[#allocation23_spill] sm:$0xff] %v4030_v27  ;;  %v1455_v17 = vrot.slane %v6745_v38, 1  ;;  %v6746_v27 = vld [vmem:[#allocation39_spill] sm:$0xff]  ;;  %v1468_v38 = vrot.slane %v6715_v37, 1  ;;  %v1461_v9 = vrot.slane %v6751_v16, 1  ;;  %v4202_v10 = vsel %vm1475_vm8, %v1472_v0, %v1473_v28 }
 0x1da   :  { %6675 = vst [vmem:[#allocation24_spill] sm:$0xff] %v4032_v31  ;;  %v1457_v56 = vrot.slane %v6746_v27, 1  ;;  %v1470_v27 = vrot.slane %v6718_v39, 1  ;;  %v4206_v61 = vsel %vm1475_vm8, %v1471_v29, %v1472_v0  ;;  %v1165_v37 = vrot.slane %v4114_v33, 7 }
 0x1db   :  { %6676 = vst [vmem:[#allocation73_spill] sm:$0xff] %v4034_v59  ;;  %v6771_v16 = vrot.slane %v6740_v35, 7 }
 0x1dc   :  { %6677 = vst [vmem:[#allocation74_spill] sm:$0xff] %v4036_v63  ;;  %v4210_v45 = vsel %vm1475_vm8, %v1470_v27, %v1471_v29  ;;  %v4214_v47 = vsel %vm1475_vm8, %v1469_v19, %v1470_v27 }
 0x1dd   :  { %6678 = vst [vmem:[#allocation75_spill] sm:$0xff] %v4038_v41 }
 0x1de   :  { %6679 = vst [vmem:[#allocation76_spill] sm:$0xff] %v4040_v57 }
 0x1df   :  { %6680 = vst [vmem:[#allocation77_spill] sm:$0xff] %v4042_v46 }
 0x1e0   :  { %6681 = vst [vmem:[#allocation78_spill] sm:$0xff] %v4044_v48 }
 0x1e1   :  { %6682 = vst [vmem:[#allocation79_spill] sm:$0xff] %v4046_v54 }
 0x1e2   :  { %6683 = vst [vmem:[#allocation80_spill] sm:$0xff] %v4048_v51  ;;  %v6691_v51 = vld [vmem:[#allocation34_spill] sm:$0xff] }
 0x1e3   :  { %6684 = vst [vmem:[#allocation81_spill] sm:$0xff] %v4050_v55  ;;  %v6712_v55 = vld [vmem:[#allocation48_spill] sm:$0xff]  ;;  %v1452_v18 = vrot.slane %v6691_v51, 1  ;;  %v1465_v51 = vrot.slane %v6747_v60, 1  ;;  %v1459_v60 = vrot.slane %v6749_v42, 1 }
 0x1e4   :  { %6726 = vst [vmem:[#allocation82_spill] sm:$0xff] %v4112_v52  ;;  %v1466_v7 = vrot.slane %v6712_v55, 1  ;;  %v1460_v55 = vrot.slane %v6750_v5, 1 }
 0x1e5   :  { %6727 = vst [vmem:[#allocation83_spill] sm:$0xff] %v4114_v33 }
 0x1e6   :  { %6728 = vst [vmem:[#allocation84_spill] sm:$0xff] %v4116_v44  ;;  %v4226_v0 = vsel %vm1475_vm8, %v1466_v7, %v1467_v43  ;;  %v4230_v29 = vsel %vm1475_vm8, %v1465_v51, %v1466_v7  ;;  %v4250_v7 = vsel %vm1475_vm8, %v1460_v55, %v1461_v9 }
 0x1e7   :  { %6729 = vst [vmem:[#allocation85_spill] sm:$0xff] %v4118_v8 }
 0x1e8   :  { %6730 = vst [vmem:[#allocation86_spill] sm:$0xff] %v4120_v1 }
 0x1e9   :  { %6731 = vst [vmem:[#allocation87_spill] sm:$0xff] %v4122_v24 }
 0x1ea   :  { %6732 = vst [vmem:[#allocation88_spill] sm:$0xff] %v4124_v15 }
 0x1eb   :  { %6733 = vst [vmem:[#allocation89_spill] sm:$0xff] %v4126_v2 }
 0x1ec   :  { %6734 = vst [vmem:[#allocation90_spill] sm:$0xff] %v4128_v25 }
 0x1ed   :  { %6735 = vst [vmem:[#allocation91_spill] sm:$0xff] %v4130_v13 }
 0x1ee   :  { %6736 = vst [vmem:[#allocation92_spill] sm:$0xff] %v4132_v40 }
 0x1ef   :  { %6737 = vst [vmem:[#allocation93_spill] sm:$0xff] %v4134_v26 }
 0x1f0   :  { %6738 = vst [vmem:[#allocation94_spill] sm:$0xff] %v4137_v32  ;;  %v6743_v32 = vld [vmem:[#allocation33_spill] sm:$0xff] }
 0x1f1   :  { %v1451_v62 = vrot.slane %v6743_v32, 1  ;;  %v1464_v32 = vrot.slane %v6709_v49, 1  ;;  %v6391_v49 = vrot.slane %v6724_v21, 1  ;;  %6753 = vst [vmem:[#allocation27_spill] sm:$0xff] %v4206_v61  ;;  %v1171_v61 = vrot.slane %v4126_v2, 7 }
 0x1f2   :  { %6754 = vst [vmem:[#allocation95_spill] sm:$0xff] %v4214_v47  ;;  %v1168_v2 = vrot.slane %v4120_v1, 7 }
 0x1f3   :  { %v4198_v39 = vsel %vm1475_vm8, %v1473_v28, %v6391_v49  ;;  %v4218_v49 = vsel %vm1475_vm8, %v1468_v38, %v1469_v19  ;;  %v4222_v28 = vsel %vm1475_vm8, %v1467_v43, %v1468_v38  ;;  %6756 = vst [vmem:[#allocation97_spill] sm:$0xff] %v4230_v29  ;;  %v4234_v27 = vsel %vm1475_vm8, %v1464_v32, %v1465_v51 }
 0x1f4   :  { %6752 = vst [vmem:[#allocation26_spill] sm:$0xff] %v4198_v39  ;;  %v4238_v19 = vsel %vm1475_vm8, %v1463_v58, %v1464_v32  ;;  %v4242_v38 = vsel %vm1475_vm8, %v1462_v23, %v1463_v58  ;;  %v4246_v43 = vsel %vm1475_vm8, %v1461_v9, %v1462_v23  ;;  %v4254_v51 = vsel %vm1475_vm8, %v1459_v60, %v1460_v55 }
 0x1f5   :  { %6755 = vst [vmem:[#allocation96_spill] sm:$0xff] %v4222_v28  ;;  %v4258_v32 = vsel %vm1475_vm8, %v1458_v14, %v1459_v60  ;;  %v4262_v58 = vsel %vm1475_vm8, %v1457_v56, %v1458_v14  ;;  %v4266_v23 = vsel %vm1475_vm8, %v1456_v50, %v1457_v56  ;;  %v4270_v9 = vsel %vm1475_vm8, %v1455_v17, %v1456_v50  ;;  %v6769_v28 = vld [vmem:[#allocation80_spill] sm:$0xff] }
 0x1f6   :  { %6757 = vst [vmem:[#allocation98_spill] sm:$0xff] %v4238_v19  ;;  %v4274_v55 = vsel %vm1475_vm8, %v1454_v12, %v1455_v17  ;;  %v4278_v60 = vsel %vm1475_vm8, %v1453_v53, %v1454_v12  ;;  %v4282_v14 = vsel %vm1475_vm8, %v1452_v18, %v1453_v53  ;;  %v4286_v56 = vsel %vm1475_vm8, %v1451_v62, %v1452_v18  ;;  %v6770_v19 = vld [vmem:[#allocation81_spill] sm:$0xff] }
 0x1f7   :  { %6758 = vst [vmem:[#allocation99_spill] sm:$0xff] %v4246_v43  ;;  %v1499_v50 = vsel %vm1475_vm8, %v1450_v4, %v1451_v62  ;;  %v4292_v39 = vsel %vm1475_vm8, %v1449_v20, %v1450_v4  ;;  %v1501_v17 = vsel %vm1475_vm8, %v1448_v22, %v1449_v20  ;;  %v4298_v12 = vsel %vm1475_vm8, %v1447_v11, %v1448_v22 }
 0x1f8   :  { %6759 = vst [vmem:[#allocation100_spill] sm:$0xff] %v4254_v51  ;;  %v1503_v53 = vsel %vm1475_vm8, %v1446_v6, %v1447_v11  ;;  %v1170_v18 = vrot.slane %v4124_v15, 7  ;;  %v6766_v62 = vrot.slane %v6740_v35, 1  ;;  %v6768_v20 = vrot.slane %v6739_v30, 1  ;;  %v6830_v51 = vld [vmem:[#allocation22_spill] sm:$0xff] }
 0x1f9   :  { %6760 = vst [vmem:[#allocation101_spill] sm:$0xff] %v4262_v58  ;;  %v1166_v11 = vrot.slane %v4116_v44, 7  ;;  %v1167_v15 = vrot.slane %v4118_v8, 7  ;;  %v1162_v29 = vrot.slane %v6769_v28, 7  ;;  %v6772_v43 = vrot.slane %v6739_v30, 7 }
 0x1fa   :  { %6761 = vst [vmem:[#allocation102_spill] sm:$0xff] %v4270_v9  ;;  %v4308_v4 = vsel %vm1475_vm8, %v6766_v62, %v1446_v6  ;;  %v6767_v47 = vmov %v6766_v62  ;;  %v1163_v6 = vrot.slane %v6770_v19, 7  ;;  %v1164_v62 = vrot.slane %v4112_v52, 7 }
 0x1fb   :  { %6762 = vst [vmem:[#allocation103_spill] sm:$0xff] %v4278_v60  ;;  %v1505_v22 = vsel %vm1475_vm8, %v6768_v20, %v6767_v47  ;;  %v4329_v47 = vsel %vm1208_vm6, %v6772_v43, %v6771_v16  ;;  %v6773_v20 = vld [vmem:[#allocation25_spill] sm:$0xff]  ;;  %v6775_v8 = vrot.slane %v4134_v26, 7  ;;  %v6777_v52 = vrot.slane %v4132_v40, 7 }
 0x1fc   :  { %6763 = vst [vmem:[#allocation104_spill] sm:$0xff] %v4286_v56  ;;  %v6774_v44 = vrot.slane %v6773_v20, 7  ;;  %v6780_v16 = vrot.slane %v4130_v13, 7  ;;  %v1250_v40 = vsel %vm1208_vm6, %v1165_v37, %v1166_v11  ;;  %v6831_v58 = vrot.slane %v6830_v51, 7 }
 0x1fd   :  { %6764 = vst [vmem:[#allocation105_spill] sm:$0xff] %v4292_v39  ;;  %v6776_v33 = vmov %v6775_v8  ;;  %v6779_v28 = vmov %v6777_v52 }
 0x1fe   :  { %6765 = vst [vmem:[#allocation106_spill] sm:$0xff] %v4298_v12  ;;  %v4337_v1 = vsel %vm1208_vm6, %v6775_v8, %v6774_v44  ;;  %v4345_v19 = vsel %vm1208_vm6, %v6777_v52, %v6776_v33  ;;  %v4353_v43 = vsel %vm1208_vm6, %v6780_v16, %v6779_v28  ;;  %v6781_v5 = vmov %v6780_v16 }
 0x1ff   :  { %6778 = vst [vmem:[#allocation107_spill] sm:$0xff] %v4345_v19  ;;  %v6782_v44 = vrot.slane %v4128_v25, 7  ;;  %v4371_v52 = vsel %vm1208_vm6, %v1170_v18, %v1171_v61  ;;  %v6786_v28 = vrot.slane %v4122_v24, 7  ;;  %v6799_v25 = vrot.slane %v4040_v57, 7  ;;  %v6822_v57 = vld [vmem:[#allocation9_spill] sm:$0xff] }
 0x200   :  { %6785 = vst [vmem:[#allocation109_spill] sm:$0xff] %v4371_v52  ;;  %v6846_v12 = vrot.slane %v6822_v57, 7 }
 0x201   :  { %v4361_v8 = vsel %vm1208_vm6, %v6782_v44, %v6781_v5  ;;  %v6784_v26 = vmov %v6782_v44  ;;  %v1246_v16 = vsel %vm1208_vm6, %v6786_v28, %v1170_v18  ;;  %v6787_v5 = vmov %v6786_v28 }
 0x202   :  { %6783 = vst [vmem:[#allocation108_spill] sm:$0xff] %v4361_v8  ;;  %v4367_v33 = vsel %vm1208_vm6, %v1171_v61, %v6784_v26  ;;  %v4382_v44 = vsel %vm1208_vm6, %v1168_v2, %v6787_v5  ;;  %v1248_v26 = vsel %vm1208_vm6, %v1167_v15, %v1168_v2  ;;  %v4388_v61 = vsel %vm1208_vm6, %v1166_v11, %v1167_v15 }
 0x203   :  { %6788 = vst [vmem:[#allocation110_spill] sm:$0xff] %v4382_v44  ;;  %v4394_v18 = vsel %vm1208_vm6, %v1164_v62, %v1165_v37  ;;  %v1252_v28 = vsel %vm1208_vm6, %v1163_v6, %v1164_v62  ;;  %v4400_v5 = vsel %vm1208_vm6, %v1162_v29, %v1163_v6  ;;  %v6792_v2 = vrot.slane %v4046_v54, 7 }
 0x204   :  { %6789 = vst [vmem:[#allocation111_spill] sm:$0xff] %v4388_v61  ;;  %v6794_v11 = vrot.slane %v4044_v48, 7  ;;  %v6797_v62 = vrot.slane %v4042_v46, 7  ;;  %v6804_v44 = vrot.slane %v4036_v63, 7  ;;  %v6809_v61 = vrot.slane %v4032_v31, 7  ;;  %v6818_v48 = vld [vmem:[#allocation14_spill] sm:$0xff] }
 0x205   :  { %6790 = vst [vmem:[#allocation112_spill] sm:$0xff] %v4394_v18  ;;  %v1254_v15 = vsel %vm1208_vm6, %v6792_v2, %v1162_v29  ;;  %v6793_v19 = vmov %v6792_v2  ;;  %v6801_v2 = vmov %v6799_v25  ;;  %v6813_v18 = vrot.slane %v4024_v3, 7  ;;  %v6827_v63 = vld [vmem:[#allocation23_spill] sm:$0xff] }
 0x206   :  { %6791 = vst [vmem:[#allocation113_spill] sm:$0xff] %v4400_v5  ;;  %v4412_v37 = vsel %vm1208_vm6, %v6794_v11, %v6793_v19  ;;  %v6796_v8 = vmov %v6794_v11  ;;  %v6798_v13 = vmov %v6797_v62  ;;  %v6802_v19 = vrot.slane %v4038_v41, 7  ;;  %v6814_v5 = vld [vmem:[#allocation18_spill] sm:$0xff] }
 0x207   :  { %6795 = vst [vmem:[#allocation114_spill] sm:$0xff] %v4412_v37  ;;  %v1256_v6 = vsel %vm1208_vm6, %v6797_v62, %v6796_v8  ;;  %v4426_v29 = vsel %vm1208_vm6, %v6799_v25, %v6798_v13  ;;  %v6806_v62 = vmov %v6804_v44  ;;  %v6807_v25 = vrot.slane %v4034_v59, 7  ;;  %v6869_v59 = vld [vmem:[#allocation10_spill] sm:$0xff] }
 0x208   :  { %6800 = vst [vmem:[#allocation115_spill] sm:$0xff] %v4426_v29  ;;  %v1258_v11 = vsel %vm1208_vm6, %v6802_v19, %v6801_v2  ;;  %v6803_v52 = vmov %v6802_v19  ;;  %v6811_v19 = vrot.slane %v4012_v34, 1  ;;  %v6815_v37 = vrot.slane %v6814_v5, 7 }
 0x209   :  { %v4440_v8 = vsel %vm1208_vm6, %v6804_v44, %v6803_v52  ;;  %v1260_v13 = vsel %vm1208_vm6, %v6807_v25, %v6806_v62  ;;  %v6808_v24 = vmov %v6807_v25  ;;  %v6812_v52 = vrot.slane %v6724_v21, 1  ;;  %v6816_v25 = vld [vmem:[#allocation16_spill] sm:$0xff] }
 0x20a   :  { %6805 = vst [vmem:[#allocation116_spill] sm:$0xff] %v4440_v8  ;;  %v4454_v2 = vsel %vm1208_vm6, %v6809_v61, %v6808_v24  ;;  %v1266_v62 = vsel %vm1208_vm6, %v6815_v37, %v6813_v18  ;;  %v6817_v54 = vrot.slane %v6816_v25, 7  ;;  %v6819_v29 = vrot.slane %v6818_v48, 7  ;;  %v6820_v61 = vld [vmem:[#allocation11_spill] sm:$0xff] }
 0x20b   :  { %6810 = vst [vmem:[#allocation117_spill] sm:$0xff] %v4454_v2  ;;  %v1539_v44 = vsel %vm1475_vm8, %v6812_v52, %v6811_v19  ;;  %v6821_v46 = vrot.slane %v6820_v61, 7  ;;  %v6823_v8 = vrot.slane %v6822_v57, 7  ;;  %v6824_v52 = vrot.slane %v4012_v34, 7  ;;  %v6866_v2 = vld [vmem:[#allocation28_spill] sm:$0xff] }
 0x20c   :  { %v1268_v24 = vsel %vm1208_vm6, %v6819_v29, %v6817_v54  ;;  %v6825_v41 = vrot.slane %v6724_v21, 7  ;;  %v6826_v37 = vrot.slane %v4032_v31, 7  ;;  %v6828_v42 = vrot.slane %v6827_v63, 7  ;;  %v6834_v21 = vld [vmem:[#allocation20_spill] sm:$0xff]  ;;  %v6895_v31 = vld [vmem:[#allocation103_spill] sm:$0xff]  ;;  %v6904_v63 = vld [vmem:[#allocation102_spill] sm:$0xff] }
 0x20d   :  { %v1270_v19 = vsel %vm1208_vm6, %v6823_v8, %v6821_v46  ;;  %v6833_v8 = vmov %v6831_v58  ;;  %v6835_v9 = vrot.slane %v6834_v21, 7 }
 0x20e   :  { %v1272_v18 = vsel %vm1208_vm6, %v6825_v41, %v6824_v52  ;;  %v1262_v54 = vsel %vm1208_vm6, %v6828_v42, %v6826_v37  ;;  %v6829_v29 = vmov %v6828_v42  ;;  %v6836_v52 = vld [vmem:[#allocation94_spill] sm:$0xff]  ;;  %v6838_v42 = vrot.slane %v4024_v3, 7 }
 0x20f   :  { %v4498_v46 = vsel %vm1208_vm6, %v6831_v58, %v6829_v29  ;;  %v1264_v41 = vsel %vm1208_vm6, %v6835_v9, %v6833_v8  ;;  %vm1543_vm9 = vcmp.lt.s32.totalorder %v6836_v52, 15  ;;  %v6837_v60 = vmov %v6835_v9 }
 0x210   :  { %6832 = vst [vmem:[#allocation18_spill] sm:$0xff] %v4498_v46  ;;  %v4513_v37 = vsel %vm1208_vm6, %v6838_v42, %v6837_v60  ;;  %v6840_v58 = vrot.slane %v6814_v5, 7  ;;  %v6841_v29 = vrot.slane %v6816_v25, 7  ;;  %v6843_v9 = vrot.slane %v6818_v48, 7 }
 0x211   :  { %6839 = vst [vmem:[#allocation16_spill] sm:$0xff] %v4513_v37  ;;  %v6844_v8 = vrot.slane %v6820_v61, 7  ;;  %v6847_v60 = vrot.slane %v4012_v34, 7 }
 0x212   :  { %v4521_v56 = vsel %vm1208_vm6, %v6841_v29, %v6840_v58  ;;  %v4541_v58 = vsel %vm1273_vm7, %v1272_v18, -inf  ;;  %v4545_v29 = vsel %vm1273_vm7, %v1270_v19, -inf  ;;  %v1587_v18 = vsel %vm1543_vm9, %v1501_v17, -inf }
 0x213   :  { %6842 = vst [vmem:[#allocation11_spill] sm:$0xff] %v4521_v56  ;;  %v4529_v39 = vsel %vm1208_vm6, %v6844_v8, %v6843_v9  ;;  %v4537_v42 = vsel %vm1208_vm6, %v6847_v60, %v6846_v12  ;;  %v4549_v9 = vsel %vm1273_vm7, %v1268_v24, -inf  ;;  %v4553_v8 = vsel %vm1273_vm7, %v1266_v62, -inf  ;;  %v6870_v56 = vld [vmem:[#allocation29_spill] sm:$0xff] }
 0x214   :  { %6845 = vst [vmem:[#allocation20_spill] sm:$0xff] %v4529_v39  ;;  %v1583_v12 = vsel %vm1543_vm9, %v1505_v22, -inf  ;;  %v1585_v60 = vsel %vm1543_vm9, %v1503_v53, -inf  ;;  %v1589_v19 = vsel %vm1543_vm9, %v1499_v50, -inf  ;;  %v1591_v24 = vsel %vm1543_vm9, %v4282_v14, -inf }
 0x215   :  { %6848 = vst [vmem:[#allocation94_spill] sm:$0xff] %v4537_v42  ;;  %v1593_v62 = vsel %vm1543_vm9, %v4274_v55, -inf  ;;  %v1595_v22 = vsel %vm1543_vm9, %v4266_v23, -inf  ;;  %v1597_v53 = vsel %vm1543_vm9, %v4258_v32, -inf  ;;  %v1599_v50 = vsel %vm1543_vm9, %v4250_v7, -inf  ;;  %v6886_v42 = vld [vmem:[#allocation104_spill] sm:$0xff] }
 0x216   :  { %6849 = vst [vmem:[#allocation118_spill] sm:$0xff] %v4549_v9  ;;  %v1601_v14 = vsel %vm1543_vm9, %v4242_v38, -inf  ;;  %v1603_v55 = vsel %vm1543_vm9, %v4234_v27, -inf  ;;  %v1605_v23 = vsel %vm1543_vm9, %v4226_v0, -inf  ;;  %v1607_v32 = vsel %vm1543_vm9, %v4218_v49, -inf }
 0x217   :  { %6850 = vst [vmem:[#allocation119_spill] sm:$0xff] %v4553_v8  ;;  %v1609_v7 = vsel %vm1543_vm9, %v4210_v45, -inf  ;;  %v4596_v38 = vsel %vm1543_vm9, %v4202_v10, -inf  ;;  %v4600_v27 = vsel %vm1543_vm9, %v1539_v44, -inf  ;;  %v4604_v0 = vsel %vm1273_vm7, %v1264_v41, -inf  ;;  %v6863_v41 = vld [vmem:[#allocation72_spill] sm:$0xff] }
 0x218   :  { %6851 = vst [vmem:[#allocation120_spill] sm:$0xff] %v4604_v0  ;;  %v4608_v49 = vsel %vm1273_vm7, %v1262_v54, -inf  ;;  %v4612_v45 = vsel %vm1273_vm7, %v1260_v13, -inf  ;;  %v4616_v10 = vsel %vm1273_vm7, %v1258_v11, -inf  ;;  %v4620_v17 = vsel %vm1273_vm7, %v1256_v6, -inf  ;;  %v6868_v8 = vld [vmem:[#allocation106_spill] sm:$0xff] }
 0x219   :  { %6852 = vst [vmem:[#allocation121_spill] sm:$0xff] %v4608_v49  ;;  %v4624_v44 = vsel %vm1273_vm7, %v1254_v15, -inf  ;;  %v4628_v54 = vsel %vm1273_vm7, %v1252_v28, -inf  ;;  %v1317_v13 = vsel %vm1273_vm7, %v4329_v47, -inf  ;;  %v4635_v11 = vsel %vm1273_vm7, %v1250_v40, -inf  ;;  %v6874_v0 = vld [vmem:[#allocation30_spill] sm:$0xff] }
 0x21a   :  { %6853 = vst [vmem:[#allocation122_spill] sm:$0xff] %v4612_v45  ;;  %v4639_v6 = vsel %vm1273_vm7, %v1248_v26, -inf  ;;  %v4643_v15 = vsel %vm1273_vm7, %v1246_v16, -inf  ;;  %v4648_v28 = vsel %vm1273_vm7, %v4367_v33, -inf  ;;  %v4653_v47 = vsel %vm1273_vm7, %v4353_v43, -inf  ;;  %v6873_v33 = vld [vmem:[#allocation70_spill] sm:$0xff] }
 0x21b   :  { %6854 = vst [vmem:[#allocation123_spill] sm:$0xff] %v4616_v10  ;;  %v4658_v40 = vsel %vm1273_vm7, %v4337_v1, -inf  ;;  %v1412_v26 = vrot.slane %v6822_v57, 1  ;;  %v1413_v1 = vrot.slane %v6820_v61, 1  ;;  %v1414_v16 = vrot.slane %v6818_v48, 1 }
 0x21c   :  { %6855 = vst [vmem:[#allocation124_spill] sm:$0xff] %v4620_v17  ;;  %v6864_v46 = vmax.f32 %v6863_v41, %v6739_v30  ;;  %v6871_v9 = vmax.f32 %v6869_v59, %v6870_v56  ;;  %v6875_v39 = vmax.f32 %v6873_v33, %v6874_v0  ;;  %v6887_v59 = vld [vmem:[#allocation13_spill] sm:$0xff]  ;;  %v6891_v0 = vld [vmem:[#allocation68_spill] sm:$0xff] }
 0x21d   :  { %6856 = vst [vmem:[#allocation125_spill] sm:$0xff] %v4624_v44  ;;  %v6888_v56 = vld [vmem:[#allocation33_spill] sm:$0xff]  ;;  %v1537_v45 = vsel %vm1475_vm8, %v1412_v26, %v1413_v1 }
 0x21e   :  { %6857 = vst [vmem:[#allocation126_spill] sm:$0xff] %v4628_v54  ;;  %v1647_v43 = vmax.f32 %v6864_v46, %v1583_v12  ;;  %v4707_v48 = vmax.f32 %v6871_v9, %v6868_v8  ;;  %v4712_v57 = vmax.f32 %v6875_v39, %v1587_v18  ;;  %v6877_v46 = vld [vmem:[#allocation105_spill] sm:$0xff]  ;;  %v6878_v12 = vld [vmem:[#allocation12_spill] sm:$0xff]  ;;  %v6889_v9 = vmax.f32 %v6887_v59, %v6888_v56  ;;  %v6892_v39 = vld [vmem:[#allocation34_spill] sm:$0xff] }
 0x21f   :  { %6858 = vst [vmem:[#allocation127_spill] sm:$0xff] %v4635_v11  ;;  %v6893_v18 = vmax.f32 %v6891_v0, %v6892_v39  ;;  %v6905_v59 = vld [vmem:[#allocation17_spill] sm:$0xff]  ;;  %v6909_v0 = vld [vmem:[#allocation66_spill] sm:$0xff] }
 0x220   :  { %6859 = vst [vmem:[#allocation128_spill] sm:$0xff] %v4639_v6  ;;  %v4729_v8 = vmax.f32 %v6889_v9, %v6886_v42  ;;  %v6906_v42 = vld [vmem:[#allocation37_spill] sm:$0xff] }
 0x221   :  { %6860 = vst [vmem:[#allocation129_spill] sm:$0xff] %v4643_v15  ;;  %v4734_v33 = vmax.f32 %v6893_v18, %v1591_v24  ;;  %v6907_v56 = vmax.f32 %v6905_v59, %v6906_v42  ;;  %v6910_v24 = vld [vmem:[#allocation38_spill] sm:$0xff]  ;;  %v6923_v59 = vld [vmem:[#allocation21_spill] sm:$0xff] }
 0x222   :  { %6861 = vst [vmem:[#allocation130_spill] sm:$0xff] %v4648_v28  ;;  %v6911_v39 = vmax.f32 %v6909_v0, %v6910_v24  ;;  %v6913_v28 = vld [vmem:[#allocation101_spill] sm:$0xff]  ;;  %v6927_v0 = vld [vmem:[#allocation64_spill] sm:$0xff] }
 0x223   :  { %6862 = vst [vmem:[#allocation131_spill] sm:$0xff] %v4653_v47  ;;  %v1381_v47 = vmax.f32 %v1317_v13, %v6740_v35  ;;  %v1379_v13 = vmax.f32 %v4658_v40, %v6773_v20  ;;  %v6865_v35 = vld [vmem:[#allocation71_spill] sm:$0xff]  ;;  %v4751_v9 = vmax.f32 %v6907_v56, %v6904_v63  ;;  %v6924_v63 = vld [vmem:[#allocation41_spill] sm:$0xff] }
 0x224   :  { %v6867_v40 = vmax.f32 %v6865_v35, %v6866_v2  ;;  %6872 = vst [vmem:[#allocation72_spill] sm:$0xff] %v4707_v48  ;;  %v6882_v2 = vld [vmem:[#allocation69_spill] sm:$0xff]  ;;  %v4756_v18 = vmax.f32 %v6911_v39, %v1595_v22  ;;  %v6925_v42 = vmax.f32 %v6923_v59, %v6924_v63  ;;  %v6928_v22 = vld [vmem:[#allocation42_spill] sm:$0xff]  ;;  %v6941_v59 = vld [vmem:[#allocation3_spill] sm:$0xff] }
 0x225   :  { %v4696_v49 = vmax.f32 %v1381_v47, %v4308_v4  ;;  %6876 = vst [vmem:[#allocation71_spill] sm:$0xff] %v4712_v57  ;;  %v6879_v4 = vld [vmem:[#allocation31_spill] sm:$0xff]  ;;  %v6929_v24 = vmax.f32 %v6927_v0, %v6928_v22  ;;  %v6945_v0 = vld [vmem:[#allocation62_spill] sm:$0xff] }
 0x226   :  { %v4701_v37 = vmax.f32 %v6867_v40, %v1585_v60  ;;  %v6880_v47 = vmax.f32 %v6878_v12, %v6879_v4  ;;  %v6883_v60 = vld [vmem:[#allocation32_spill] sm:$0xff]  ;;  %6890 = vst [vmem:[#allocation10_spill] sm:$0xff] %v4729_v8  ;;  %v6896_v12 = vld [vmem:[#allocation15_spill] sm:$0xff] }
 0x227   :  { %v6884_v35 = vmax.f32 %v6882_v2, %v6883_v60  ;;  %6894 = vst [vmem:[#allocation29_spill] sm:$0xff] %v4734_v33  ;;  %v6900_v2 = vld [vmem:[#allocation67_spill] sm:$0xff]  ;;  %v4778_v39 = vmax.f32 %v6929_v24, %v1599_v50  ;;  %v6946_v50 = vld [vmem:[#allocation46_spill] sm:$0xff] }
 0x228   :  { %v4718_v41 = vmax.f32 %v6880_v47, %v6877_v46  ;;  %v6897_v46 = vld [vmem:[#allocation35_spill] sm:$0xff]  ;;  %6908 = vst [vmem:[#allocation105_spill] sm:$0xff] %v4751_v9  ;;  %v6947_v22 = vmax.f32 %v6945_v0, %v6946_v50  ;;  %v6963_v0 = vld [vmem:[#allocation60_spill] sm:$0xff] }
 0x229   :  { %v4723_v40 = vmax.f32 %v6884_v35, %v1589_v19  ;;  %v6898_v4 = vmax.f32 %v6896_v12, %v6897_v46  ;;  %v6901_v19 = vld [vmem:[#allocation36_spill] sm:$0xff]  ;;  %6912 = vst [vmem:[#allocation12_spill] sm:$0xff] %v4756_v18  ;;  %v6914_v12 = vld [vmem:[#allocation19_spill] sm:$0xff] }
 0x22a   :  { %6881 = vst [vmem:[#allocation28_spill] sm:$0xff] %v4718_v41  ;;  %v6902_v60 = vmax.f32 %v6900_v2, %v6901_v19  ;;  %v6918_v2 = vld [vmem:[#allocation65_spill] sm:$0xff]  ;;  %v6931_v18 = vld [vmem:[#allocation99_spill] sm:$0xff]  ;;  %v4800_v24 = vmax.f32 %v6947_v22, %v1603_v55  ;;  %v6964_v55 = vld [vmem:[#allocation50_spill] sm:$0xff] }
 0x22b   :  { %6885 = vst [vmem:[#allocation106_spill] sm:$0xff] %v4723_v40  ;;  %v4740_v47 = vmax.f32 %v6898_v4, %v6895_v31  ;;  %v6915_v31 = vld [vmem:[#allocation39_spill] sm:$0xff]  ;;  %v6965_v50 = vmax.f32 %v6963_v0, %v6964_v55  ;;  %v6982_v0 = vld [vmem:[#allocation54_spill] sm:$0xff] }
 0x22c   :  { %v4745_v35 = vmax.f32 %v6902_v60, %v1593_v62  ;;  %v6916_v46 = vmax.f32 %v6914_v12, %v6915_v31  ;;  %v6919_v62 = vld [vmem:[#allocation40_spill] sm:$0xff]  ;;  %6930 = vst [vmem:[#allocation104_spill] sm:$0xff] %v4778_v39  ;;  %v6932_v12 = vld [vmem:[#allocation2_spill] sm:$0xff]  ;;  %v6949_v39 = vld [vmem:[#allocation97_spill] sm:$0xff] }
 0x22d   :  { %6899 = vst [vmem:[#allocation70_spill] sm:$0xff] %v4740_v47  ;;  %v6920_v19 = vmax.f32 %v6918_v2, %v6919_v62  ;;  %v6936_v2 = vld [vmem:[#allocation63_spill] sm:$0xff]  ;;  %v4822_v22 = vmax.f32 %v6965_v50, %v1607_v32  ;;  %v6981_v32 = vld [vmem:[#allocation57_spill] sm:$0xff] }
 0x22e   :  { %6903 = vst [vmem:[#allocation30_spill] sm:$0xff] %v4745_v35  ;;  %v4762_v4 = vmax.f32 %v6916_v46, %v6913_v28  ;;  %v6922_v35 = vld [vmem:[#allocation100_spill] sm:$0xff]  ;;  %v6933_v28 = vld [vmem:[#allocation43_spill] sm:$0xff]  ;;  %v6983_v55 = vmax.f32 %v6981_v32, %v6982_v0  ;;  %v1551_v32 = vsel %vm1543_vm9, %v1537_v45, -inf  ;;  %v1938_v45 = vmax.f32 %v4696_v49, %v4707_v48 }
 0x22f   :  { %v4767_v60 = vmax.f32 %v6920_v19, %v1597_v53  ;;  %v4773_v56 = vmax.f32 %v6925_v42, %v6922_v35  ;;  %v6934_v31 = vmax.f32 %v6932_v12, %v6933_v28  ;;  %v6937_v53 = vld [vmem:[#allocation44_spill] sm:$0xff]  ;;  %v6942_v35 = vld [vmem:[#allocation45_spill] sm:$0xff]  ;;  %6948 = vst [vmem:[#allocation34_spill] sm:$0xff] %v4800_v24  ;;  %v6967_v24 = vld [vmem:[#allocation95_spill] sm:$0xff] }
 0x230   :  { %6917 = vst [vmem:[#allocation31_spill] sm:$0xff] %v4762_v4  ;;  %v6938_v62 = vmax.f32 %v6936_v2, %v6937_v53  ;;  %v6943_v63 = vmax.f32 %v6941_v59, %v6942_v35  ;;  %v6950_v12 = vld [vmem:[#allocation4_spill] sm:$0xff]  ;;  %v6954_v2 = vld [vmem:[#allocation61_spill] sm:$0xff]  ;;  %v4845_v50 = vmax.f32 %v6983_v55, %v4596_v38 }
 0x231   :  { %6921 = vst [vmem:[#allocation69_spill] sm:$0xff] %v4767_v60  ;;  %v4784_v46 = vmax.f32 %v6934_v31, %v6931_v18  ;;  %v6940_v60 = vld [vmem:[#allocation98_spill] sm:$0xff]  ;;  %v6951_v18 = vld [vmem:[#allocation47_spill] sm:$0xff]  ;;  %v6959_v59 = vld [vmem:[#allocation5_spill] sm:$0xff] }
 0x232   :  { %6926 = vst [vmem:[#allocation32_spill] sm:$0xff] %v4773_v56  ;;  %v4789_v19 = vmax.f32 %v6938_v62, %v1601_v14  ;;  %v4795_v42 = vmax.f32 %v6943_v63, %v6940_v60  ;;  %v6952_v28 = vmax.f32 %v6950_v12, %v6951_v18  ;;  %v6955_v14 = vld [vmem:[#allocation48_spill] sm:$0xff]  ;;  %v6960_v60 = vld [vmem:[#allocation49_spill] sm:$0xff]  ;;  %v6968_v12 = vld [vmem:[#allocation6_spill] sm:$0xff] }
 0x233   :  { %6935 = vst [vmem:[#allocation13_spill] sm:$0xff] %v4784_v46  ;;  %v6956_v53 = vmax.f32 %v6954_v2, %v6955_v14  ;;  %v6961_v35 = vmax.f32 %v6959_v59, %v6960_v60  ;;  %v6972_v2 = vld [vmem:[#allocation58_spill] sm:$0xff]  ;;  %v6977_v59 = vld [vmem:[#allocation7_spill] sm:$0xff]  ;;  %v6997_v38 = vld [vmem:[#allocation76_spill] sm:$0xff] }
 0x234   :  { %6939 = vst [vmem:[#allocation33_spill] sm:$0xff] %v4789_v19  ;;  %v4806_v31 = vmax.f32 %v6952_v28, %v6949_v39  ;;  %v6958_v19 = vld [vmem:[#allocation96_spill] sm:$0xff]  ;;  %v6969_v39 = vld [vmem:[#allocation51_spill] sm:$0xff]  ;;  %v6998_v55 = vld [vmem:[#allocation77_spill] sm:$0xff]  ;;  %v1954_v6 = vmax.f32 %v4784_v46, %v4795_v42 }
 0x235   :  { %6944 = vst [vmem:[#allocation68_spill] sm:$0xff] %v4795_v42  ;;  %v4811_v62 = vmax.f32 %v6956_v53, %v1605_v23  ;;  %v4817_v63 = vmax.f32 %v6961_v35, %v6958_v19  ;;  %v6970_v18 = vmax.f32 %v6968_v12, %v6969_v39  ;;  %v6973_v23 = vld [vmem:[#allocation52_spill] sm:$0xff]  ;;  %v6978_v19 = vld [vmem:[#allocation53_spill] sm:$0xff]  ;;  %v6985_v12 = vld [vmem:[#allocation26_spill] sm:$0xff] }
 0x236   :  { %6953 = vst [vmem:[#allocation103_spill] sm:$0xff] %v4806_v31  ;;  %v6974_v14 = vmax.f32 %v6972_v2, %v6973_v23  ;;  %v6979_v60 = vmax.f32 %v6977_v59, %v6978_v19  ;;  %v6987_v39 = vld [vmem:[#allocation55_spill] sm:$0xff]  ;;  %v6991_v2 = vld [vmem:[#allocation56_spill] sm:$0xff]  ;;  %v7030_v44 = vld [vmem:[#allocation34_spill] sm:$0xff] }
 0x237   :  { %6957 = vst [vmem:[#allocation15_spill] sm:$0xff] %v4811_v62  ;;  %v4828_v28 = vmax.f32 %v6970_v18, %v6967_v24  ;;  %v6976_v62 = vld [vmem:[#allocation27_spill] sm:$0xff]  ;;  %v6986_v24 = vld [vmem:[#allocation8_spill] sm:$0xff]  ;;  %v1958_v54 = vmax.f32 %v4806_v31, %v4817_v63 }
 0x238   :  { %6962 = vst [vmem:[#allocation35_spill] sm:$0xff] %v4817_v63  ;;  %v4833_v53 = vmax.f32 %v6974_v14, %v1609_v7  ;;  %v4839_v35 = vmax.f32 %v6979_v60, %v6976_v62  ;;  %v6988_v18 = vmax.f32 %v6986_v24, %v6987_v39  ;;  %v6990_v7 = vld [vmem:[#allocation59_spill] sm:$0xff]  ;;  %v6994_v62 = vld [vmem:[#allocation74_spill] sm:$0xff]  ;;  %v7007_v24 = vrot.slane %v6739_v30, 1 }
 0x239   :  { %6966 = vst [vmem:[#allocation67_spill] sm:$0xff] %v4822_v22  ;;  %v6992_v23 = vmax.f32 %v6990_v7, %v6991_v2  ;;  %v6995_v19 = vld [vmem:[#allocation75_spill] sm:$0xff]  ;;  %v7008_v39 = vrot.slane %v6773_v20, 1  ;;  %v7011_v2 = vrot.slane %v6816_v25, 1  ;;  %v1536_v20 = vsel %vm1475_vm8, %v1413_v1, %v1414_v16 }
 0x23a   :  { %6971 = vst [vmem:[#allocation36_spill] sm:$0xff] %v4828_v28  ;;  %v4851_v28 = vmax.f32 %v6988_v18, %v6985_v12  ;;  %v7000_v12 = vld [vmem:[#allocation78_spill] sm:$0xff]  ;;  %v1939_v1 = vmax.f32 %v4701_v37, %v4712_v57 }
 0x23b   :  { %6975 = vst [vmem:[#allocation102_spill] sm:$0xff] %v4833_v53  ;;  %v4857_v14 = vmax.f32 %v6992_v23, %v4600_v27  ;;  %v1416_v27 = vrot.slane %v6814_v5, 1  ;;  %v1506_v7 = vsel %vm1475_vm8, %v7008_v39, %v7007_v24  ;;  %v1535_v59 = vsel %vm1475_vm8, %v1414_v16, %v7011_v2 }
 0x23c   :  { %6980 = vst [vmem:[#allocation17_spill] sm:$0xff] %v4839_v35  ;;  %v1646_v60 = vmax.f32 %v1379_v13, %v1506_v7  ;;  %v7019_v13 = vrot.slane %v4024_v3, 1  ;;  %v7020_v24 = vrot.slane %v4012_v34, 1  ;;  %v1553_v30 = vsel %vm1543_vm9, %v1535_v59, -inf }
 0x23d   :  { %6984 = vst [vmem:[#allocation37_spill] sm:$0xff] %v4845_v50  ;;  %v7021_v2 = vmax.f32 %v4541_v58, %v4012_v34  ;;  %v1940_v34 = vmax.f32 %v4707_v48, %v4718_v41  ;;  %v1943_v58 = vmax.f32 %v4723_v40, %v4734_v33  ;;  %v7029_v48 = vld [vmem:[#allocation33_spill] sm:$0xff] }
 0x23e   :  { %6989 = vst [vmem:[#allocation66_spill] sm:$0xff] %v4851_v28  ;;  %v1533_v7 = vsel %vm1475_vm8, %v1416_v27, %v7019_v13  ;;  %v1538_v17 = vsel %vm1475_vm8, %v7020_v24, %v1412_v26  ;;  %v7022_v13 = vmax.f32 %v4545_v29, %v6820_v61  ;;  %v4928_v16 = vmax.f32 %v1646_v60, %v4696_v49  ;;  %v7027_v24 = vld [vmem:[#allocation69_spill] sm:$0xff]  ;;  %v7031_v39 = vld [vmem:[#allocation15_spill] sm:$0xff] }
 0x23f   :  { %6993 = vst [vmem:[#allocation38_spill] sm:$0xff] %v4857_v14  ;;  %v1614_v23 = vmax.f32 %v7021_v2, %v1538_v17  ;;  %v4931_v26 = vmax.f32 %v1647_v43, %v4701_v37  ;;  %v1941_v61 = vmax.f32 %v4712_v57, %v4723_v40  ;;  %v1944_v29 = vmax.f32 %v4729_v8, %v4740_v47  ;;  %v7025_v17 = vld [vmem:[#allocation30_spill] sm:$0xff]  ;;  %v7026_v43 = vld [vmem:[#allocation12_spill] sm:$0xff] }
 0x240   :  { %v4925_v15 = vmax.f32 %v7022_v13, %v1536_v20  ;;  %7023 = vst [vmem:[#allocation101_spill] sm:$0xff] %v4928_v16  ;;  %v1942_v20 = vmax.f32 %v4718_v41, %v4729_v8  ;;  %v1945_v49 = vmax.f32 %v4734_v33, %v7025_v17  ;;  %v1946_v37 = vmax.f32 %v4740_v47, %v4751_v9  ;;  %v7046_v47 = vld [vmem:[#allocation24_spill] sm:$0xff]  ;;  %v7054_v8 = vld [vmem:[#allocation14_spill] sm:$0xff] }
 0x241   :  { %7024 = vst [vmem:[#allocation19_spill] sm:$0xff] %v4931_v26  ;;  %v1947_v59 = vmax.f32 %v7025_v17, %v7026_v43  ;;  %v1948_v60 = vmax.f32 %v4751_v9, %v4762_v4  ;;  %v1949_v2 = vmax.f32 %v7026_v43, %v7027_v24  ;;  %v1950_v13 = vmax.f32 %v4762_v4, %v4773_v56  ;;  %v7028_v26 = vld [vmem:[#allocation104_spill] sm:$0xff]  ;;  %v7049_v43 = vld [vmem:[#allocation131_spill] sm:$0xff] }
 0x242   :  { %v1951_v57 = vmax.f32 %v7027_v24, %v7028_v26  ;;  %v1952_v16 = vmax.f32 %v4773_v56, %v4784_v46  ;;  %v1953_v50 = vmax.f32 %v7028_v26, %v7029_v48  ;;  %v1955_v11 = vmax.f32 %v7029_v48, %v7030_v44  ;;  %v7032_v18 = vld [vmem:[#allocation36_spill] sm:$0xff] }
 0x243   :  { %v1956_v28 = vmax.f32 %v4795_v42, %v4806_v31  ;;  %v1957_v0 = vmax.f32 %v7030_v44, %v7031_v39  ;;  %v1959_v10 = vmax.f32 %v7031_v39, %v4822_v22  ;;  %v1960_v26 = vmax.f32 %v4817_v63, %v7032_v18  ;;  %v7048_v9 = vld [vmem:[#allocation92_spill] sm:$0xff]  ;;  %v7060_v39 = vld [vmem:[#allocation11_spill] sm:$0xff] }
 0x244   :  { %v1961_v46 = vmax.f32 %v4822_v22, %v4833_v53  ;;  %v1962_v48 = vmax.f32 %v7032_v18, %v4839_v35  ;;  %v7033_v56 = vld [vmem:[#allocation37_spill] sm:$0xff]  ;;  %v7041_v17 = vrot.slane %v6830_v51, 1  ;;  %v7042_v18 = vrot.slane %v6834_v21, 1  ;;  %v7050_v51 = vld [vmem:[#allocation94_spill] sm:$0xff] }
 0x245   :  { %v1963_v42 = vmax.f32 %v4833_v53, %v7033_v56  ;;  %v7034_v24 = vld [vmem:[#allocation66_spill] sm:$0xff]  ;;  %v4991_v31 = vmax.f32 %v7033_v56, %v4857_v14  ;;  %v7047_v4 = vrot.slane %v6816_v25, 1 }
 0x246   :  { %v4987_v44 = vmax.f32 %v4839_v35, %v7034_v24  ;;  %v1531_v53 = vsel %vm1475_vm8, %v7042_v18, %v7041_v17  ;;  %v7051_v18 = vld [vmem:[#allocation9_spill] sm:$0xff]  ;;  %v7056_v35 = vld [vmem:[#allocation118_spill] sm:$0xff] }
 0x247   :  { %7036 = vst [vmem:[#allocation65_spill] sm:$0xff] %v4991_v31  ;;  %v7045_v31 = vld [vmem:[#allocation23_spill] sm:$0xff]  ;;  %v1534_v22 = vsel %vm1475_vm8, %v7047_v4, %v1416_v27  ;;  %v7052_v17 = vmax.f32 %v7050_v51, %v7051_v18  ;;  %v7057_v63 = vmax.f32 %v7056_v35, %v6816_v25  ;;  %v1557_v27 = vsel %vm1543_vm9, %v1531_v53, -inf  ;;  %v7068_v4 = vld [vmem:[#allocation16_spill] sm:$0xff]  ;;  %v7082_v25 = vld [vmem:[#allocation105_spill] sm:$0xff] }
 0x248   :  { %7035 = vst [vmem:[#allocation39_spill] sm:$0xff] %v4987_v44  ;;  %v1555_v44 = vsel %vm1543_vm9, %v1533_v7, -inf  ;;  %v1420_v56 = vrot.slane %v7045_v31, 1  ;;  %v7053_v7 = vld [vmem:[#allocation20_spill] sm:$0xff]  ;;  %v7058_v31 = vld [vmem:[#allocation93_spill] sm:$0xff]  ;;  %v7061_v51 = vmax.f32 %v7060_v39, %v6814_v5  ;;  %v7063_v18 = vrot.slane %v7046_v47, 1 }
 0x249   :  { %v1615_v33 = vmax.f32 %v7052_v17, %v1551_v32  ;;  %v7055_v40 = vmax.f32 %v7053_v7, %v7054_v8  ;;  %v5026_v24 = vmax.f32 %v7057_v63, %v1534_v22  ;;  %v5038_v8 = vmax.f32 %v1614_v23, %v4925_v15  ;;  %v7066_v17 = vld [vmem:[#allocation119_spill] sm:$0xff] }
 0x24a   :  { %v5035_v32 = vmax.f32 %v7061_v51, %v1555_v44  ;;  %v1529_v5 = vsel %vm1475_vm8, %v1420_v56, %v7063_v18  ;;  %v7064_v44 = vrot.slane %v6834_v21, 1  ;;  %v7065_v23 = vrot.slane %v4024_v3, 1 }
 0x24b   :  { %v5021_v14 = vmax.f32 %v7055_v40, %v1553_v30  ;;  %v7062_v40 = vld [vmem:[#allocation73_spill] sm:$0xff]  ;;  %v7067_v7 = vmax.f32 %v7066_v17, %v4024_v3  ;;  %v7069_v35 = vmax.f32 %v7068_v4, %v6834_v21  ;;  %v1906_v18 = vmax.f32 %v4925_v15, %v5026_v24  ;;  %v7070_v3 = vld [vmem:[#allocation28_spill] sm:$0xff]  ;;  %v7074_v4 = vld [vmem:[#allocation10_spill] sm:$0xff] }
 0x24c   :  { %v1422_v30 = vrot.slane %v7062_v40, 1  ;;  %v1532_v39 = vsel %vm1475_vm8, %v7065_v23, %v7064_v44  ;;  %v5075_v44 = vmax.f32 %v5038_v8, %v5026_v24  ;;  %v5078_v23 = vmax.f32 %v1938_v45, %v7070_v3  ;;  %v7078_v15 = vld [vmem:[#allocation70_spill] sm:$0xff]  ;;  %v7084_v45 = vld [vmem:[#allocation12_spill] sm:$0xff] }
 0x24d   :  { %v5059_v51 = vmax.f32 %v7067_v7, %v1532_v39  ;;  %v5064_v53 = vmax.f32 %v7069_v35, %v1557_v27  ;;  %v5067_v63 = vmax.f32 %v1615_v33, %v5021_v14  ;;  %v1907_v22 = vmax.f32 %v5021_v14, %v5035_v32  ;;  %v7072_v39 = vld [vmem:[#allocation106_spill] sm:$0xff]  ;;  %v7076_v33 = vld [vmem:[#allocation29_spill] sm:$0xff] }
 0x24e   :  { %7071 = vst [vmem:[#allocation40_spill] sm:$0xff] %v5078_v23  ;;  %v5081_v21 = vmax.f32 %v1939_v1, %v7072_v39  ;;  %v5084_v27 = vmax.f32 %v1940_v34, %v7074_v4  ;;  %v5087_v35 = vmax.f32 %v1941_v61, %v7076_v33  ;;  %v5090_v17 = vmax.f32 %v1942_v20, %v7078_v15  ;;  %v7080_v14 = vld [vmem:[#allocation30_spill] sm:$0xff]  ;;  %v7086_v1 = vld [vmem:[#allocation31_spill] sm:$0xff]  ;;  %v7088_v34 = vld [vmem:[#allocation69_spill] sm:$0xff] }
 0x24f   :  { %v5093_v7 = vmax.f32 %v1943_v58, %v7080_v14  ;;  %v5096_v41 = vmax.f32 %v1944_v29, %v7082_v25  ;;  %v5099_v3 = vmax.f32 %v1945_v49, %v7084_v45  ;;  %v5102_v39 = vmax.f32 %v1946_v37, %v7086_v1  ;;  %v7090_v61 = vld [vmem:[#allocation32_spill] sm:$0xff]  ;;  %v7094_v58 = vld [vmem:[#allocation13_spill] sm:$0xff]  ;;  %v7100_v37 = vld [vmem:[#allocation34_spill] sm:$0xff] }
 0x250   :  { %7073 = vst [vmem:[#allocation100_spill] sm:$0xff] %v5081_v21  ;;  %v5105_v4 = vmax.f32 %v1947_v59, %v7088_v34  ;;  %v5108_v33 = vmax.f32 %v1948_v60, %v7090_v61  ;;  %v7092_v20 = vld [vmem:[#allocation104_spill] sm:$0xff]  ;;  %v5114_v14 = vmax.f32 %v1950_v13, %v7094_v58  ;;  %v7096_v29 = vld [vmem:[#allocation33_spill] sm:$0xff]  ;;  %v5123_v1 = vmax.f32 %v1953_v50, %v7100_v37  ;;  %v7102_v59 = vld [vmem:[#allocation103_spill] sm:$0xff] }
 0x251   :  { %7075 = vst [vmem:[#allocation21_spill] sm:$0xff] %v5084_v27  ;;  %v5111_v15 = vmax.f32 %v1949_v2, %v7092_v20  ;;  %v5117_v25 = vmax.f32 %v1951_v57, %v7096_v29  ;;  %v7098_v49 = vld [vmem:[#allocation68_spill] sm:$0xff]  ;;  %v5126_v34 = vmax.f32 %v1954_v6, %v7102_v59  ;;  %v7104_v60 = vld [vmem:[#allocation15_spill] sm:$0xff]  ;;  %v7114_v50 = vld [vmem:[#allocation17_spill] sm:$0xff] }
 0x252   :  { %7077 = vst [vmem:[#allocation41_spill] sm:$0xff] %v5087_v35  ;;  %v5120_v45 = vmax.f32 %v1952_v16, %v7098_v49  ;;  %v5129_v61 = vmax.f32 %v1955_v11, %v7104_v60  ;;  %v7106_v2 = vld [vmem:[#allocation35_spill] sm:$0xff]  ;;  %v7110_v57 = vld [vmem:[#allocation36_spill] sm:$0xff]  ;;  %v7112_v16 = vld [vmem:[#allocation102_spill] sm:$0xff]  ;;  %v5144_v37 = vmax.f32 %v1960_v26, %v7114_v50 }
 0x253   :  { %7079 = vst [vmem:[#allocation64_spill] sm:$0xff] %v5090_v17  ;;  %v5132_v20 = vmax.f32 %v1956_v28, %v7106_v2  ;;  %v7108_v13 = vld [vmem:[#allocation67_spill] sm:$0xff]  ;;  %v5138_v29 = vmax.f32 %v1958_v54, %v7110_v57  ;;  %v5141_v49 = vmax.f32 %v1959_v10, %v7112_v16  ;;  %v7116_v6 = vld [vmem:[#allocation37_spill] sm:$0xff]  ;;  %v7118_v11 = vld [vmem:[#allocation66_spill] sm:$0xff]  ;;  %v2254_v10 = vsel %vm572_vm2, %v5038_v8, 0.0 }
 0x254   :  { %7081 = vst [vmem:[#allocation42_spill] sm:$0xff] %v5093_v7  ;;  %v5135_v58 = vmax.f32 %v1957_v0, %v7108_v13  ;;  %v5147_v59 = vmax.f32 %v1961_v46, %v7116_v6  ;;  %v5150_v60 = vmax.f32 %v1962_v48, %v7118_v11  ;;  %v7120_v28 = vld [vmem:[#allocation38_spill] sm:$0xff]  ;;  %v5157_v0 = vmax.f32 %v5067_v63, %v5035_v32  ;;  %v7122_v26 = vld [vmem:[#allocation79_spill] sm:$0xff] }
 0x255   :  { %7083 = vst [vmem:[#allocation99_spill] sm:$0xff] %v5096_v41  ;;  %v5153_v2 = vmax.f32 %v1963_v42, %v7120_v28  ;;  %v2255_v54 = vsel %vm572_vm2, %v5067_v63, 0.0  ;;  %v2257_v46 = vsel %vm572_vm2, %v5075_v44, 0.0  ;;  %v7123_v48 = vld [vmem:[#allocation22_spill] sm:$0xff]  ;;  %v1559_v16 = vsel %vm1543_vm9, %v1529_v5, -inf  ;;  %v7126_v28 = vld [vmem:[#allocation120_spill] sm:$0xff] }
 0x256   :  { %7085 = vst [vmem:[#allocation2_spill] sm:$0xff] %v5099_v3  ;;  %v7124_v57 = vrot.slane %v7123_v48, 1  ;;  %v2256_v50 = vadd.f32 %v2255_v54, %v2254_v10  ;;  %v7125_v6 = vrot.slane %v6994_v62, 1  ;;  %v1908_v13 = vmax.f32 %v5026_v24, %v5059_v51  ;;  %v7130_v10 = vld [vmem:[#allocation82_spill] sm:$0xff] }
 0x257   :  { %7087 = vst [vmem:[#allocation43_spill] sm:$0xff] %v5102_v39  ;;  %v2259_v24 = vsel %vm572_vm2, %v5157_v0, 0.0  ;;  %v1441_v3 = vrot.slane %v7048_v9, 1 }
 0x258   :  { %7089 = vst [vmem:[#allocation63_spill] sm:$0xff] %v5105_v4  ;;  %v1530_v42 = vsel %vm1475_vm8, %v7124_v57, %v1420_v56  ;;  %v1527_v11 = vsel %vm1475_vm8, %v1422_v30, %v7125_v6  ;;  %v7128_v56 = vld [vmem:[#allocation80_spill] sm:$0xff] }
 0x259   :  { %7091 = vst [vmem:[#allocation44_spill] sm:$0xff] %v5108_v33  ;;  %v7140_v57 = vld [vmem:[#allocation84_spill] sm:$0xff]  ;;  %v7163_v33 = vld [vmem:[#allocation115_spill] sm:$0xff] }
 0x25a   :  { %7093 = vst [vmem:[#allocation98_spill] sm:$0xff] %v5111_v15 }
 0x25b   :  { %7095 = vst [vmem:[#allocation3_spill] sm:$0xff] %v5114_v14  ;;  %v7153_v14 = vld [vmem:[#allocation116_spill] sm:$0xff] }
 0x25c   :  { %7097 = vst [vmem:[#allocation45_spill] sm:$0xff] %v5117_v25  ;;  %v7152_v25 = vld [vmem:[#allocation88_spill] sm:$0xff] }
 0x25d   :  { %7099 = vst [vmem:[#allocation62_spill] sm:$0xff] %v5120_v45 }
 0x25e   :  { %7101 = vst [vmem:[#allocation46_spill] sm:$0xff] %v5123_v1  ;;  %v7151_v1 = vld [vmem:[#allocation87_spill] sm:$0xff] }
 0x25f   :  { %7103 = vst [vmem:[#allocation97_spill] sm:$0xff] %v5126_v34 }
 0x260   :  { %7105 = vst [vmem:[#allocation4_spill] sm:$0xff] %v5129_v61  ;;  %v7162_v61 = vld [vmem:[#allocation90_spill] sm:$0xff] }
 0x261   :  { %7107 = vst [vmem:[#allocation47_spill] sm:$0xff] %v5132_v20  ;;  %v1439_v15 = vrot.slane %v7162_v61, 1 }
 0x262   :  { %7109 = vst [vmem:[#allocation61_spill] sm:$0xff] %v5135_v58  ;;  %v7132_v58 = vld [vmem:[#allocation23_spill] sm:$0xff] }
 0x263   :  { %7111 = vst [vmem:[#allocation48_spill] sm:$0xff] %v5138_v29  ;;  %v7131_v29 = vld [vmem:[#allocation18_spill] sm:$0xff] }
 0x264   :  { %7113 = vst [vmem:[#allocation96_spill] sm:$0xff] %v5141_v49  ;;  %v2258_v49 = vadd.f32 %v2257_v46, %v2256_v50  ;;  %v7133_v6 = vmax.f32 %v7131_v29, %v7132_v58  ;;  %v7136_v50 = vrot.slane %v7046_v47, 1  ;;  %v7137_v29 = vld [vmem:[#allocation121_spill] sm:$0xff] }
 0x265   :  { %7115 = vst [vmem:[#allocation5_spill] sm:$0xff] %v5144_v37  ;;  %v7129_v37 = vld [vmem:[#allocation81_spill] sm:$0xff] }
 0x266   :  { %7117 = vst [vmem:[#allocation49_spill] sm:$0xff] %v5147_v59  ;;  %v5182_v59 = vmax.f32 %v1906_v18, %v5059_v51  ;;  %v1623_v20 = vmax.f32 %v7133_v6, %v1559_v16  ;;  %v7134_v18 = vrot.slane %v6997_v38, 1  ;;  %v1528_v58 = vsel %vm1475_vm8, %v7136_v50, %v1422_v30  ;;  %v7141_v30 = vld [vmem:[#allocation85_spill] sm:$0xff] }
 0x267   :  { %7119 = vst [vmem:[#allocation60_spill] sm:$0xff] %v5150_v60  ;;  %v7138_v16 = vmax.f32 %v7137_v29, %v7046_v47  ;;  %v7145_v29 = vrot.slane %v6998_v55, 1  ;;  %v7178_v17 = vrot.slane %v7129_v37, 1 }
 0x268   :  { %7121 = vst [vmem:[#allocation50_spill] sm:$0xff] %v5153_v2  ;;  %v7127_v2 = vmax.f32 %v7126_v28, %v7123_v48  ;;  %v5193_v48 = vmax.f32 %v1907_v22, %v5064_v53  ;;  %v2260_v22 = vadd.f32 %v2259_v24, %v2258_v49  ;;  %v1911_v47 = vmax.f32 %v5064_v53, %v1623_v20 }
 0x269   :  { %v1624_v28 = vmax.f32 %v7138_v16, %v1528_v58 }
 0x26a   :  { %v1622_v60 = vmax.f32 %v7127_v2, %v1530_v42  ;;  %v1909_v2 = vmax.f32 %v5035_v32, %v5064_v53  ;;  %v7135_v42 = vrot.slane %v6995_v19, 1  ;;  %v1561_v32 = vsel %vm1543_vm9, %v1527_v11, -inf  ;;  %v7142_v11 = vld [vmem:[#allocation117_spill] sm:$0xff] }
 0x26b   :  { %v7143_v49 = vmax.f32 %v7142_v11, %v7062_v40 }
 0x26c   :  { %v1525_v46 = vsel %vm1475_vm8, %v7135_v42, %v7134_v18  ;;  %v1910_v6 = vmax.f32 %v5059_v51, %v1622_v60  ;;  %v5213_v5 = vmax.f32 %v1908_v13, %v1622_v60  ;;  %v2261_v18 = vsel %vm572_vm2, %v5182_v59, 0.0  ;;  %v7139_v42 = vld [vmem:[#allocation83_spill] sm:$0xff] }
 0x26d   :  { %v2262_v34 = vadd.f32 %v2261_v18, %v2260_v22  ;;  %v1625_v24 = vmax.f32 %v7143_v49, %v1561_v32  ;;  %v5224_v58 = vmax.f32 %v1909_v2, %v1623_v20  ;;  %v2263_v51 = vsel %vm572_vm2, %v5193_v48, 0.0  ;;  %v7148_v32 = vld [vmem:[#allocation122_spill] sm:$0xff] }
 0x26e   :  { %v7144_v13 = vrot.slane %v7000_v12, 1  ;;  %v7146_v22 = vrot.slane %v6995_v19, 1  ;;  %v7147_v18 = vrot.slane %v6994_v62, 1  ;;  %v1563_v53 = vsel %vm1543_vm9, %v1525_v46, -inf }
 0x26f   :  { %v2264_v2 = vadd.f32 %v2263_v51, %v2262_v34  ;;  %v7149_v11 = vmax.f32 %v7148_v32, %v6994_v62  ;;  %v1912_v50 = vmax.f32 %v1622_v60, %v1624_v28  ;;  %v5245_v54 = vmax.f32 %v1910_v6, %v1624_v28 }
 0x270   :  { %v1523_v16 = vsel %vm1475_vm8, %v7145_v29, %v7144_v13  ;;  %v1526_v40 = vsel %vm1475_vm8, %v7147_v18, %v7146_v22  ;;  %v2265_v13 = vsel %vm572_vm2, %v5213_v5, 0.0  ;;  %v7150_v29 = vld [vmem:[#allocation86_spill] sm:$0xff]  ;;  %v7154_v34 = vmax.f32 %v7153_v14, %v6995_v19 }
 0x271   :  { %v1626_v49 = vmax.f32 %v7149_v11, %v1526_v40  ;;  %v2266_v18 = vadd.f32 %v2265_v13, %v2264_v2  ;;  %v1913_v51 = vmax.f32 %v1623_v20, %v1625_v24  ;;  %v5255_v62 = vmax.f32 %v1911_v47, %v1625_v24  ;;  %v7159_v47 = vld [vmem:[#allocation123_spill] sm:$0xff] }
 0x272   :  { %v1627_v46 = vmax.f32 %v7154_v34, %v1563_v53  ;;  %v2267_v60 = vsel %vm572_vm2, %v5224_v58, 0.0  ;;  %v7155_v6 = vrot.slane %v7128_v56, 1  ;;  %v7156_v40 = vrot.slane %v7122_v26, 1 }
 0x273   :  { %v7157_v11 = vrot.slane %v6998_v55, 1  ;;  %v7158_v2 = vrot.slane %v6997_v38, 1  ;;  %v1565_v14 = vsel %vm1543_vm9, %v1523_v16, -inf  ;;  %v2268_v20 = vadd.f32 %v2267_v60, %v2266_v18 }
 0x274   :  { %v1521_v32 = vsel %vm1475_vm8, %v7156_v40, %v7155_v6  ;;  %v7160_v53 = vmax.f32 %v7159_v47, %v6997_v38  ;;  %v1914_v34 = vmax.f32 %v1624_v28, %v1626_v49  ;;  %v5276_v45 = vmax.f32 %v1912_v50, %v1626_v49  ;;  %v7161_v40 = vld [vmem:[#allocation89_spill] sm:$0xff] }
 0x275   :  { %v1524_v19 = vsel %vm1475_vm8, %v7158_v2, %v7157_v11  ;;  %v2269_v6 = vsel %vm572_vm2, %v5245_v54, 0.0  ;;  %v1438_v22 = vrot.slane %v7161_v40, 1  ;;  %v1442_v11 = vrot.slane %v7058_v31, 1 }
 0x276   :  { %v1628_v13 = vmax.f32 %v7160_v53, %v1524_v19  ;;  %v2270_v2 = vadd.f32 %v2269_v6, %v2268_v20  ;;  %v7164_v16 = vmax.f32 %v7163_v33, %v6998_v55  ;;  %v1915_v60 = vmax.f32 %v1625_v24, %v1627_v46 }
 0x277   :  { %v5286_v38 = vmax.f32 %v1913_v51, %v1627_v46  ;;  %v2271_v28 = vsel %vm572_vm2, %v5255_v62, 0.0  ;;  %v7165_v50 = vrot.slane %v7130_v10, 1  ;;  %v7166_v19 = vrot.slane %v7129_v37, 1  ;;  %v7169_v51 = vld [vmem:[#allocation124_spill] sm:$0xff] }
 0x278   :  { %v1629_v18 = vmax.f32 %v7164_v16, %v1565_v14  ;;  %v7167_v53 = vrot.slane %v7122_v26, 1  ;;  %v7168_v20 = vrot.slane %v7000_v12, 1  ;;  %v1567_v33 = vsel %vm1543_vm9, %v1521_v32, -inf }
 0x279   :  { %v1519_v47 = vsel %vm1475_vm8, %v7166_v19, %v7165_v50  ;;  %v2272_v24 = vadd.f32 %v2271_v28, %v2270_v2  ;;  %v7170_v14 = vmax.f32 %v7169_v51, %v7000_v12  ;;  %v1916_v16 = vmax.f32 %v1626_v49, %v1628_v13  ;;  %v7171_v19 = vld [vmem:[#allocation91_spill] sm:$0xff]  ;;  %v7174_v12 = vld [vmem:[#allocation114_spill] sm:$0xff] }
 0x27a   :  { %v1522_v55 = vsel %vm1475_vm8, %v7168_v20, %v7167_v53  ;;  %v5307_v4 = vmax.f32 %v1914_v34, %v1628_v13  ;;  %v2273_v50 = vsel %vm572_vm2, %v5276_v45, 0.0  ;;  %v1440_v39 = vrot.slane %v7171_v19, 1 }
 0x27b   :  { %v1630_v6 = vmax.f32 %v7170_v14, %v1522_v55  ;;  %v7172_v53 = vrot.slane %v7140_v57, 1  ;;  %v7173_v20 = vrot.slane %v7139_v42, 1  ;;  %v2274_v2 = vadd.f32 %v2273_v50, %v2272_v24  ;;  %v7176_v14 = vld [vmem:[#allocation25_spill] sm:$0xff] }
 0x27c   :  { %v7175_v49 = vmax.f32 %v7174_v12, %v7122_v26  ;;  %v1917_v28 = vmax.f32 %v1627_v46, %v1629_v18  ;;  %v5322_v55 = vmax.f32 %v1915_v60, %v1629_v18  ;;  %v2275_v51 = vsel %vm572_vm2, %v5286_v38, 0.0 }
 0x27d   :  { %v1517_v32 = vsel %vm1475_vm8, %v7173_v20, %v7172_v53  ;;  %v7177_v41 = vrot.slane %v7176_v14, 1  ;;  %v7179_v24 = vrot.slane %v7128_v56, 1  ;;  %v1569_v46 = vsel %vm1543_vm9, %v1519_v47, -inf }
 0x27e   :  { %v1631_v34 = vmax.f32 %v7175_v49, %v1567_v33  ;;  %v2276_v60 = vadd.f32 %v2275_v51, %v2274_v2  ;;  %v7180_v33 = vld [vmem:[#allocation125_spill] sm:$0xff]  ;;  %v1918_v20 = vmax.f32 %v1628_v13, %v1630_v6  ;;  %v5343_v12 = vmax.f32 %v1916_v16, %v1630_v6 }
 0x27f   :  { %v5330_v7 = vsel %vm1475_vm8, %v1442_v11, %v7177_v41  ;;  %v1520_v26 = vsel %vm1475_vm8, %v7179_v24, %v7178_v17  ;;  %v7181_v50 = vmax.f32 %v7180_v33, %v7128_v56  ;;  %v2277_v41 = vsel %vm572_vm2, %v5307_v4, 0.0  ;;  %v7182_v51 = vld [vmem:[#allocation113_spill] sm:$0xff] }
 0x280   :  { %v5349_v49 = vsel %vm1475_vm8, %v1441_v3, %v1442_v11  ;;  %v1509_v17 = vsel %vm1475_vm8, %v1440_v39, %v1441_v3  ;;  %v1571_v47 = vsel %vm1543_vm9, %v1517_v32, -inf  ;;  %v2278_v2 = vadd.f32 %v2277_v41, %v2276_v60  ;;  %v7188_v60 = vld [vmem:[#allocation126_spill] sm:$0xff] }
 0x281   :  { %v1632_v53 = vmax.f32 %v7181_v50, %v1520_v26  ;;  %v7183_v56 = vmax.f32 %v7182_v51, %v7129_v37  ;;  %v1919_v16 = vmax.f32 %v1629_v18, %v1631_v34  ;;  %v5358_v14 = vmax.f32 %v1917_v28, %v1631_v34 }
 0x282   :  { %v2279_v24 = vsel %vm572_vm2, %v5322_v55, 0.0  ;;  %v5364_v11 = vsel %vm1475_vm8, %v1439_v15, %v1440_v39  ;;  %v7184_v3 = vrot.slane %v7150_v29, 1  ;;  %v7185_v26 = vrot.slane %v7141_v30, 1 }
 0x283   :  { %v1633_v13 = vmax.f32 %v7183_v56, %v1569_v46  ;;  %v7186_v37 = vrot.slane %v7139_v42, 1  ;;  %v7187_v18 = vrot.slane %v7130_v10, 1  ;;  %v2280_v46 = vadd.f32 %v2279_v24, %v2278_v2  ;;  %v7192_v24 = vld [vmem:[#allocation112_spill] sm:$0xff] }
 0x284   :  { %v1515_v32 = vsel %vm1475_vm8, %v7185_v26, %v7184_v3  ;;  %v7189_v33 = vmax.f32 %v7188_v60, %v7130_v10  ;;  %v1920_v50 = vmax.f32 %v1630_v6, %v1632_v53  ;;  %v5381_v41 = vmax.f32 %v1918_v20, %v1632_v53 }
 0x285   :  { %v1518_v28 = vsel %vm1475_vm8, %v7187_v18, %v7186_v37  ;;  %v2281_v51 = vsel %vm572_vm2, %v5343_v12, 0.0  ;;  %v1511_v56 = vsel %vm1475_vm8, %v1438_v22, %v1439_v15  ;;  %v7190_v3 = vrot.slane %v7152_v25, 1 }
 0x286   :  { %v1634_v39 = vmax.f32 %v7189_v33, %v1518_v28  ;;  %v7191_v26 = vrot.slane %v7151_v1, 1  ;;  %v7193_v10 = vmax.f32 %v7192_v24, %v7139_v42  ;;  %v2282_v6 = vadd.f32 %v2281_v51, %v2280_v46  ;;  %v7199_v51 = vld [vmem:[#allocation127_spill] sm:$0xff] }
 0x287   :  { %v1573_v20 = vsel %vm1543_vm9, %v1515_v32, -inf  ;;  %v1921_v18 = vmax.f32 %v1631_v34, %v1633_v13  ;;  %v5398_v28 = vmax.f32 %v1919_v16, %v1633_v13  ;;  %v2283_v15 = vsel %vm572_vm2, %v5358_v14, 0.0 }
 0x288   :  { %v1513_v2 = vsel %vm1475_vm8, %v7191_v26, %v7190_v3  ;;  %v1635_v37 = vmax.f32 %v7193_v10, %v1571_v47  ;;  %v7194_v60 = vmov %v7190_v3  ;;  %v7195_v3 = vmov %v7191_v26 }
 0x289   :  { %v1512_v33 = vsel %vm1475_vm8, %v7194_v60, %v1438_v22  ;;  %v7196_v42 = vrot.slane %v7150_v29, 1  ;;  %v7197_v32 = vrot.slane %v7141_v30, 1  ;;  %v7198_v34 = vrot.slane %v7140_v57, 1 }
 0x28a   :  { %v2284_v46 = vadd.f32 %v2283_v15, %v2282_v6  ;;  %v7200_v26 = vmax.f32 %v7199_v51, %v7140_v57  ;;  %v1922_v22 = vmax.f32 %v1632_v53, %v1634_v39  ;;  %v5421_v10 = vmax.f32 %v1920_v50, %v1634_v39  ;;  %v7205_v51 = vld [vmem:[#allocation110_spill] sm:$0xff] }
 0x28b   :  { %v1514_v47 = vsel %vm1475_vm8, %v7196_v42, %v7195_v3  ;;  %v1516_v16 = vsel %vm1475_vm8, %v7198_v34, %v7197_v32  ;;  %v2285_v60 = vsel %vm572_vm2, %v5381_v41, 0.0  ;;  %v1575_v3 = vsel %vm1543_vm9, %v1513_v2, -inf  ;;  %v7201_v42 = vld [vmem:[#allocation111_spill] sm:$0xff] }
 0x28c   :  { %v1636_v24 = vmax.f32 %v7200_v26, %v1516_v16  ;;  %v7202_v35 = vmax.f32 %v7201_v42, %v7141_v30  ;;  %v1923_v36 = vmax.f32 %v1633_v13, %v1635_v37  ;;  %v2286_v32 = vadd.f32 %v2285_v60, %v2284_v46 }
 0x28d   :  { %v5430_v6 = vmax.f32 %v1921_v18, %v1635_v37  ;;  %v2287_v57 = vsel %vm572_vm2, %v5398_v28, 0.0  ;;  %v2387_v53 = vmul.f32 %v5038_v8, %v5038_v8  ;;  %v2388_v50 = vmul.f32 %v5067_v63, %v5067_v63 }
 0x28e   :  { %v1637_v27 = vmax.f32 %v7202_v35, %v1573_v20  ;;  %v1577_v2 = vsel %vm1543_vm9, %v1511_v56, -inf  ;;  %v1579_v30 = vsel %vm1543_vm9, %v1509_v17, -inf  ;;  %v2288_v35 = vadd.f32 %v2287_v57, %v2286_v32  ;;  %v7203_v20 = vld [vmem:[#allocation128_spill] sm:$0xff] }
 0x28f   :  { %v2389_v13 = vmul.f32 %v5075_v44, %v5075_v44  ;;  %v7204_v18 = vmax.f32 %v7203_v20, %v7150_v29  ;;  %v1924_v34 = vmax.f32 %v1634_v39, %v1636_v24  ;;  %v5447_v16 = vmax.f32 %v1922_v22, %v1636_v24  ;;  %v7207_v22 = vld [vmem:[#allocation129_spill] sm:$0xff] }
 0x290   :  { %v2289_v46 = vsel %vm572_vm2, %v5421_v10, 0.0  ;;  %v7206_v56 = vmax.f32 %v7205_v51, %v7151_v1  ;;  %v1925_v60 = vmax.f32 %v1635_v37, %v1637_v27  ;;  %v5454_v17 = vmax.f32 %v1923_v36, %v1637_v27 }
 0x291   :  { %v1638_v15 = vmax.f32 %v7204_v18, %v1514_v47  ;;  %v2290_v42 = vadd.f32 %v2289_v46, %v2288_v35  ;;  %v2291_v32 = vsel %vm572_vm2, %v5430_v6, 0.0  ;;  %v2390_v29 = vmul.f32 %v5157_v0, %v5157_v0 }
 0x292   :  { %v1639_v26 = vmax.f32 %v7206_v56, %v1575_v3  ;;  %v2451_v39 = vsel %vm572_vm2, %v2387_v53, 0.0  ;;  %v2452_v47 = vsel %vm572_vm2, %v2388_v50, 0.0  ;;  %v7208_v57 = vmax.f32 %v7207_v22, %v7152_v25  ;;  %v7209_v53 = vld [vmem:[#allocation109_spill] sm:$0xff] }
 0x293   :  { %v2292_v1 = vadd.f32 %v2291_v32, %v2290_v42  ;;  %v2453_v3 = vadd.f32 %v2452_v47, %v2451_v39  ;;  %v2454_v37 = vsel %vm572_vm2, %v2389_v13, 0.0  ;;  %v1926_v36 = vmax.f32 %v1636_v24, %v1638_v15  ;;  %v7211_v32 = vld [vmem:[#allocation130_spill] sm:$0xff] }
 0x294   :  { %v1640_v20 = vmax.f32 %v7208_v57, %v1512_v33  ;;  %v5466_v35 = vmax.f32 %v1924_v34, %v1638_v15  ;;  %v2293_v18 = vsel %vm572_vm2, %v5447_v16, 0.0  ;;  %v2391_v46 = vmul.f32 %v5182_v59, %v5182_v59 }
 0x295   :  { %v7210_v50 = vmax.f32 %v7209_v53, %v7161_v40  ;;  %v1927_v56 = vmax.f32 %v1637_v27, %v1639_v26  ;;  %v2294_v25 = vadd.f32 %v2293_v18, %v2292_v1  ;;  %v2455_v33 = vadd.f32 %v2454_v37, %v2453_v3  ;;  %v7213_v3 = vld [vmem:[#allocation108_spill] sm:$0xff] }
 0x296   :  { %v5475_v42 = vmax.f32 %v1925_v60, %v1639_v26  ;;  %v2295_v24 = vsel %vm572_vm2, %v5454_v17, 0.0  ;;  %v2392_v13 = vmul.f32 %v5193_v48, %v5193_v48  ;;  %v2456_v34 = vsel %vm572_vm2, %v2390_v29, 0.0 }
 0x297   :  { %v1641_v51 = vmax.f32 %v7210_v50, %v1577_v2  ;;  %v7212_v39 = vmax.f32 %v7211_v32, %v7162_v61  ;;  %v1928_v40 = vmax.f32 %v1638_v15, %v1640_v20  ;;  %v2296_v2 = vadd.f32 %v2295_v24, %v2294_v25 }
 0x298   :  { %v2457_v27 = vadd.f32 %v2456_v34, %v2455_v33  ;;  %v5486_v22 = vmax.f32 %v1926_v36, %v1640_v20  ;;  %v2297_v60 = vsel %vm572_vm2, %v5466_v35, 0.0  ;;  %v2393_v57 = vmul.f32 %v5213_v5, %v5213_v5 }
 0x299   :  { %v1642_v47 = vmax.f32 %v7212_v39, %v5364_v11  ;;  %v2458_v1 = vsel %vm572_vm2, %v2391_v46, 0.0  ;;  %v7214_v29 = vmax.f32 %v7213_v3, %v7171_v19  ;;  %v1929_v18 = vmax.f32 %v1639_v26, %v1641_v51 }
 0x29a   :  { %v2298_v61 = vadd.f32 %v2297_v60, %v2296_v2  ;;  %v2459_v11 = vadd.f32 %v2458_v1, %v2457_v27  ;;  %v5496_v15 = vmax.f32 %v1927_v56, %v1641_v51  ;;  %v2299_v36 = vsel %vm572_vm2, %v5475_v42, 0.0  ;;  %v7216_v27 = vld [vmem:[#allocation107_spill] sm:$0xff] }
 0x29b   :  { %v1643_v37 = vmax.f32 %v7214_v29, %v1579_v30  ;;  %v2394_v53 = vmul.f32 %v5224_v58, %v5224_v58  ;;  %v2460_v50 = vsel %vm572_vm2, %v2392_v13, 0.0  ;;  %v1581_v46 = vsel %vm1543_vm9, %v5330_v7, -inf }
 0x29c   :  { %v1930_v25 = vmax.f32 %v1640_v20, %v1642_v47  ;;  %v2300_v19 = vadd.f32 %v2299_v36, %v2298_v61  ;;  %v2461_v30 = vadd.f32 %v2460_v50, %v2459_v11  ;;  %v5506_v26 = vmax.f32 %v1928_v40, %v1642_v47 }
 0x29d   :  { %v2301_v56 = vsel %vm572_vm2, %v5486_v22, 0.0  ;;  %v2395_v33 = vmul.f32 %v5245_v54, %v5245_v54  ;;  %v2462_v24 = vsel %vm572_vm2, %v2393_v57, 0.0  ;;  %v7215_v13 = vmax.f32 %v7049_v43, %v7048_v9 }
 0x29e   :  { %v1931_v52 = vmax.f32 %v1641_v51, %v1643_v37  ;;  %v2302_v7 = vadd.f32 %v2301_v56, %v2300_v19  ;;  %v2463_v20 = vadd.f32 %v2462_v24, %v2461_v30  ;;  %v5517_v32 = vmax.f32 %v1929_v18, %v1643_v37 }
 0x29f   :  { %v1644_v34 = vmax.f32 %v7215_v13, %v5349_v49  ;;  %v2303_v39 = vsel %vm572_vm2, %v5496_v15, 0.0  ;;  %v2396_v40 = vmul.f32 %v5255_v62, %v5255_v62  ;;  %v2464_v2 = vsel %vm572_vm2, %v2394_v53, 0.0 }
 0x2a0   :  { %v7217_v60 = vmax.f32 %v7216_v27, %v7058_v31  ;;  %v2304_v1 = vadd.f32 %v2303_v39, %v2302_v7  ;;  %v2465_v9 = vadd.f32 %v2464_v2, %v2463_v20  ;;  %v2305_v49 = vsel %vm572_vm2, %v5506_v26, 0.0 }
 0x2a1   :  { %v5527_v43 = vmax.f32 %v1930_v25, %v1644_v34  ;;  %v2397_v51 = vmul.f32 %v5276_v45, %v5276_v45  ;;  %v2466_v3 = vsel %vm572_vm2, %v2395_v33, 0.0  ;;  %v2307_v31 = vsel %vm572_vm2, %v5517_v32, 0.0 }
 0x2a2   :  { %v1645_v57 = vmax.f32 %v7217_v60, %v1581_v46  ;;  %v2306_v29 = vadd.f32 %v2305_v49, %v2304_v1  ;;  %v2467_v18 = vadd.f32 %v2466_v3, %v2465_v9  ;;  %v2398_v11 = vmul.f32 %v5286_v38, %v5286_v38  ;;  %v7221_v49 = vld [vmem:[#allocation72_spill] sm:$0xff] }
 0x2a3   :  { %v2468_v36 = vsel %vm572_vm2, %v2396_v40, 0.0  ;;  %v5541_v46 = vmax.f32 %v1642_v47, %v1644_v34  ;;  %v2309_v25 = vsel %vm572_vm2, %v5527_v43, 0.0  ;;  %v2399_v19 = vmul.f32 %v5307_v4, %v5307_v4 }
 0x2a4   :  { %v5534_v61 = vmax.f32 %v1931_v52, %v1645_v57  ;;  %v2308_v53 = vadd.f32 %v2307_v31, %v2306_v29  ;;  %v2469_v50 = vadd.f32 %v2468_v36, %v2467_v18  ;;  %v2470_v30 = vsel %vm572_vm2, %v2397_v51, 0.0  ;;  %v7222_v51 = vld [vmem:[#allocation101_spill] sm:$0xff] }
 0x2a5   :  { %7219 = vst [vmem:[#allocation6_spill] sm:$0xff] %v5541_v46  ;;  %v5548_v24 = vmax.f32 %v1643_v37, %v1645_v57  ;;  %v2400_v52 = vmul.f32 %v5322_v55, %v5322_v55  ;;  %v2472_v47 = vsel %vm572_vm2, %v2398_v11, 0.0  ;;  %v2313_v20 = vsel %vm572_vm2, %v5541_v46, 0.0 }
 0x2a6   :  { %7218 = vst [vmem:[#allocation95_spill] sm:$0xff] %v5534_v61  ;;  %v2310_v56 = vadd.f32 %v2309_v25, %v2308_v53  ;;  %v2471_v33 = vadd.f32 %v2470_v30, %v2469_v50  ;;  %v2311_v13 = vsel %vm572_vm2, %v5534_v61, 0.0  ;;  %v2401_v39 = vmul.f32 %v5343_v12, %v5343_v12  ;;  %v7224_v53 = vld [vmem:[#allocation71_spill] sm:$0xff] }
 0x2a7   :  { %7220 = vst [vmem:[#allocation51_spill] sm:$0xff] %v5548_v24  ;;  %v2474_v40 = vsel %vm572_vm2, %v2399_v19, 0.0  ;;  %v2315_v27 = vsel %vm572_vm2, %v5548_v24, 0.0  ;;  %v2402_v60 = vmul.f32 %v5358_v14, %v5358_v14  ;;  %v2476_v57 = vsel %vm572_vm2, %v2400_v52, 0.0  ;;  %v7225_v50 = vld [vmem:[#allocation19_spill] sm:$0xff] }
 0x2a8   :  { %v2312_v34 = vadd.f32 %v2311_v13, %v2310_v56  ;;  %v2473_v7 = vadd.f32 %v2472_v47, %v2471_v33  ;;  %v5567_v3 = vmax.f32 %v7222_v51, %v7221_v49  ;;  %v2317_v29 = vsel %vm572_vm2, %v7222_v51, 0.0 }
 0x2a9   :  { %v2403_v18 = vmul.f32 %v5381_v41, %v5381_v41  ;;  %v2478_v31 = vsel %vm572_vm2, %v2401_v39, 0.0  ;;  %v5576_v25 = vmax.f32 %v7225_v50, %v7224_v53  ;;  %v2319_v19 = vsel %vm572_vm2, %v7225_v50, 0.0  ;;  %v7227_v53 = vld [vmem:[#allocation21_spill] sm:$0xff] }
 0x2aa   :  { %v2314_v37 = vadd.f32 %v2313_v20, %v2312_v34  ;;  %v2475_v2 = vadd.f32 %v2474_v40, %v2473_v7  ;;  %7223 = vst [vmem:[#allocation58_spill] sm:$0xff] %v5567_v3  ;;  %v2404_v30 = vmul.f32 %v5398_v28, %v5398_v28  ;;  %v2480_v56 = vsel %vm572_vm2, %v2402_v60, 0.0 }
 0x2ab   :  { %7226 = vst [vmem:[#allocation52_spill] sm:$0xff] %v5576_v25  ;;  %v2321_v52 = vsel %vm572_vm2, %v5567_v3, 0.0  ;;  %v2405_v47 = vmul.f32 %v5421_v10, %v5421_v10  ;;  %v2482_v34 = vsel %vm572_vm2, %v2403_v18, 0.0  ;;  %v2323_v39 = vsel %vm572_vm2, %v5576_v25, 0.0 }
 0x2ac   :  { %v2316_v1 = vadd.f32 %v2315_v27, %v2314_v37  ;;  %v2477_v9 = vadd.f32 %v2476_v57, %v2475_v2  ;;  %v2406_v40 = vmul.f32 %v5430_v6, %v5430_v6  ;;  %v2484_v37 = vsel %vm572_vm2, %v2404_v30, 0.0 }
 0x2ad   :  { %v2325_v60 = vsel %vm572_vm2, %v5078_v23, 0.0  ;;  %v2407_v57 = vmul.f32 %v5447_v16, %v5447_v16  ;;  %v2408_v18 = vmul.f32 %v5454_v17, %v5454_v17  ;;  %v2409_v30 = vmul.f32 %v5466_v35, %v5466_v35 }
 0x2ae   :  { %v2318_v11 = vadd.f32 %v2317_v29, %v2316_v1  ;;  %v2479_v36 = vadd.f32 %v2478_v31, %v2477_v9  ;;  %v2486_v1 = vsel %vm572_vm2, %v2405_v47, 0.0  ;;  %v2327_v29 = vsel %vm572_vm2, %v5081_v21, 0.0 }
 0x2af   :  { %v2488_v31 = vsel %vm572_vm2, %v2406_v40, 0.0  ;;  %v7229_v40 = vld [vmem:[#allocation64_spill] sm:$0xff] }
 0x2b0   :  { %v2320_v33 = vadd.f32 %v2319_v19, %v2318_v11  ;;  %v2481_v13 = vadd.f32 %v2480_v56, %v2479_v36  ;;  %v2329_v19 = vsel %vm572_vm2, %v7227_v53, 0.0  ;;  %v2490_v56 = vsel %vm572_vm2, %v2407_v57, 0.0 }
 0x2b2   :  { %v2322_v7 = vadd.f32 %v2321_v52, %v2320_v33  ;;  %v2483_v20 = vadd.f32 %v2482_v34, %v2481_v13  ;;  %v7228_v52 = vld [vmem:[#allocation41_spill] sm:$0xff]  ;;  %v2410_v34 = vmul.f32 %v5475_v42, %v5475_v42 }
 0x2b3   :  { %v2331_v47 = vsel %vm572_vm2, %v7228_v52, 0.0 }
 0x2b4   :  { %v2324_v2 = vadd.f32 %v2323_v39, %v2322_v7  ;;  %v2485_v27 = vadd.f32 %v2484_v37, %v2483_v20  ;;  %v2492_v7 = vsel %vm572_vm2, %v2408_v18, 0.0  ;;  %v2333_v37 = vsel %vm572_vm2, %v7229_v40, 0.0 }
 0x2b6   :  { %v2326_v9 = vadd.f32 %v2325_v60, %v2324_v2  ;;  %v2487_v49 = vadd.f32 %v2486_v1, %v2485_v27  ;;  %v2411_v2 = vmul.f32 %v5486_v22, %v5486_v22  ;;  %v2494_v27 = vsel %vm572_vm2, %v2409_v30, 0.0  ;;  %v7230_v1 = vld [vmem:[#allocation42_spill] sm:$0xff] }
 0x2b8   :  { %v2328_v11 = vadd.f32 %v2327_v29, %v2326_v9  ;;  %v2489_v36 = vadd.f32 %v2488_v31, %v2487_v49  ;;  %v2335_v9 = vsel %vm572_vm2, %v7230_v1, 0.0  ;;  %v2412_v49 = vmul.f32 %v5496_v15, %v5496_v15 }
 0x2b9   :  { %v2496_v29 = vsel %vm572_vm2, %v2410_v34, 0.0  ;;  %v2498_v30 = vsel %vm572_vm2, %v2411_v2, 0.0 }
 0x2ba   :  { %v2330_v33 = vadd.f32 %v2329_v19, %v2328_v11  ;;  %v2491_v13 = vadd.f32 %v2490_v56, %v2489_v36  ;;  %v7231_v11 = vld [vmem:[#allocation99_spill] sm:$0xff]  ;;  %v2413_v19 = vmul.f32 %v5506_v26, %v5506_v26  ;;  %v2500_v34 = vsel %vm572_vm2, %v2412_v49, 0.0 }
 0x2bb   :  { %v2337_v36 = vsel %vm572_vm2, %v7231_v11, 0.0 }
 0x2bc   :  { %v2332_v20 = vadd.f32 %v2331_v47, %v2330_v33  ;;  %v2493_v39 = vadd.f32 %v2492_v7, %v2491_v13  ;;  %v7232_v13 = vld [vmem:[#allocation2_spill] sm:$0xff]  ;;  %v2414_v7 = vmul.f32 %v5517_v32, %v5517_v32  ;;  %v2502_v2 = vsel %vm572_vm2, %v2413_v19, 0.0 }
 0x2bd   :  { %v2339_v47 = vsel %vm572_vm2, %v7232_v13, 0.0 }
 0x2be   :  { %v2334_v60 = vadd.f32 %v2333_v37, %v2332_v20  ;;  %v2495_v57 = vadd.f32 %v2494_v27, %v2493_v39  ;;  %v7233_v37 = vld [vmem:[#allocation43_spill] sm:$0xff]  ;;  %v2504_v49 = vsel %vm572_vm2, %v2414_v7, 0.0 }
 0x2bf   :  { %v2341_v27 = vsel %vm572_vm2, %v7233_v37, 0.0 }
 0x2c0   :  { %v2336_v18 = vadd.f32 %v2335_v9, %v2334_v60  ;;  %v2497_v31 = vadd.f32 %v2496_v29, %v2495_v57  ;;  %v2415_v60 = vmul.f32 %v5527_v43, %v5527_v43  ;;  %v7234_v29 = vld [vmem:[#allocation63_spill] sm:$0xff] }
 0x2c2   :  { %v2338_v56 = vadd.f32 %v2337_v36, %v2336_v18  ;;  %v2499_v33 = vadd.f32 %v2498_v30, %v2497_v31  ;;  %v2343_v18 = vsel %vm572_vm2, %v7234_v29, 0.0  ;;  %v2416_v31 = vmul.f32 %v5534_v61, %v5534_v61  ;;  %v7245_v61 = vld [vmem:[#allocation48_spill] sm:$0xff] }
 0x2c3   :  { %v2506_v19 = vsel %vm572_vm2, %v2415_v60, 0.0 }
 0x2c4   :  { %v2340_v20 = vadd.f32 %v2339_v47, %v2338_v56  ;;  %v2501_v39 = vadd.f32 %v2500_v34, %v2499_v33  ;;  %v7235_v56 = vld [vmem:[#allocation44_spill] sm:$0xff]  ;;  %v2417_v47 = vmul.f32 %v5541_v46, %v5541_v46  ;;  %v2508_v7 = vsel %vm572_vm2, %v2416_v31, 0.0 }
 0x2c5   :  { %v2345_v33 = vsel %vm572_vm2, %v7235_v56, 0.0  ;;  %v2419_v46 = vmul.f32 %v7222_v51, %v7222_v51  ;;  %v2421_v51 = vmul.f32 %v5567_v3, %v5567_v3  ;;  %v2423_v3 = vmul.f32 %v5078_v23, %v5078_v23 }
 0x2c6   :  { %v2342_v57 = vadd.f32 %v2341_v27, %v2340_v20  ;;  %v2503_v9 = vadd.f32 %v2502_v2, %v2501_v39  ;;  %v7236_v39 = vld [vmem:[#allocation98_spill] sm:$0xff]  ;;  %v2418_v2 = vmul.f32 %v5548_v24, %v5548_v24  ;;  %v2510_v60 = vsel %vm572_vm2, %v2417_v47, 0.0 }
 0x2c7   :  { %v2347_v27 = vsel %vm572_vm2, %v7236_v39, 0.0  ;;  %v2420_v24 = vmul.f32 %v7225_v50, %v7225_v50  ;;  %v2514_v47 = vsel %vm572_vm2, %v2419_v46, 0.0  ;;  %v2422_v50 = vmul.f32 %v5576_v25, %v5576_v25 }
 0x2c8   :  { %v2344_v36 = vadd.f32 %v2343_v18, %v2342_v57  ;;  %v2505_v30 = vadd.f32 %v2504_v49, %v2503_v9  ;;  %v7237_v18 = vld [vmem:[#allocation3_spill] sm:$0xff]  ;;  %v2512_v31 = vsel %vm572_vm2, %v2418_v2, 0.0  ;;  %v2518_v46 = vsel %vm572_vm2, %v2421_v51, 0.0 }
 0x2c9   :  { %v2349_v49 = vsel %vm572_vm2, %v7237_v18, 0.0  ;;  %v2516_v2 = vsel %vm572_vm2, %v2420_v24, 0.0  ;;  %v2424_v25 = vmul.f32 %v5081_v21, %v5081_v21  ;;  %v2520_v24 = vsel %vm572_vm2, %v2422_v50, 0.0 }
 0x2ca   :  { %v2346_v34 = vadd.f32 %v2345_v33, %v2344_v36  ;;  %v2507_v20 = vadd.f32 %v2506_v19, %v2505_v30  ;;  %v7238_v33 = vld [vmem:[#allocation45_spill] sm:$0xff]  ;;  %v2425_v23 = vmul.f32 %v7227_v53, %v7227_v53  ;;  %v2522_v51 = vsel %vm572_vm2, %v2423_v3, 0.0 }
 0x2cb   :  { %v2351_v19 = vsel %vm572_vm2, %v7238_v33, 0.0  ;;  %v2426_v21 = vmul.f32 %v7228_v52, %v7228_v52  ;;  %v2524_v50 = vsel %vm572_vm2, %v2424_v25, 0.0  ;;  %v2365_v3 = vsel %vm572_vm2, %v7245_v61, 0.0 }
 0x2cc   :  { %v2348_v57 = vadd.f32 %v2347_v27, %v2346_v34  ;;  %v2509_v9 = vadd.f32 %v2508_v7, %v2507_v20  ;;  %v7239_v27 = vld [vmem:[#allocation62_spill] sm:$0xff]  ;;  %v2429_v25 = vmul.f32 %v7231_v11, %v7231_v11 }
 0x2cd   :  { %v2353_v7 = vsel %vm572_vm2, %v7239_v27, 0.0 }
 0x2ce   :  { %v2350_v36 = vadd.f32 %v2349_v49, %v2348_v57  ;;  %v2511_v30 = vadd.f32 %v2510_v60, %v2509_v9  ;;  %v7240_v49 = vld [vmem:[#allocation46_spill] sm:$0xff] }
 0x2cf   :  { %v2355_v60 = vsel %vm572_vm2, %v7240_v49, 0.0 }
 0x2d0   :  { %v2352_v34 = vadd.f32 %v2351_v19, %v2350_v36  ;;  %v2513_v20 = vadd.f32 %v2512_v31, %v2511_v30  ;;  %v7241_v19 = vld [vmem:[#allocation97_spill] sm:$0xff] }
 0x2d1   :  { %v2357_v31 = vsel %vm572_vm2, %v7241_v19, 0.0 }
 0x2d2   :  { %v2354_v57 = vadd.f32 %v2353_v7, %v2352_v34  ;;  %v2515_v9 = vadd.f32 %v2514_v47, %v2513_v20  ;;  %v7242_v7 = vld [vmem:[#allocation4_spill] sm:$0xff] }
 0x2d3   :  { %v2359_v47 = vsel %vm572_vm2, %v7242_v7, 0.0 }
 0x2d4   :  { %v2356_v36 = vadd.f32 %v2355_v60, %v2354_v57  ;;  %v2517_v30 = vadd.f32 %v2516_v2, %v2515_v9  ;;  %v7243_v60 = vld [vmem:[#allocation47_spill] sm:$0xff] }
 0x2d5   :  { %v2361_v2 = vsel %vm572_vm2, %v7243_v60, 0.0 }
 0x2d6   :  { %v2358_v34 = vadd.f32 %v2357_v31, %v2356_v36  ;;  %v2519_v20 = vadd.f32 %v2518_v46, %v2517_v30  ;;  %v7244_v31 = vld [vmem:[#allocation61_spill] sm:$0xff] }
 0x2d7   :  { %v2363_v46 = vsel %vm572_vm2, %v7244_v31, 0.0 }
 0x2d8   :  { %v2360_v57 = vadd.f32 %v2359_v47, %v2358_v34  ;;  %v2521_v9 = vadd.f32 %v2520_v24, %v2519_v20  ;;  %v2427_v47 = vmul.f32 %v7229_v40, %v7229_v40  ;;  %v2526_v24 = vsel %vm572_vm2, %v2425_v23, 0.0 }
 0x2da   :  { %v2362_v36 = vadd.f32 %v2361_v2, %v2360_v57  ;;  %v2523_v30 = vadd.f32 %v2522_v51, %v2521_v9  ;;  %v2428_v57 = vmul.f32 %v7230_v1, %v7230_v1  ;;  %v2528_v9 = vsel %vm572_vm2, %v2426_v21, 0.0 }
 0x2db   :  { %v2431_v21 = vmul.f32 %v7233_v37, %v7233_v37 }
 0x2dc   :  { %v2364_v34 = vadd.f32 %v2363_v46, %v2362_v36  ;;  %v2525_v20 = vadd.f32 %v2524_v50, %v2523_v30  ;;  %v2530_v36 = vsel %vm572_vm2, %v2427_v47, 0.0  ;;  %v7246_v46 = vld [vmem:[#allocation96_spill] sm:$0xff]  ;;  %v2430_v50 = vmul.f32 %v7232_v13, %v7232_v13 }
 0x2dd   :  { %v2367_v23 = vsel %vm572_vm2, %v7246_v46, 0.0 }
 0x2de   :  { %v2527_v53 = vadd.f32 %v2526_v24, %v2525_v20  ;;  %v2366_v2 = vadd.f32 %v2365_v3, %v2364_v34  ;;  %v2532_v20 = vsel %vm572_vm2, %v2428_v57, 0.0  ;;  %v7247_v3 = vld [vmem:[#allocation5_spill] sm:$0xff]  ;;  %v2433_v57 = vmul.f32 %v7235_v56, %v7235_v56 }
 0x2df   :  { %v2369_v47 = vsel %vm572_vm2, %v7247_v3, 0.0 }
 0x2e0   :  { %v2529_v51 = vadd.f32 %v2528_v9, %v2527_v53  ;;  %v2368_v24 = vadd.f32 %v2367_v23, %v2366_v2  ;;  %v2534_v53 = vsel %vm572_vm2, %v2429_v25, 0.0  ;;  %v2432_v9 = vmul.f32 %v7234_v29, %v7234_v29  ;;  %v7248_v23 = vld [vmem:[#allocation49_spill] sm:$0xff] }
 0x2e1   :  { %v2538_v2 = vsel %vm572_vm2, %v2431_v21, 0.0  ;;  %v2371_v25 = vsel %vm572_vm2, %v7248_v23, 0.0 }
 0x2e2   :  { %v2531_v30 = vadd.f32 %v2530_v36, %v2529_v51  ;;  %v2536_v51 = vsel %vm572_vm2, %v2430_v50, 0.0  ;;  %v2370_v36 = vadd.f32 %v2369_v47, %v2368_v24  ;;  %v2435_v50 = vmul.f32 %v7237_v18, %v7237_v18  ;;  %v7249_v47 = vld [vmem:[#allocation60_spill] sm:$0xff] }
 0x2e3   :  { %v2542_v24 = vsel %vm572_vm2, %v2433_v57, 0.0  ;;  %v2373_v21 = vsel %vm572_vm2, %v7249_v47, 0.0 }
 0x2e4   :  { %v2533_v1 = vadd.f32 %v2532_v20, %v2531_v30  ;;  %v2540_v20 = vsel %vm572_vm2, %v2432_v9, 0.0  ;;  %v2437_v9 = vmul.f32 %v7239_v27, %v7239_v27 }
 0x2e6   :  { %v2535_v34 = vadd.f32 %v2534_v53, %v2533_v1  ;;  %v2434_v1 = vmul.f32 %v7236_v39, %v7236_v39  ;;  %v2372_v53 = vadd.f32 %v2371_v25, %v2370_v36  ;;  %v2546_v36 = vsel %vm572_vm2, %v2435_v50, 0.0  ;;  %v7250_v25 = vld [vmem:[#allocation50_spill] sm:$0xff] }
 0x2e7   :  { %v2375_v57 = vsel %vm572_vm2, %v7250_v25, 0.0 }
 0x2e8   :  { %v2537_v13 = vadd.f32 %v2536_v51, %v2535_v34  ;;  %v2544_v51 = vsel %vm572_vm2, %v2434_v1, 0.0  ;;  %v2439_v1 = vmul.f32 %v7241_v19, %v7241_v19 }
 0x2ea   :  { %v2539_v30 = vadd.f32 %v2538_v2, %v2537_v13  ;;  %v2436_v13 = vmul.f32 %v7238_v33, %v7238_v33  ;;  %v2374_v2 = vadd.f32 %v2373_v21, %v2372_v53  ;;  %v2550_v53 = vsel %vm572_vm2, %v2437_v9, 0.0  ;;  %v7251_v21 = vld [vmem:[#allocation39_spill] sm:$0xff] }
 0x2eb   :  { %v2377_v50 = vsel %vm572_vm2, %v7251_v21, 0.0 }
 0x2ec   :  { %v2541_v29 = vadd.f32 %v2540_v20, %v2539_v30  ;;  %v2548_v20 = vsel %vm572_vm2, %v2436_v13, 0.0  ;;  %v2441_v13 = vmul.f32 %v7243_v60, %v7243_v60 }
 0x2ee   :  { %v2543_v34 = vadd.f32 %v2542_v24, %v2541_v29  ;;  %v2438_v29 = vmul.f32 %v7240_v49, %v7240_v49  ;;  %v2376_v24 = vadd.f32 %v2375_v57, %v2374_v2  ;;  %v2554_v2 = vsel %vm572_vm2, %v2439_v1, 0.0  ;;  %v7252_v57 = vld [vmem:[#allocation65_spill] sm:$0xff] }
 0x2ef   :  { %v2379_v9 = vsel %vm572_vm2, %v7252_v57, 0.0  ;;  %v2444_v1 = vmul.f32 %v7246_v46, %v7246_v46 }
 0x2f0   :  { %v2545_v39 = vadd.f32 %v2544_v51, %v2543_v34  ;;  %v2552_v51 = vsel %vm572_vm2, %v2438_v29, 0.0  ;;  %v2443_v29 = vmul.f32 %v7245_v61, %v7245_v61 }
 0x2f2   :  { %v2547_v30 = vadd.f32 %v2546_v36, %v2545_v39  ;;  %v2440_v39 = vmul.f32 %v7242_v7, %v7242_v7  ;;  %v2378_v36 = vadd.f32 %v2377_v50, %v2376_v24  ;;  %v2558_v24 = vsel %vm572_vm2, %v2441_v13, 0.0 }
 0x2f4   :  { %v2549_v33 = vadd.f32 %v2548_v20, %v2547_v30  ;;  %v2556_v20 = vsel %vm572_vm2, %v2440_v39, 0.0  ;;  %v2562_v39 = vsel %vm572_vm2, %v2443_v29, 0.0 }
 0x2f6   :  { %v2551_v34 = vadd.f32 %v2550_v53, %v2549_v33  ;;  %v2442_v33 = vmul.f32 %v7244_v31, %v7244_v31  ;;  %v2380_v53 = vadd.f32 %v2379_v9, %v2378_v36  ;;  %v2564_v9 = vsel %vm572_vm2, %v2444_v1, 0.0 }
 0x2f8   :  { %v2553_v49 = vadd.f32 %v2552_v51, %v2551_v34  ;;  %v2381_v50 = vrot.slane %v2380_v53, 4 }
 0x2fa   :  { %v2555_v30 = vadd.f32 %v2554_v2, %v2553_v49  ;;  %v2560_v49 = vsel %vm572_vm2, %v2442_v33, 0.0  ;;  %v2445_v2 = vmul.f32 %v7247_v3, %v7247_v3  ;;  %v2382_v13 = vadd.f32 %v2381_v50, %v2380_v53 }
 0x2fb   :  { %v2450_v50 = vmul.f32 %v7252_v57, %v7252_v57 }
 0x2fc   :  { %v2557_v7 = vadd.f32 %v2556_v20, %v2555_v30  ;;  %v2446_v30 = vmul.f32 %v7248_v23, %v7248_v23  ;;  %v2447_v20 = vmul.f32 %v7249_v47, %v7249_v47  ;;  %v2566_v33 = vsel %vm572_vm2, %v2445_v2, 0.0 }
 0x2fd   :  { %v2383_v29 = vrot.slane %v2382_v13, 2 }
 0x2fe   :  { %v2559_v34 = vadd.f32 %v2558_v24, %v2557_v7  ;;  %v2570_v1 = vsel %vm572_vm2, %v2447_v20, 0.0 }
 0x2ff   :  { %v2384_v2 = vadd.f32 %v2383_v29, %v2382_v13 }
 0x300   :  { %v2561_v51 = vadd.f32 %v2560_v49, %v2559_v34  ;;  %v2448_v34 = vmul.f32 %v7250_v25, %v7250_v25  ;;  %v2568_v49 = vsel %vm572_vm2, %v2446_v30, 0.0  ;;  %v2576_v30 = vsel %vm572_vm2, %v2450_v50, 0.0 }
 0x301   :  { %v2385_v25 = vrot.slane %v2384_v2, 1 }
 0x302   :  { %v2563_v36 = vadd.f32 %v2562_v39, %v2561_v51  ;;  %v2449_v39 = vmul.f32 %v7251_v21, %v7251_v21 }
 0x303   :  { %v2386_v47 = vadd.f32 %v2385_v25, %v2384_v2 }
 0x304   :  { %v2565_v7 = vadd.f32 %v2564_v9, %v2563_v36  ;;  %v2572_v36 = vsel %vm572_vm2, %v2448_v34, 0.0 }
 0x306   :  { %v2567_v24 = vadd.f32 %v2566_v33, %v2565_v7  ;;  %v2574_v7 = vsel %vm572_vm2, %v2449_v39, 0.0 }
 0x308   :  { %v2569_v51 = vadd.f32 %v2568_v49, %v2567_v24 }
 0x30a   :  { %v2571_v53 = vadd.f32 %v2570_v1, %v2569_v51  ;;  %v5783_v51 = vmul.f32 0.001953125, %v2386_v47 }
 0x30c   :  { %v2573_v9 = vadd.f32 %v2572_v36, %v2571_v53  ;;  %v2586_v13 = vmul.f32 %v5783_v51, %v5783_v51  ;;  %v2590_v47 = vsub.f32 %v5067_v63, %v5783_v51  ;;  %v2594_v63 = vsub.f32 %v5193_v48, %v5783_v51 }
 0x30e   :  { %v2575_v33 = vadd.f32 %v2574_v7, %v2573_v9 }
 0x310   :  { %v2577_v24 = vadd.f32 %v2576_v30, %v2575_v33  ;;  %v2593_v30 = vsub.f32 %v5182_v59, %v5783_v51  ;;  %v2596_v59 = vsub.f32 %v5224_v58, %v5783_v51  ;;  %v2598_v58 = vsub.f32 %v5255_v62, %v5783_v51 }
 0x311   :  { %v2600_v62 = vsub.f32 %v5286_v38, %v5783_v51  ;;  %v2602_v38 = vsub.f32 %v5322_v55, %v5783_v51  ;;  %v2604_v55 = vsub.f32 %v5358_v14, %v5783_v51  ;;  %v2606_v14 = vsub.f32 %v5398_v28, %v5783_v51 }
 0x312   :  { %v2578_v49 = vrot.slane %v2577_v24, 4  ;;  %v2608_v28 = vsub.f32 %v5430_v6, %v5783_v51  ;;  %v2610_v6 = vsub.f32 %v5454_v17, %v5783_v51  ;;  %v2612_v17 = vsub.f32 %v5475_v42, %v5783_v51 }
 0x313   :  { %v2614_v42 = vsub.f32 %v5496_v15, %v5783_v51  ;;  %v2616_v15 = vsub.f32 %v5517_v32, %v5783_v51 }
 0x314   :  { %v2579_v21 = vadd.f32 %v2578_v49, %v2577_v24 }
 0x316   :  { %v2580_v23 = vrot.slane %v2579_v21, 2 }
 0x318   :  { %v2581_v20 = vadd.f32 %v2580_v23, %v2579_v21  ;;  %v2589_v23 = vsub.f32 %v5038_v8, %v5783_v51  ;;  %v2591_v21 = vsub.f32 %v5075_v44, %v5783_v51 }
 0x31a   :  { %v2582_v1 = vrot.slane %v2581_v20, 1 }
 0x31c   :  { %v2583_v57 = vadd.f32 %v2582_v1, %v2581_v20  ;;  %v2595_v20 = vsub.f32 %v5213_v5, %v5783_v51  ;;  %v2597_v5 = vsub.f32 %v5245_v54, %v5783_v51  ;;  %v2599_v54 = vsub.f32 %v5276_v45, %v5783_v51 }
 0x31d   :  { %v2601_v45 = vsub.f32 %v5307_v4, %v5783_v51  ;;  %v2603_v4 = vsub.f32 %v5343_v12, %v5783_v51  ;;  %v2605_v12 = vsub.f32 %v5381_v41, %v5783_v51  ;;  %v2607_v41 = vsub.f32 %v5421_v10, %v5783_v51 }
 0x31e   :  { %v2585_v34 = vmul.f32 0.001953125, %v2583_v57  ;;  %v2592_v57 = vsub.f32 %v5157_v0, %v5783_v51  ;;  %v2609_v10 = vsub.f32 %v5447_v16, %v5783_v51  ;;  %v2611_v16 = vsub.f32 %v5466_v35, %v5783_v51 }
 0x31f   :  { %v2613_v35 = vsub.f32 %v5486_v22, %v5783_v51  ;;  %v2615_v22 = vsub.f32 %v5506_v26, %v5783_v51  ;;  %v2617_v26 = vsub.f32 %v5527_v43, %v5783_v51 }
 0x320   :  { %v2587_v29 = vsub.f32 %v2585_v34, %v2586_v13 }
 0x322   :  { %v2588_v39 = vmax.f32 %v2587_v29, 0.0 }
 0x324   :  { %v2653_v53 = vadd.f32 1e-05, %v2588_v39 }
 0x326   :  { %2833 = vrsqrt.f32 %v2653_v53  ;;  %vm2660_vm11 = vweird.f32 %v2653_v53 }
 0x32c   :  { %v2834_v50 = vpop.eup %2833 }
 0x32d   :  { %v2655_v36 = vmul.f32 %v2834_v50, %v2653_v53  ;;  %vm2661_vm10 = vweird.f32 %v2834_v50 }
 0x32e   :  { %vm2662_vm12 = vmor %vm2660_vm11, %vm2661_vm10 }
 0x32f   :  { %v2656_v9 = vmul.f32 %v2834_v50, %v2655_v36 }
 0x331   :  { %v2657_v7 = vmul.f32 0.5, %v2656_v9 }
 0x333   :  { %v2658_v25 = vsub.f32 1.5, %v2657_v7 }
 0x335   :  { %v2659_v2 = vmul.f32 %v2834_v50, %v2658_v25 }
 0x337   :  { %v5795_v33 = vsel %vm2662_vm12, %v2834_v50, %v2659_v2 }
 0x338   :  { %v2664_v24 = vmul.f32 %v5795_v33, %v2589_v23  ;;  %v2665_v49 = vmul.f32 %v5795_v33, %v2590_v47  ;;  %v2666_v8 = vmul.f32 %v5795_v33, %v2591_v21  ;;  %v2667_v44 = vmul.f32 %v5795_v33, %v2592_v57 }
 0x339   :  { %v2668_v0 = vmul.f32 %v5795_v33, %v2593_v30  ;;  %v2669_v1 = vmul.f32 %v5795_v33, %v2594_v63  ;;  %v2670_v48 = vmul.f32 %v5795_v33, %v2595_v20  ;;  %v2671_v13 = vmul.f32 %v5795_v33, %v2596_v59 }
 0x33a   :  { %2728 = vst.msk [vmem:[%s6239_s2] sm:$0xff] %vm572_vm2, %v2664_v24  ;;  %v2672_v34 = vmul.f32 %v5795_v33, %v2597_v5  ;;  %v2673_v29 = vmul.f32 %v5795_v33, %v2598_v58  ;;  %v2674_v39 = vmul.f32 %v5795_v33, %v2599_v54  ;;  %v2675_v53 = vmul.f32 %v5795_v33, %v2600_v62  ;;  %v7256_v58 = vld [vmem:[#allocation101_spill] sm:$0xff] }
 0x33b   :  { %2729 = vst.msk [vmem:[%s6239_s2 + $0x8] sm:$0xff] %vm572_vm2, %v2665_v49  ;;  %v2676_v50 = vmul.f32 %v5795_v33, %v2601_v45  ;;  %v2677_v36 = vmul.f32 %v5795_v33, %v2602_v38  ;;  %v2678_v9 = vmul.f32 %v5795_v33, %v2603_v4  ;;  %v2679_v7 = vmul.f32 %v5795_v33, %v2604_v55  ;;  %v7258_v45 = vld [vmem:[#allocation58_spill] sm:$0xff]  ;;  %v7260_v55 = vld [vmem:[#allocation40_spill] sm:$0xff] }
 0x33c   :  { %2730 = vst.msk [vmem:[%s6239_s2 + $0x10] sm:$0xff] %vm572_vm2, %v2666_v8  ;;  %v2680_v25 = vmul.f32 %v5795_v33, %v2605_v12  ;;  %v2681_v2 = vmul.f32 %v5795_v33, %v2606_v14  ;;  %v2682_v23 = vmul.f32 %v5795_v33, %v2607_v41  ;;  %v2683_v47 = vmul.f32 %v5795_v33, %v2608_v28  ;;  %v7262_v41 = vld [vmem:[#allocation21_spill] sm:$0xff] }
 0x33d   :  { %2731 = vst.msk [vmem:[%s6239_s2 + $0x18] sm:$0xff] %vm572_vm2, %v2667_v44  ;;  %v2684_v21 = vmul.f32 %v5795_v33, %v2609_v10  ;;  %v2685_v57 = vmul.f32 %v5795_v33, %v2610_v6  ;;  %v2686_v30 = vmul.f32 %v5795_v33, %v2611_v16  ;;  %v2687_v24 = vmul.f32 %v5795_v33, %v2612_v17  ;;  %v7253_v44 = vld [vmem:[#allocation95_spill] sm:$0xff]  ;;  %v7264_v17 = vld [vmem:[#allocation2_spill] sm:$0xff] }
 0x33e   :  { %2732 = vst.msk [vmem:[%s6239_s2 + $0x20] sm:$0xff] %vm572_vm2, %v2668_v0  ;;  %v2688_v49 = vmul.f32 %v5795_v33, %v2613_v35  ;;  %v2689_v8 = vmul.f32 %v5795_v33, %v2614_v42  ;;  %v2690_v63 = vmul.f32 %v5795_v33, %v2615_v22  ;;  %v2618_v32 = vsub.f32 %v7253_v44, %v5783_v51  ;;  %v7254_v0 = vld [vmem:[#allocation6_spill] sm:$0xff]  ;;  %v7265_v42 = vld [vmem:[#allocation63_spill] sm:$0xff]  ;;  %v7267_v44 = vld [vmem:[#allocation45_spill] sm:$0xff] }
 0x33f   :  { %2733 = vst.msk [vmem:[%s6239_s2 + $0x28] sm:$0xff] %vm572_vm2, %v2669_v1  ;;  %v2691_v20 = vmul.f32 %v5795_v33, %v2616_v15  ;;  %v2619_v43 = vsub.f32 %v7254_v0, %v5783_v51  ;;  %v2692_v59 = vmul.f32 %v5795_v33, %v2617_v26  ;;  %v7255_v1 = vld [vmem:[#allocation51_spill] sm:$0xff]  ;;  %v7266_v15 = vld [vmem:[#allocation98_spill] sm:$0xff] }
 0x340   :  { %2734 = vst.msk [vmem:[%s6239_s2 + $0x30] sm:$0xff] %vm572_vm2, %v2670_v48  ;;  %v2620_v5 = vsub.f32 %v7255_v1, %v5783_v51  ;;  %v2693_v48 = vmul.f32 %v5795_v33, %v2618_v32  ;;  %v2638_v32 = vsub.f32 %v7267_v44, %v5783_v51 }
 0x341   :  { %2735 = vst.msk [vmem:[%s6239_s2 + $0x38] sm:$0xff] %vm572_vm2, %v2671_v13  ;;  %v2621_v13 = vsub.f32 %v7256_v58, %v5783_v51  ;;  %v2694_v54 = vmul.f32 %v5795_v33, %v2619_v43  ;;  %v7268_v43 = vld [vmem:[#allocation46_spill] sm:$0xff] }
 0x342   :  { %2736 = vst.msk [vmem:[%s6239_s2 + $0x40] sm:$0xff] %vm572_vm2, %v2672_v34  ;;  %v7257_v34 = vld [vmem:[#allocation19_spill] sm:$0xff]  ;;  %v2713_v1 = vmul.f32 %v5795_v33, %v2638_v32 }
 0x343   :  { %2737 = vst.msk [vmem:[%s6239_s2 + $0x48] sm:$0xff] %vm572_vm2, %v2673_v29  ;;  %v2622_v62 = vsub.f32 %v7257_v34, %v5783_v51  ;;  %v2695_v29 = vmul.f32 %v5795_v33, %v2620_v5  ;;  %v2696_v38 = vmul.f32 %v5795_v33, %v2621_v13  ;;  %v2644_v34 = vsub.f32 %v7244_v31, %v5783_v51 }
 0x344   :  { %2738 = vst.msk [vmem:[%s6239_s2 + $0x50] sm:$0xff] %vm572_vm2, %v2674_v39  ;;  %v2623_v39 = vsub.f32 %v7258_v45, %v5783_v51  ;;  %v2646_v31 = vsub.f32 %v7246_v46, %v5783_v51 }
 0x345   :  { %2739 = vst.msk [vmem:[%s6239_s2 + $0x58] sm:$0xff] %vm572_vm2, %v2675_v53  ;;  %v7259_v53 = vld [vmem:[#allocation52_spill] sm:$0xff]  ;;  %v2719_v45 = vmul.f32 %v5795_v33, %v2644_v34 }
 0x346   :  { %2740 = vst.msk [vmem:[%s6239_s2 + $0x60] sm:$0xff] %vm572_vm2, %v2676_v50  ;;  %v2624_v4 = vsub.f32 %v7259_v53, %v5783_v51  ;;  %v2697_v50 = vmul.f32 %v5795_v33, %v2622_v62  ;;  %v2698_v12 = vmul.f32 %v5795_v33, %v2623_v39  ;;  %v2721_v53 = vmul.f32 %v5795_v33, %v2646_v31 }
 0x347   :  { %2741 = vst.msk [vmem:[%s6239_s2 + $0x68] sm:$0xff] %vm572_vm2, %v2677_v36  ;;  %v2625_v36 = vsub.f32 %v7260_v55, %v5783_v51  ;;  %v7272_v55 = vld [vmem:[#allocation50_spill] sm:$0xff] }
 0x348   :  { %2742 = vst.msk [vmem:[%s6239_s2 + $0x70] sm:$0xff] %vm572_vm2, %v2678_v9  ;;  %v7261_v9 = vld [vmem:[#allocation100_spill] sm:$0xff] }
 0x349   :  { %2743 = vst.msk [vmem:[%s6239_s2 + $0x78] sm:$0xff] %vm572_vm2, %v2679_v7  ;;  %v2626_v14 = vsub.f32 %v7261_v9, %v5783_v51  ;;  %v2699_v7 = vmul.f32 %v5795_v33, %v2624_v4  ;;  %v2700_v28 = vmul.f32 %v5795_v33, %v2625_v36  ;;  %v7271_v4 = vld [vmem:[#allocation60_spill] sm:$0xff]  ;;  %v2650_v36 = vsub.f32 %v7272_v55, %v5783_v51  ;;  %v7273_v9 = vld [vmem:[#allocation39_spill] sm:$0xff] }
 0x34a   :  { %2744 = vst.msk [vmem:[%s6239_s2 + $0x80] sm:$0xff] %vm572_vm2, %v2680_v25  ;;  %v2627_v25 = vsub.f32 %v7262_v41, %v5783_v51  ;;  %v7274_v41 = vld [vmem:[#allocation65_spill] sm:$0xff] }
 0x34b   :  { %2745 = vst.msk [vmem:[%s6239_s2 + $0x88] sm:$0xff] %vm572_vm2, %v2681_v2  ;;  %v2628_v2 = vsub.f32 %v7228_v52, %v5783_v51  ;;  %v2701_v10 = vmul.f32 %v5795_v33, %v2626_v14  ;;  %v2651_v14 = vsub.f32 %v7273_v9, %v5783_v51 }
 0x34c   :  { %2746 = vst.msk [vmem:[%s6239_s2 + $0x90] sm:$0xff] %vm572_vm2, %v2682_v23  ;;  %v2629_v23 = vsub.f32 %v7229_v40, %v5783_v51  ;;  %v2702_v6 = vmul.f32 %v5795_v33, %v2627_v25  ;;  %v2631_v40 = vsub.f32 %v7231_v11, %v5783_v51  ;;  %v2633_v11 = vsub.f32 %v7233_v37, %v5783_v51 }
 0x34d   :  { %2747 = vst.msk [vmem:[%s6239_s2 + $0x98] sm:$0xff] %vm572_vm2, %v2683_v47  ;;  %v7263_v47 = vld [vmem:[#allocation42_spill] sm:$0xff]  ;;  %v2703_v16 = vmul.f32 %v5795_v33, %v2628_v2  ;;  %v2635_v37 = vsub.f32 %v7235_v56, %v5783_v51  ;;  %v2637_v56 = vsub.f32 %v7237_v18, %v5783_v51  ;;  %v2639_v18 = vsub.f32 %v7239_v27, %v5783_v51 }
 0x34e   :  { %2748 = vst.msk [vmem:[%s6239_s2 + $0xa0] sm:$0xff] %vm572_vm2, %v2684_v21  ;;  %v2630_v52 = vsub.f32 %v7263_v47, %v5783_v51  ;;  %v2704_v21 = vmul.f32 %v5795_v33, %v2629_v23  ;;  %v2641_v27 = vsub.f32 %v7241_v19, %v5783_v51  ;;  %v2643_v19 = vsub.f32 %v7243_v60, %v5783_v51 }
 0x34f   :  { %2749 = vst.msk [vmem:[%s6239_s2 + $0xa8] sm:$0xff] %vm572_vm2, %v2685_v57  ;;  %v2632_v57 = vsub.f32 %v7264_v17, %v5783_v51  ;;  %v2712_v0 = vmul.f32 %v5795_v33, %v2637_v56  ;;  %v2714_v5 = vmul.f32 %v5795_v33, %v2639_v18  ;;  %v2645_v60 = vsub.f32 %v7245_v61, %v5783_v51 }
 0x350   :  { %2750 = vst.msk [vmem:[%s6239_s2 + $0xb0] sm:$0xff] %vm572_vm2, %v2686_v30  ;;  %v2705_v35 = vmul.f32 %v5795_v33, %v2630_v52  ;;  %v2706_v30 = vmul.f32 %v5795_v33, %v2631_v40  ;;  %v2647_v61 = vsub.f32 %v7247_v3, %v5783_v51  ;;  %v2649_v3 = vsub.f32 %v7271_v4, %v5783_v51 }
 0x351   :  { %2751 = vst.msk [vmem:[%s6239_s2 + $0xb8] sm:$0xff] %vm572_vm2, %v2687_v24  ;;  %v2634_v24 = vsub.f32 %v7265_v42, %v5783_v51  ;;  %v2707_v22 = vmul.f32 %v5795_v33, %v2632_v57  ;;  %v2720_v39 = vmul.f32 %v5795_v33, %v2645_v60  ;;  %v2652_v25 = vsub.f32 %v7274_v41, %v5783_v51 }
 0x352   :  { %2752 = vst.msk [vmem:[%s6239_s2 + $0xc0] sm:$0xff] %vm572_vm2, %v2688_v49  ;;  %v2708_v49 = vmul.f32 %v5795_v33, %v2633_v11  ;;  %v2726_v2 = vmul.f32 %v5795_v33, %v2651_v14 }
 0x353   :  { %2753 = vst.msk [vmem:[%s6239_s2 + $0xc8] sm:$0xff] %vm572_vm2, %v2689_v8  ;;  %v2636_v8 = vsub.f32 %v7266_v15, %v5783_v51  ;;  %v2709_v26 = vmul.f32 %v5795_v33, %v2634_v24 }
 0x354   :  { %2754 = vst.msk [vmem:[%s6239_s2 + $0xd0] sm:$0xff] %vm572_vm2, %v2690_v63  ;;  %v2710_v63 = vmul.f32 %v5795_v33, %v2635_v37 }
 0x355   :  { %2755 = vst.msk [vmem:[%s6239_s2 + $0xd8] sm:$0xff] %vm572_vm2, %v2691_v20  ;;  %v2711_v20 = vmul.f32 %v5795_v33, %v2636_v8 }
 0x356   :  { %2756 = vst.msk [vmem:[%s6239_s2 + $0xe0] sm:$0xff] %vm572_vm2, %v2692_v59  ;;  %v2640_v59 = vsub.f32 %v7268_v43, %v5783_v51 }
 0x357   :  { %2757 = vst.msk [vmem:[%s6239_s2 + $0xe8] sm:$0xff] %vm572_vm2, %v2693_v48  ;;  %v7269_v48 = vld [vmem:[#allocation4_spill] sm:$0xff] }
 0x358   :  { %2758 = vst.msk [vmem:[%s6239_s2 + $0xf0] sm:$0xff] %vm572_vm2, %v2694_v54  ;;  %v2642_v58 = vsub.f32 %v7269_v48, %v5783_v51  ;;  %v2715_v13 = vmul.f32 %v5795_v33, %v2640_v59  ;;  %v2716_v54 = vmul.f32 %v5795_v33, %v2641_v27 }
 0x359   :  { %2759 = vst.msk [vmem:[%s6239_s2 + $0xf8] sm:$0xff] %vm572_vm2, %v2695_v29  ;;  %v2718_v29 = vmul.f32 %v5795_v33, %v2643_v19 }
 0x35a   :  { %2760 = vst.msk [vmem:[%s6239_s2 + $0x100] sm:$0xff] %vm572_vm2, %v2696_v38  ;;  %v2717_v62 = vmul.f32 %v5795_v33, %v2642_v58  ;;  %v7270_v38 = vld [vmem:[#allocation49_spill] sm:$0xff] }
 0x35b   :  { %2761 = vst.msk [vmem:[%s6239_s2 + $0x108] sm:$0xff] %vm572_vm2, %v2697_v50  ;;  %v2648_v46 = vsub.f32 %v7270_v38, %v5783_v51  ;;  %v2722_v50 = vmul.f32 %v5795_v33, %v2647_v61 }
 0x35c   :  { %2762 = vst.msk [vmem:[%s6239_s2 + $0x110] sm:$0xff] %vm572_vm2, %v2698_v12 }
 0x35d   :  { %2763 = vst.msk [vmem:[%s6239_s2 + $0x118] sm:$0xff] %vm572_vm2, %v2699_v7  ;;  %v2723_v12 = vmul.f32 %v5795_v33, %v2648_v46  ;;  %v2724_v7 = vmul.f32 %v5795_v33, %v2649_v3 }
 0x35e   :  { %2764 = vst.msk [vmem:[%s6239_s2 + $0x120] sm:$0xff] %vm572_vm2, %v2700_v28  ;;  %v2725_v28 = vmul.f32 %v5795_v33, %v2650_v36 }
 0x35f   :  { %2765 = vst.msk [vmem:[%s6239_s2 + $0x128] sm:$0xff] %vm572_vm2, %v2701_v10  ;;  %v2727_v10 = vmul.f32 %v5795_v33, %v2652_v25 }
 0x360   :  { %2766 = vst.msk [vmem:[%s6239_s2 + $0x130] sm:$0xff] %vm572_vm2, %v2702_v6 }
 0x361   :  { %2767 = vst.msk [vmem:[%s6239_s2 + $0x138] sm:$0xff] %vm572_vm2, %v2703_v16 }
 0x362   :  { %2768 = vst.msk [vmem:[%s6239_s2 + $0x140] sm:$0xff] %vm572_vm2, %v2704_v21 }
 0x363   :  { %2769 = vst.msk [vmem:[%s6239_s2 + $0x148] sm:$0xff] %vm572_vm2, %v2705_v35 }
 0x364   :  { %2770 = vst.msk [vmem:[%s6239_s2 + $0x150] sm:$0xff] %vm572_vm2, %v2706_v30 }
 0x365   :  { %2771 = vst.msk [vmem:[%s6239_s2 + $0x158] sm:$0xff] %vm572_vm2, %v2707_v22 }
 0x366   :  { %2772 = vst.msk [vmem:[%s6239_s2 + $0x160] sm:$0xff] %vm572_vm2, %v2708_v49 }
 0x367   :  { %2773 = vst.msk [vmem:[%s6239_s2 + $0x168] sm:$0xff] %vm572_vm2, %v2709_v26 }
 0x368   :  { %2774 = vst.msk [vmem:[%s6239_s2 + $0x170] sm:$0xff] %vm572_vm2, %v2710_v63 }
 0x369   :  { %2775 = vst.msk [vmem:[%s6239_s2 + $0x178] sm:$0xff] %vm572_vm2, %v2711_v20 }
 0x36a   :  { %2776 = vst.msk [vmem:[%s6239_s2 + $0x180] sm:$0xff] %vm572_vm2, %v2712_v0 }
 0x36b   :  { %2777 = vst.msk [vmem:[%s6239_s2 + $0x188] sm:$0xff] %vm572_vm2, %v2713_v1 }
 0x36c   :  { %2778 = vst.msk [vmem:[%s6239_s2 + $0x190] sm:$0xff] %vm572_vm2, %v2714_v5 }
 0x36d   :  { %2779 = vst.msk [vmem:[%s6239_s2 + $0x198] sm:$0xff] %vm572_vm2, %v2715_v13 }
 0x36e   :  { %2780 = vst.msk [vmem:[%s6239_s2 + $0x1a0] sm:$0xff] %vm572_vm2, %v2716_v54 }
 0x36f   :  { %2781 = vst.msk [vmem:[%s6239_s2 + $0x1a8] sm:$0xff] %vm572_vm2, %v2717_v62 }
 0x370   :  { %2782 = vst.msk [vmem:[%s6239_s2 + $0x1b0] sm:$0xff] %vm572_vm2, %v2718_v29 }
 0x371   :  { %2783 = vst.msk [vmem:[%s6239_s2 + $0x1b8] sm:$0xff] %vm572_vm2, %v2719_v45 }
 0x372   :  { %2784 = vst.msk [vmem:[%s6239_s2 + $0x1c0] sm:$0xff] %vm572_vm2, %v2720_v39 }
 0x373   :  { %2785 = vst.msk [vmem:[%s6239_s2 + $0x1c8] sm:$0xff] %vm572_vm2, %v2721_v53 }
 0x374   :  { %2786 = vst.msk [vmem:[%s6239_s2 + $0x1d0] sm:$0xff] %vm572_vm2, %v2722_v50 }
 0x375   :  { %2787 = vst.msk [vmem:[%s6239_s2 + $0x1d8] sm:$0xff] %vm572_vm2, %v2723_v12 }
 0x376   :  { %2788 = vst.msk [vmem:[%s6239_s2 + $0x1e0] sm:$0xff] %vm572_vm2, %v2724_v7 }
 0x377   :  { %2789 = vst.msk [vmem:[%s6239_s2 + $0x1e8] sm:$0xff] %vm572_vm2, %v2725_v28 }
 0x378   :  { %2790 = vst.msk [vmem:[%s6239_s2 + $0x1f0] sm:$0xff] %vm572_vm2, %v2726_v2 }
 0x379   :  { %2791 = vst.msk [vmem:[%s6239_s2 + $0x1f8] sm:$0xff] %vm572_vm2, %v2727_v10 }

</bundles_post_ra>
